<compile_context>
chip_gen: v7x
topology: tpu7x:2x2x1
jax: 0.10.0
libtpu: 0.0.40
codegen_flags: <defaults>
</compile_context>

<pallas_src>
import math
from functools import partial

import jax
import jax.numpy as jnp
from jax.experimental import pallas as pl
from jax.experimental.pallas import tpu as pltpu

BF16 = jnp.bfloat16
LN_EPS = 1e-6

# ---- generation-aware tiling / VMEM budget ----
try:
    _VMEM_CAP = int(pltpu.get_tpu_info().vmem_capacity_bytes)
except Exception:
    _VMEM_CAP = 128 * 1024 * 1024
if _VMEM_CAP >= 96 * 1024 * 1024:          # v5e / v6e (128 MiB VMEM)
    TM, _VMEM_LIMIT = 512, 64 * 1024 * 1024
else:                                      # v7x (64 MiB VMEM): leave headroom
    TM, _VMEM_LIMIT = 256, 48 * 1024 * 1024


def _round_up(x, m):
    return ((x + m - 1) // m) * m


def _row_tile(m, tm=TM):
    """Row tile (multiple of 8) and padded row count it divides; prefers >=2 grid steps."""
    bm = min(tm, _round_up(m, 8))
    mp = _round_up(m, bm)
    if mp // bm == 1 and bm % 16 == 0 and bm >= 16:
        bm //= 2                            # 2 steps -> both v7x TensorCores used
    return bm, mp


def _pad_rows(x, mp):
    m = x.shape[0]
    if mp == m:
        return x
    return jnp.pad(x, ((0, mp - m),) + ((0, 0),) * (x.ndim - 1))


def _cparams():
    return pltpu.CompilerParams(dimension_semantics=("parallel",),
                                vmem_limit_bytes=_VMEM_LIMIT)


# ----------------------------- embedding linears -----------------------------

def _linear_kernel(x_ref, w_ref, b_ref, o_ref, *, relu):
    y = jnp.dot(x_ref[...], w_ref[...], preferred_element_type=jnp.float32) + b_ref[...]
    if relu:
        y = jnp.maximum(y, 0.0)
    o_ref[...] = y


def linear_pallas(x, w, b=None, relu=False):
    """y = relu?(x @ w + b). bf16 MXU operands, f32 accumulation/output."""
    din, dout = w.shape
    if b is None:
        b = jnp.zeros((dout,), jnp.float32)
    dinp = _round_up(din, 8)
    if dinp != din:
        x = jnp.pad(x, ((0, 0), (0, dinp - din)))
        w = jnp.pad(w, ((0, dinp - din), (0, 0)))
    m = x.shape[0]
    bm, mp = _row_tile(m)
    x = _pad_rows(x, mp)
    out = pl.pallas_call(
        partial(_linear_kernel, relu=relu),
        out_shape=jax.ShapeDtypeStruct((mp, dout), jnp.float32),
        grid=(mp // bm,),
        in_specs=[
            pl.BlockSpec((bm, dinp), lambda i: (i, 0)),
            pl.BlockSpec((dinp, dout), lambda i: (0, 0)),
            pl.BlockSpec((1, dout), lambda i: (0, 0)),
        ],
        out_specs=pl.BlockSpec((bm, dout), lambda i: (i, 0)),
        compiler_params=_cparams(),
    )(x.astype(BF16), w.astype(BF16), b.astype(jnp.float32).reshape(1, dout))
    return out[:m]


# ----------------------------- fused decoder layer -----------------------------

def _layer_kernel(hv_ref, em_ref, hvg_ref,
                  wq_ref, wkem_ref, wkhv_ref, wvem_ref, wvhv_ref, wo_ref,
                  sel_ref, selt_ref, g0_ref, bt0_ref,
                  w1_ref, bf1_ref, w2_ref, bf2_ref, g1_ref, bt1_ref,
                  o_ref, *, hidden, heads, kk, k_real, scale, eps):
    bm = hv_ref.shape[0]
    hv = hv_ref[...]                                                  # (bm, H) f32
    em = em_ref[...]                                                  # (bm*kk, 2H) bf16
    hvg = hvg_ref[...]                                                # (bm*kk, H)  bf16

    # --- fused KV projection: KV never leaves VMEM, stored bf16 ---
    k_all = (jnp.dot(em, wkem_ref[...], preferred_element_type=jnp.float32)
             + jnp.dot(hvg, wkhv_ref[...], preferred_element_type=jnp.float32)).astype(BF16)
    v_all = (jnp.dot(em, wvem_ref[...], preferred_element_type=jnp.float32)
             + jnp.dot(hvg, wvhv_ref[...], preferred_element_type=jnp.float32)).astype(BF16)

    # --- Q projection ---
    q = jnp.dot(hv.astype(BF16), wq_ref[...], preferred_element_type=jnp.float32)  # (bm, H)

    # --- per-head logits via MXU head-selector matmul (no lane slicing / concat) ---
    k3 = k_all.reshape(bm, kk, hidden)                                # kk % 8 == 0 -> layout-free
    prod = q[:, None, :] * k3                                         # (bm, kk, H) f32
    logits = jnp.dot(prod.reshape(bm * kk, hidden).astype(BF16), sel_ref[...],
                     preferred_element_type=jnp.float32)              # (bm*kk, heads)
    logits = logits.reshape(bm, kk, heads) * scale
    if kk != k_real:                                                  # static: mask K padding
        kidx = jax.lax.broadcasted_iota(jnp.int32, (bm, kk, heads), 1)
        logits = jnp.where(kidx < k_real, logits, -1e30)

    # --- softmax over neighbors (reference has no attention mask) ---
    mx = jnp.max(logits, axis=1)                                      # (bm, heads)
    e = jnp.exp(logits - mx[:, None, :])
    den = jnp.sum(e, axis=1)                                          # (bm, heads)
    attn = e * pl.reciprocal(den, approx=True)[:, None, :]            # (bm, kk, heads)

    # --- expand heads back to H lanes on the MXU, weight V, reduce over neighbors ---
    attn_full = jnp.dot(attn.reshape(bm * kk, heads).astype(BF16), selt_ref[...],
                        preferred_element_type=jnp.float32)           # (bm*kk, H)
    ctx = jnp.sum((attn_full * v_all).reshape(bm, kk, hidden), axis=1)  # (bm, H) f32

    # --- W_O + residual + LayerNorm0 (dropout = identity) ---
    dh = jnp.dot(ctx.astype(BF16), wo_ref[...], preferred_element_type=jnp.float32)
    x = hv + dh
    mu = jnp.mean(x, axis=-1, keepdims=True)
    var = jnp.mean((x - mu) ** 2, axis=-1, keepdims=True)
    x = (x - mu) * jax.lax.rsqrt(var + eps) * g0_ref[...] + bt0_ref[...]

    # --- FFN + residual + LayerNorm1 (4H intermediate stays in VMEM) ---
    h1 = jnp.dot(x.astype(BF16), w1_ref[...], preferred_element_type=jnp.float32) + bf1_ref[...]
    h1 = jnp.maximum(h1, 0.0)
    dh2 = jnp.dot(h1.astype(BF16), w2_ref[...], preferred_element_type=jnp.float32) + bf2_ref[...]
    y = x + dh2
    mu = jnp.mean(y, axis=-1, keepdims=True)
    var = jnp.mean((y - mu) ** 2, axis=-1, keepdims=True)
    o_ref[...] = (y - mu) * jax.lax.rsqrt(var + eps) * g1_ref[...] + bt1_ref[...]


def transformer_layer_pallas(h_v, em, hvg, lp_, sel, selt, *, bm, kk, k_real, heads, scale):
    """One TransformerLayer: h_v (Mp,H) f32, em (Mp*kk,2H) bf16, hvg (Mp*kk,H) bf16."""
    mp, hidden = h_v.shape
    h2 = 2 * hidden
    dff = lp_["ff_w1"].shape[1]
    wkem = lp_["W_K"][:h2].astype(BF16)
    wkhv = lp_["W_K"][h2:].astype(BF16)
    wvem = lp_["W_V"][:h2].astype(BF16)
    wvhv = lp_["W_V"][h2:].astype(BF16)
    full = lambda i: (0, 0)
    # TODO(synk): consider pipeline_mode=pl.Buffered(3) on the em/hvg streams for v5e/v6e.
    out = pl.pallas_call(
        partial(_layer_kernel, hidden=hidden, heads=heads, kk=kk, k_real=k_real,
                scale=scale, eps=LN_EPS),
        out_shape=jax.ShapeDtypeStruct((mp, hidden), jnp.float32),
        grid=(mp // bm,),
        in_specs=[
            pl.BlockSpec((bm, hidden), lambda i: (i, 0)),
            pl.BlockSpec((bm * kk, h2), lambda i: (i, 0)),
            pl.BlockSpec((bm * kk, hidden), lambda i: (i, 0)),
            pl.BlockSpec((hidden, hidden), full),   # W_Q
            pl.BlockSpec((h2, hidden), full),       # W_K (edge/seq rows)
            pl.BlockSpec((hidden, hidden), full),   # W_K (node rows)
            pl.BlockSpec((h2, hidden), full),       # W_V (edge/seq rows)
            pl.BlockSpec((hidden, hidden), full),   # W_V (node rows)
            pl.BlockSpec((hidden, hidden), full),   # W_O
            pl.BlockSpec((hidden, heads), full),    # head selector
            pl.BlockSpec((heads, hidden), full),    # head selector^T
            pl.BlockSpec((1, hidden), full),        # LN0 gamma
            pl.BlockSpec((1, hidden), full),        # LN0 beta
            pl.BlockSpec((hidden, dff), full),      # W_in
            pl.BlockSpec((1, dff), full),           # b_in
            pl.BlockSpec((dff, hidden), full),      # W_out (ffn)
            pl.BlockSpec((1, hidden), full),        # b_out (ffn)
            pl.BlockSpec((1, hidden), full),        # LN1 gamma
            pl.BlockSpec((1, hidden), full),        # LN1 beta
        ],
        out_specs=pl.BlockSpec((bm, hidden), lambda i: (i, 0)),
        compiler_params=_cparams(),
    )(h_v, em, hvg,
      lp_["W_Q"].astype(BF16), wkem, wkhv, wvem, wvhv, lp_["W_O"].astype(BF16),
      sel, selt,
      lp_["ln0_g"].reshape(1, hidden), lp_["ln0_b"].reshape(1, hidden),
      lp_["ff_w1"].astype(BF16), lp_["ff_b1"].reshape(1, dff),
      lp_["ff_w2"].astype(BF16), lp_["ff_b2"].reshape(1, hidden),
      lp_["ln1_g"].reshape(1, hidden), lp_["ln1_b"].reshape(1, hidden))
    return out


# ----------------------------- decoder W_out + Attention1d head -----------------------------

def _head_kernel(h_ref, m_ref, wdec_ref, bdec_ref, wa_ref, ba_ref, wout_ref, bout_ref, o_ref,
                 *, bt, lp, hidden):
    h = h_ref[...]                                                    # (bt*lp, H) f32
    logits = jnp.dot(h.astype(BF16), wdec_ref[...],
                     preferred_element_type=jnp.float32) + bdec_ref[...]        # (bt*lp, H)
    a = jnp.sum(logits * wa_ref[...], axis=-1, keepdims=True) + ba_ref[...]     # (bt*lp, 1)
    a = jnp.where(m_ref[...] > 0, a, -1e30)                           # masked softmax over L
    a3 = a.reshape(bt, lp, 1)
    mx = jnp.max(a3, axis=1)                                          # (bt, 1)
    e = jnp.exp(a3 - mx[:, None, :])
    den = jnp.sum(e, axis=1)                                          # (bt, 1)
    attn = e * pl.reciprocal(den, approx=True)[:, None, :]            # (bt, lp, 1)
    pooled = jnp.sum(attn * logits.reshape(bt, lp, hidden), axis=1)   # (bt, H)
    pooled = jnp.maximum(pooled, 0.0)                                 # ReLU
    o_ref[0] = jnp.dot(pooled.astype(BF16), wout_ref[...],
                       preferred_element_type=jnp.float32) + bout_ref[...]


def decoder_head_pallas(h_seq, mask, w_dec, b_dec, w_attn, b_attn, w_out, b_out):
    """h_seq: (N, L, H) f32, mask: (N, L) f32 -> (N, d_out) f32."""
    n, l, hidden = h_seq.shape
    d_out = w_out.shape[1]
    lp = _round_up(l, 8)
    dp = _round_up(d_out, 128)                       # lane-dense output block
    bt = min(8, n)
    np_ = _round_up(n, bt)
    if np_ // bt == 1 and bt > 1:                    # keep >=2 grid steps when possible
        bt = max(1, bt // 2)
        np_ = _round_up(n, bt)
    h2 = jnp.pad(h_seq, ((0, np_ - n), (0, lp - l), (0, 0))).reshape(np_ * lp, hidden)
    m2 = jnp.pad(mask, ((0, np_ - n), (0, lp - l))).reshape(np_ * lp, 1).astype(jnp.float32)
    w_out_p = jnp.pad(w_out, ((0, 0), (0, dp - d_out))).astype(BF16)
    b_out_p = jnp.pad(b_out.reshape(1, -1), ((0, 0), (0, dp - d_out))).astype(jnp.float32)

    out = pl.pallas_call(
        partial(_head_kernel, bt=bt, lp=lp, hidden=hidden),
        out_shape=jax.ShapeDtypeStruct((np_ // bt, bt, dp), jnp.float32),
        grid=(np_ // bt,),
        in_specs=[
            pl.BlockSpec((bt * lp, hidden), lambda i: (i, 0)),
            pl.BlockSpec((bt * lp, 1), lambda i: (i, 0)),
            pl.BlockSpec((hidden, hidden), lambda i: (0, 0)),
            pl.BlockSpec((1, hidden), lambda i: (0, 0)),
            pl.BlockSpec((1, hidden), lambda i: (0, 0)),
            pl.BlockSpec((1, 1), lambda i: (0, 0)),
            pl.BlockSpec((hidden, dp), lambda i: (0, 0)),
            pl.BlockSpec((1, dp), lambda i: (0, 0)),
        ],
        out_specs=pl.BlockSpec((1, bt, dp), lambda i: (i, 0, 0)),
        compiler_params=_cparams(),
    )(h2, m2, w_dec.astype(BF16), b_dec.reshape(1, hidden),
      w_attn.reshape(1, hidden).astype(jnp.float32), b_attn.reshape(1, 1),
      w_out_p, b_out_p)
    return out.reshape(np_, dp)[:n, :d_out]


# ----------------------------- parameters -----------------------------

def _init_linear(key, din, dout, bias=True):
    kw, kb = jax.random.split(key)
    w = jax.random.normal(kw, (din, dout), jnp.float32) * (1.0 / math.sqrt(din))
    b = (jax.random.normal(kb, (dout,), jnp.float32) * 0.01) if bias else None
    return w, b


def init_params(key, node_features, edge_features, hidden_dim, d_out, num_layers=3):
    H = hidden_dim
    ks = iter(jax.random.split(key, 8 + 8 * num_layers))
    p = {}
    p["W_v"], p["b_v"] = _init_linear(next(ks), node_features, H)
    p["W_e"], p["b_e"] = _init_linear(next(ks), edge_features, H)
    # Struct2Property passes num_letters = hidden_dim -> Embedding(H, H)
    p["W_s"] = jax.random.normal(next(ks), (H, H), jnp.float32) * 0.1
    layers = []
    for _ in range(num_layers):
        lp = {}
        lp["W_Q"], _ = _init_linear(next(ks), H, H, bias=False)
        lp["W_K"], _ = _init_linear(next(ks), 3 * H, H, bias=False)
        lp["W_V"], _ = _init_linear(next(ks), 3 * H, H, bias=False)
        lp["W_O"], _ = _init_linear(next(ks), H, H, bias=False)
        lp["ln0_g"] = jnp.ones((H,), jnp.float32)
        lp["ln0_b"] = jnp.zeros((H,), jnp.float32)
        lp["ln1_g"] = jnp.ones((H,), jnp.float32)
        lp["ln1_b"] = jnp.zeros((H,), jnp.float32)
        lp["ff_w1"], lp["ff_b1"] = _init_linear(next(ks), H, 4 * H)
        lp["ff_w2"], lp["ff_b2"] = _init_linear(next(ks), 4 * H, H)
        layers.append(lp)
    p["layers"] = layers
    p["W_dec_out"], p["b_dec_out"] = _init_linear(next(ks), H, H)   # W_out: H -> num_letters(=H)
    p["attn1d_w"] = jax.random.normal(next(ks), (H,), jnp.float32) * (1.0 / math.sqrt(H))
    p["attn1d_b"] = jnp.zeros((1, 1), jnp.float32)
    p["out_w"], p["out_b"] = _init_linear(next(ks), H, d_out)
    return p


# ----------------------------- forward pass -----------------------------

def struct2property_forward(params, nodes, edges, connections, src, edge_mask, input_mask=None):
    N, L, _ = nodes.shape
    K = connections.shape[2]
    H = params["W_v"].shape[1]
    heads = 4                                   # TransformerLayer default num_heads
    d = H // heads
    scale = 1.0 / math.sqrt(d)
    M = N * L
    bm, Mp = _row_tile(M)
    Kp = _round_up(K, 8)

    def gather_nodes(x, idx):                   # torch.gather along dim 1
        return jax.vmap(lambda xb, ib: xb[ib])(x, idx)

    # ---- embeddings ----
    h_V = linear_pallas(nodes.reshape(M, -1), params["W_v"], params["b_v"])            # (M, H)
    h_E = linear_pallas(edges.reshape(M * K, -1), params["W_e"], params["b_e"])        # (M*K, H)
    h_S = params["W_s"][src]                                                           # (N, L, H)

    # no_structure check (h_V *= 0; h_E *= 0 when everything is zero)
    no_struct = jnp.logical_and(jnp.all(nodes == 0), jnp.all(edges == 0))
    s = jnp.where(no_struct, 0.0, 1.0).astype(jnp.float32)
    h_V = h_V * s
    h_E = (h_E * s).reshape(N, L, K, H)

    # direction='bidirectional' (Struct2Property default) -> (connections - ii) > 0 branch
    ii = jnp.arange(L).reshape(1, L, 1)
    mask_fw = ((connections - ii) > 0).astype(jnp.float32)[..., None]                  # (N,L,K,1)

    # Only the non-zero H-blocks of h_ESV are ever materialized (zeros of the reference
    # cancel structurally):  [mask_fw*edge_mask*h_E | mask_fw*gather(h_S) | mask_fw*gather(h_V)].
    # The first two blocks are constant across layers: build, pad and cast to bf16 once.
    em = jnp.concatenate([mask_fw * edge_mask * h_E,
                          mask_fw * gather_nodes(h_S, connections)], axis=-1)          # (N,L,K,2H)
    em = jnp.pad(em, ((0, 0), (0, 0), (0, Kp - K), (0, 0))).reshape(M * Kp, 2 * H)
    em = jnp.pad(em, ((0, (Mp - M) * Kp), (0, 0))).astype(BF16)                        # (Mp*Kp, 2H)

    # flat neighbor indices + forward mask for the per-layer h_V gather (built once, padded)
    base = (jnp.arange(N) * L).reshape(N, 1, 1)
    flat_conn = jnp.pad((connections + base).reshape(M, K),
                        ((0, Mp - M), (0, Kp - K))).reshape(Mp * Kp)
    mask_flat = jnp.pad(mask_fw.reshape(M, K),
                        ((0, Mp - M), (0, Kp - K))).reshape(Mp * Kp, 1)

    # block-diagonal head-selector matrices (head split/merge runs on the MXU)
    sel = (jnp.arange(H)[:, None] // d == jnp.arange(heads)[None, :]).astype(BF16)     # (H, heads)
    selt = (jnp.arange(heads)[:, None] == jnp.arange(H)[None, :] // d).astype(BF16)    # (heads, H)

    h_V = _pad_rows(h_V, Mp)                                                           # (Mp, H) f32

    for lp_ in params["layers"]:
        # per-layer third block of h_ESV: mask_fw * gather(h_V), fused gather+mask+cast
        hvg = (h_V[flat_conn] * mask_flat).astype(BF16)                                # (Mp*Kp, H)
        h_V = transformer_layer_pallas(h_V, em, hvg, lp_, sel, selt,
                                       bm=bm, kk=Kp, k_real=K, heads=heads, scale=scale)

    if input_mask is None:
        input_mask = jnp.ones((N, L), jnp.float32)
    out = decoder_head_pallas(
        h_V[:M].reshape(N, L, H), input_mask.astype(jnp.float32),
        params["W_dec_out"], params["b_dec_out"],
        params["attn1d_w"], params["attn1d_b"],
        params["out_w"], params["out_b"])
    return out                                                                         # (N, d_out)


# ----------------------------- demo -----------------------------

if __name__ == "__main__":
    N, L, K = 2, 16, 8
    node_features, edge_features, hidden_dim, d_out = 10, 6, 32, 4

    key = jax.random.PRNGKey(0)
    k = jax.random.split(key, 6)
    nodes = jax.random.normal(k[0], (N, L, node_features), jnp.float32)
    edges = jax.random.normal(k[1], (N, L, K, edge_features), jnp.float32)
    connections = jax.random.randint(k[2], (N, L, K), 0, L)
    src = jax.random.randint(k[3], (N, L), 0, hidden_dim)
    edge_mask = jnp.ones((N, L, K, 1), jnp.float32)

    params = init_params(jax.random.PRNGKey(42), node_features, edge_features,
                         hidden_dim, d_out, num_layers=3)

    fwd = jax.jit(struct2property_forward)
    out = fwd(params, nodes, edges, connections, src, edge_mask)
    jax.block_until_ready(out)
    assert out.shape == (N, d_out)
    print("KERNEL_OK")
</pallas_src>

<mosaic_0001>
module attributes {stable_mosaic.version = 11 : i64} {
  func.func @_linear_kernel(%arg0: i32, %arg1: memref<16x16xbf16, #tpu.memory_space<vmem>>, %arg2: memref<16x32xbf16, #tpu.memory_space<vmem>>, %arg3: memref<1x32xf32, #tpu.memory_space<vmem>>, %arg4: memref<16x32xf32, #tpu.memory_space<vmem>>) attributes {dimension_semantics = [#tpu.dimension_semantics<parallel>], iteration_bounds = array<i64: 2>, scalar_prefetch = 0 : i64, scratch_operands = 0 : i64, tpu.core_type = #tpu.core_type<tc>, window_params = [{transform_indices = @transform_0, window_bounds = array<i64: 16, 16>}, {pipeline_mode = #tpu.pipeline_mode<synchronous>, transform_indices = @transform_1, window_bounds = array<i64: 16, 32>}, {pipeline_mode = #tpu.pipeline_mode<synchronous>, transform_indices = @transform_2, window_bounds = array<i64: 1, 32>}, {transform_indices = @transform_3, window_bounds = array<i64: 16, 32>}]} {
    %c0 = arith.constant 0 : index
    %c0_0 = arith.constant 0 : index
    %0 = vector.load %arg1[%c0, %c0_0] : memref<16x16xbf16, #tpu.memory_space<vmem>>, vector<16x16xbf16>
    %c0_1 = arith.constant 0 : index
    %c0_2 = arith.constant 0 : index
    %1 = vector.load %arg2[%c0_1, %c0_2] : memref<16x32xbf16, #tpu.memory_space<vmem>>, vector<16x32xbf16>
    %cst = arith.constant dense<0.000000e+00> : vector<16x32xf32>
    %2 = tpu.matmul %0, %1, %cst {dimension_numbers = #tpu.dot_dimension_numbers<[1], [0], [0], [1], [0, 0, 1, 1], [], []>} : vector<16x16xbf16>, vector<16x32xbf16>, vector<16x32xf32> -> vector<16x32xf32>
    %c0_3 = arith.constant 0 : index
    %c0_4 = arith.constant 0 : index
    %3 = vector.load %arg3[%c0_3, %c0_4] : memref<1x32xf32, #tpu.memory_space<vmem>>, vector<1x32xf32>
    %4 = vector.broadcast %3 : vector<1x32xf32> to vector<16x32xf32>
    %5 = arith.addf %2, %4 : vector<16x32xf32>
    %c0_5 = arith.constant 0 : index
    %c0_6 = arith.constant 0 : index
    %6 = vector.load %arg4[%c0_5, %c0_6] : memref<16x32xf32, #tpu.memory_space<vmem>>, vector<16x32xf32>
    tpu.vector_store %arg4[%c0_5, %c0_6], %5 {strides = array<i32>} : memref<16x32xf32, #tpu.memory_space<vmem>>, vector<16x32xf32>,
    return
  }
  func.func @transform_0(%arg0: i32) -> (i32, i32) {
    %c0_i32 = arith.constant 0 : i32
    %c0_i32_0 = arith.constant 0 : i32
    return %arg0, %c0_i32 : i32, i32
  }
  func.func @transform_1(%arg0: i32) -> (i32, i32) {
    %c0_i32 = arith.constant 0 : i32
    %c0_i32_0 = arith.constant 0 : i32
    %c0_i32_1 = arith.constant 0 : i32
    return %c0_i32, %c0_i32_0 : i32, i32
  }
  func.func @transform_2(%arg0: i32) -> (i32, i32) {
    %c0_i32 = arith.constant 0 : i32
    %c0_i32_0 = arith.constant 0 : i32
    %c0_i32_1 = arith.constant 0 : i32
    return %c0_i32, %c0_i32_0 : i32, i32
  }
  func.func @transform_3(%arg0: i32) -> (i32, i32) {
    %c0_i32 = arith.constant 0 : i32
    %c0_i32_0 = arith.constant 0 : i32
    return %arg0, %c0_i32 : i32, i32
  }
}

module attributes {stable_mosaic.version = 11 : i64} {
  func.func @_linear_kernel(%arg0: i32, %arg1: memref<128x8xbf16, #tpu.memory_space<vmem>>, %arg2: memref<8x32xbf16, #tpu.memory_space<vmem>>, %arg3: memref<1x32xf32, #tpu.memory_space<vmem>>, %arg4: memref<128x32xf32, #tpu.memory_space<vmem>>) attributes {dimension_semantics = [#tpu.dimension_semantics<parallel>], iteration_bounds = array<i64: 2>, scalar_prefetch = 0 : i64, scratch_operands = 0 : i64, tpu.core_type = #tpu.core_type<tc>, window_params = [{transform_indices = @transform_0, window_bounds = array<i64: 128, 8>}, {pipeline_mode = #tpu.pipeline_mode<synchronous>, transform_indices = @transform_1, window_bounds = array<i64: 8, 32>}, {pipeline_mode = #tpu.pipeline_mode<synchronous>, transform_indices = @transform_2, window_bounds = array<i64: 1, 32>}, {transform_indices = @transform_3, window_bounds = array<i64: 128, 32>}]} {
    %c0 = arith.constant 0 : index
    %c0_0 = arith.constant 0 : index
    %0 = vector.load %arg1[%c0, %c0_0] : memref<128x8xbf16, #tpu.memory_space<vmem>>, vector<128x8xbf16>
    %c0_1 = arith.constant 0 : index
    %c0_2 = arith.constant 0 : index
    %1 = vector.load %arg2[%c0_1, %c0_2] : memref<8x32xbf16, #tpu.memory_space<vmem>>, vector<8x32xbf16>
    %cst = arith.constant dense<0.000000e+00> : vector<128x32xf32>
    %2 = tpu.matmul %0, %1, %cst {dimension_numbers = #tpu.dot_dimension_numbers<[1], [0], [0], [1], [0, 0, 1, 1], [], []>} : vector<128x8xbf16>, vector<8x32xbf16>, vector<128x32xf32> -> vector<128x32xf32>
    %c0_3 = arith.constant 0 : index
    %c0_4 = arith.constant 0 : index
    %3 = vector.load %arg3[%c0_3, %c0_4] : memref<1x32xf32, #tpu.memory_space<vmem>>, vector<1x32xf32>
    %4 = vector.broadcast %3 : vector<1x32xf32> to vector<128x32xf32>
    %5 = arith.addf %2, %4 : vector<128x32xf32>
    %c0_5 = arith.constant 0 : index
    %c0_6 = arith.constant 0 : index
    %6 = vector.load %arg4[%c0_5, %c0_6] : memref<128x32xf32, #tpu.memory_space<vmem>>, vector<128x32xf32>
    tpu.vector_store %arg4[%c0_5, %c0_6], %5 {strides = array<i32>} : memref<128x32xf32, #tpu.memory_space<vmem>>, vector<128x32xf32>,
    return
  }
  func.func @transform_0(%arg0: i32) -> (i32, i32) {
    %c0_i32 = arith.constant 0 : i32
    %c0_i32_0 = arith.constant 0 : i32
    return %arg0, %c0_i32 : i32, i32
  }
  func.func @transform_1(%arg0: i32) -> (i32, i32) {
    %c0_i32 = arith.constant 0 : i32
    %c0_i32_0 = arith.constant 0 : i32
    %c0_i32_1 = arith.constant 0 : i32
    return %c0_i32, %c0_i32_0 : i32, i32
  }
  func.func @transform_2(%arg0: i32) -> (i32, i32) {
    %c0_i32 = arith.constant 0 : i32
    %c0_i32_0 = arith.constant 0 : i32
    %c0_i32_1 = arith.constant 0 : i32
    return %c0_i32, %c0_i32_0 : i32, i32
  }
  func.func @transform_3(%arg0: i32) -> (i32, i32) {
    %c0_i32 = arith.constant 0 : i32
    %c0_i32_0 = arith.constant 0 : i32
    return %arg0, %c0_i32 : i32, i32
  }
}

module attributes {stable_mosaic.version = 11 : i64} {
  func.func @_layer_kernel(%arg0: i32, %arg1: memref<16x32xf32, #tpu.memory_space<vmem>>, %arg2: memref<128x64xbf16, #tpu.memory_space<vmem>>, %arg3: memref<128x32xbf16, #tpu.memory_space<vmem>>, %arg4: memref<32x32xbf16, #tpu.memory_space<vmem>>, %arg5: memref<64x32xbf16, #tpu.memory_space<vmem>>, %arg6: memref<32x32xbf16, #tpu.memory_space<vmem>>, %arg7: memref<64x32xbf16, #tpu.memory_space<vmem>>, %arg8: memref<32x32xbf16, #tpu.memory_space<vmem>>, %arg9: memref<32x32xbf16, #tpu.memory_space<vmem>>, %arg10: memref<32x4xbf16, #tpu.memory_space<vmem>>, %arg11: memref<4x32xbf16, #tpu.memory_space<vmem>>, %arg12: memref<1x32xf32, #tpu.memory_space<vmem>>, %arg13: memref<1x32xf32, #tpu.memory_space<vmem>>, %arg14: memref<32x128xbf16, #tpu.memory_space<vmem>>, %arg15: memref<1x128xf32, #tpu.memory_space<vmem>>, %arg16: memref<128x32xbf16, #tpu.memory_space<vmem>>, %arg17: memref<1x32xf32, #tpu.memory_space<vmem>>, %arg18: memref<1x32xf32, #tpu.memory_space<vmem>>, %arg19: memref<1x32xf32, #tpu.memory_space<vmem>>, %arg20: memref<16x32xf32, #tpu.memory_space<vmem>>) attributes {dimension_semantics = [#tpu.dimension_semantics<parallel>], iteration_bounds = array<i64: 2>, scalar_prefetch = 0 : i64, scratch_operands = 0 : i64, tpu.core_type = #tpu.core_type<tc>, window_params = [{transform_indices = @transform_0, window_bounds = array<i64: 16, 32>}, {transform_indices = @transform_1, window_bounds = array<i64: 128, 64>}, {transform_indices = @transform_2, window_bounds = array<i64: 128, 32>}, {pipeline_mode = #tpu.pipeline_mode<synchronous>, transform_indices = @transform_3, window_bounds = array<i64: 32, 32>}, {pipeline_mode = #tpu.pipeline_mode<synchronous>, transform_indices = @transform_4, window_bounds = array<i64: 64, 32>}, {pipeline_mode = #tpu.pipeline_mode<synchronous>, transform_indices = @transform_5, window_bounds = array<i64: 32, 32>}, {pipeline_mode = #tpu.pipeline_mode<synchronous>, transform_indices = @transform_6, window_bounds = array<i64: 64, 32>}, {pipeline_mode = #tpu.pipeline_mode<synchronous>, transform_indices = @transform_7, window_bounds = array<i64: 32, 32>}, {pipeline_mode = #tpu.pipeline_mode<synchronous>, transform_indices = @transform_8, window_bounds = array<i64: 32, 32>}, {pipeline_mode = #tpu.pipeline_mode<synchronous>, transform_indices = @transform_9, window_bounds = array<i64: 32, 4>}, {pipeline_mode = #tpu.pipeline_mode<synchronous>, transform_indices = @transform_10, window_bounds = array<i64: 4, 32>}, {pipeline_mode = #tpu.pipeline_mode<synchronous>, transform_indices = @transform_11, window_bounds = array<i64: 1, 32>}, {pipeline_mode = #tpu.pipeline_mode<synchronous>, transform_indices = @transform_12, window_bounds = array<i64: 1, 32>}, {pipeline_mode = #tpu.pipeline_mode<synchronous>, transform_indices = @transform_13, window_bounds = array<i64: 32, 128>}, {pipeline_mode = #tpu.pipeline_mode<synchronous>, transform_indices = @transform_14, window_bounds = array<i64: 1, 128>}, {pipeline_mode = #tpu.pipeline_mode<synchronous>, transform_indices = @transform_15, window_bounds = array<i64: 128, 32>}, {pipeline_mode = #tpu.pipeline_mode<synchronous>, transform_indices = @transform_16, window_bounds = array<i64: 1, 32>}, {pipeline_mode = #tpu.pipeline_mode<synchronous>, transform_indices = @transform_17, window_bounds = array<i64: 1, 32>}, {pipeline_mode = #tpu.pipeline_mode<synchronous>, transform_indices = @transform_18, window_bounds = array<i64: 1, 32>}, {transform_indices = @transform_19, window_bounds = array<i64: 16, 32>}]} {
    %c0 = arith.constant 0 : index
    %c0_0 = arith.constant 0 : index
    %0 = vector.load %arg1[%c0, %c0_0] : memref<16x32xf32, #tpu.memory_space<vmem>>, vector<16x32xf32>
    %c0_1 = arith.constant 0 : index
    %c0_2 = arith.constant 0 : index
    %1 = vector.load %arg2[%c0_1, %c0_2] : memref<128x64xbf16, #tpu.memory_space<vmem>>, vector<128x64xbf16>
    %c0_3 = arith.constant 0 : index
    %c0_4 = arith.constant 0 : index
    %2 = vector.load %arg3[%c0_3, %c0_4] : memref<128x32xbf16, #tpu.memory_space<vmem>>, vector<128x32xbf16>
    %c0_5 = arith.constant 0 : index
    %c0_6 = arith.constant 0 : index
    %3 = vector.load %arg5[%c0_5, %c0_6] : memref<64x32xbf16, #tpu.memory_space<vmem>>, vector<64x32xbf16>
    %cst = arith.constant dense<0.000000e+00> : vector<128x32xf32>
    %4 = tpu.matmul %1, %3, %cst {dimension_numbers = #tpu.dot_dimension_numbers<[1], [0], [0], [1], [0, 0, 1, 1], [], []>} : vector<128x64xbf16>, vector<64x32xbf16>, vector<128x32xf32> -> vector<128x32xf32>
    %c0_7 = arith.constant 0 : index
    %c0_8 = arith.constant 0 : index
    %5 = vector.load %arg6[%c0_7, %c0_8] : memref<32x32xbf16, #tpu.memory_space<vmem>>, vector<32x32xbf16>
    %cst_9 = arith.constant dense<0.000000e+00> : vector<128x32xf32>
    %6 = tpu.matmul %2, %5, %cst_9 {dimension_numbers = #tpu.dot_dimension_numbers<[1], [0], [0], [1], [0, 0, 1, 1], [], []>} : vector<128x32xbf16>, vector<32x32xbf16>, vector<128x32xf32> -> vector<128x32xf32>
    %7 = arith.addf %4, %6 : vector<128x32xf32>
    %8 = arith.truncf %7 : vector<128x32xf32> to vector<128x32xbf16>
    %c0_10 = arith.constant 0 : index
    %c0_11 = arith.constant 0 : index
    %9 = vector.load %arg7[%c0_10, %c0_11] : memref<64x32xbf16, #tpu.memory_space<vmem>>, vector<64x32xbf16>
    %cst_12 = arith.constant dense<0.000000e+00> : vector<128x32xf32>
    %10 = tpu.matmul %1, %9, %cst_12 {dimension_numbers = #tpu.dot_dimension_numbers<[1], [0], [0], [1], [0, 0, 1, 1], [], []>} : vector<128x64xbf16>, vector<64x32xbf16>, vector<128x32xf32> -> vector<128x32xf32>
    %c0_13 = arith.constant 0 : index
    %c0_14 = arith.constant 0 : index
    %11 = vector.load %arg8[%c0_13, %c0_14] : memref<32x32xbf16, #tpu.memory_space<vmem>>, vector<32x32xbf16>
    %cst_15 = arith.constant dense<0.000000e+00> : vector<128x32xf32>
    %12 = tpu.matmul %2, %11, %cst_15 {dimension_numbers = #tpu.dot_dimension_numbers<[1], [0], [0], [1], [0, 0, 1, 1], [], []>} : vector<128x32xbf16>, vector<32x32xbf16>, vector<128x32xf32> -> vector<128x32xf32>
    %13 = arith.addf %10, %12 : vector<128x32xf32>
    %14 = arith.truncf %13 : vector<128x32xf32> to vector<128x32xbf16>
    %15 = arith.truncf %0 : vector<16x32xf32> to vector<16x32xbf16>
    %c0_16 = arith.constant 0 : index
    %c0_17 = arith.constant 0 : index
    %16 = vector.load %arg4[%c0_16, %c0_17] : memref<32x32xbf16, #tpu.memory_space<vmem>>, vector<32x32xbf16>
    %cst_18 = arith.constant dense<0.000000e+00> : vector<16x32xf32>
    %17 = tpu.matmul %15, %16, %cst_18 {dimension_numbers = #tpu.dot_dimension_numbers<[1], [0], [0], [1], [0, 0, 1, 1], [], []>} : vector<16x32xbf16>, vector<32x32xbf16>, vector<16x32xf32> -> vector<16x32xf32>
    %18 = vector.shape_cast %8 : vector<128x32xbf16> to vector<16x8x32xbf16>
    %19 = vector.shape_cast %17 : vector<16x32xf32> to vector<16x1x32xf32>
    %20 = arith.extf %18 : vector<16x8x32xbf16> to vector<16x8x32xf32>
    %21 = vector.broadcast %19 : vector<16x1x32xf32> to vector<16x8x32xf32>
    %22 = arith.mulf %21, %20 : vector<16x8x32xf32>
    %23 = vector.shape_cast %22 : vector<16x8x32xf32> to vector<128x32xf32>
    %24 = arith.truncf %23 : vector<128x32xf32> to vector<128x32xbf16>
    %c0_19 = arith.constant 0 : index
    %c0_20 = arith.constant 0 : index
    %25 = vector.load %arg10[%c0_19, %c0_20] : memref<32x4xbf16, #tpu.memory_space<vmem>>, vector<32x4xbf16>
    %cst_21 = arith.constant dense<0.000000e+00> : vector<128x4xf32>
    %26 = tpu.matmul %24, %25, %cst_21 {dimension_numbers = #tpu.dot_dimension_numbers<[1], [0], [0], [1], [0, 0, 1, 1], [], []>} : vector<128x32xbf16>, vector<32x4xbf16>, vector<128x4xf32> -> vector<128x4xf32>
    %27 = vector.shape_cast %26 : vector<128x4xf32> to vector<16x8x4xf32>
    %cst_22 = arith.constant 0.353553385 : f32
    %28 = vector.broadcast %cst_22 : f32 to vector<16x8x4xf32>
    %29 = arith.mulf %27, %28 : vector<16x8x4xf32>
    %cst_23 = arith.constant dense<0xFF800000> : vector<16x4xf32>
    %30 = vector.multi_reduction <maximumf>, %29, %cst_23 [1] : vector<16x8x4xf32> to vector<16x4xf32>
    %31 = vector.shape_cast %30 : vector<16x4xf32> to vector<16x1x4xf32>
    %32 = vector.broadcast %31 : vector<16x1x4xf32> to vector<16x8x4xf32>
    %33 = arith.subf %29, %32 : vector<16x8x4xf32>
    %34 = math.exp %33 : vector<16x8x4xf32>
    %cst_24 = arith.constant dense<0.000000e+00> : vector<16x4xf32>
    %35 = vector.multi_reduction <add>, %34, %cst_24 [1] : vector<16x8x4xf32> to vector<16x4xf32>
    %36 = tpu.reciprocal %35 {approx = true} : vector<16x4xf32> -> vector<16x4xf32>
    %37 = vector.shape_cast %36 : vector<16x4xf32> to vector<16x1x4xf32>
    %38 = vector.broadcast %37 : vector<16x1x4xf32> to vector<16x8x4xf32>
    %39 = arith.mulf %34, %38 : vector<16x8x4xf32>
    %40 = vector.shape_cast %39 : vector<16x8x4xf32> to vector<128x4xf32>
    %41 = arith.truncf %40 : vector<128x4xf32> to vector<128x4xbf16>
    %c0_25 = arith.constant 0 : index
    %c0_26 = arith.constant 0 : index
    %42 = vector.load %arg11[%c0_25, %c0_26] : memref<4x32xbf16, #tpu.memory_space<vmem>>, vector<4x32xbf16>
    %cst_27 = arith.constant dense<0.000000e+00> : vector<128x32xf32>
    %43 = tpu.matmul %41, %42, %cst_27 {dimension_numbers = #tpu.dot_dimension_numbers<[1], [0], [0], [1], [0, 0, 1, 1], [], []>} : vector<128x4xbf16>, vector<4x32xbf16>, vector<128x32xf32> -> vector<128x32xf32>
    %44 = arith.extf %14 : vector<128x32xbf16> to vector<128x32xf32>
    %45 = arith.mulf %43, %44 : vector<128x32xf32>
    %46 = vector.shape_cast %45 : vector<128x32xf32> to vector<16x8x32xf32>
    %cst_28 = arith.constant dense<0.000000e+00> : vector<16x32xf32>
    %47 = vector.multi_reduction <add>, %46, %cst_28 [1] : vector<16x8x32xf32> to vector<16x32xf32>
    %48 = arith.truncf %47 : vector<16x32xf32> to vector<16x32xbf16>
    %c0_29 = arith.constant 0 : index
    %c0_30 = arith.constant 0 : index
    %49 = vector.load %arg9[%c0_29, %c0_30] : memref<32x32xbf16, #tpu.memory_space<vmem>>, vector<32x32xbf16>
    %cst_31 = arith.constant dense<0.000000e+00> : vector<16x32xf32>
    %50 = tpu.matmul %48, %49, %cst_31 {dimension_numbers = #tpu.dot_dimension_numbers<[1], [0], [0], [1], [0, 0, 1, 1], [], []>} : vector<16x32xbf16>, vector<32x32xbf16>, vector<16x32xf32> -> vector<16x32xf32>
    %51 = arith.addf %0, %50 : vector<16x32xf32>
    %cst_32 = arith.constant dense<0.000000e+00> : vector<16xf32>
    %52 = vector.multi_reduction <add>, %51, %cst_32 [1] : vector<16x32xf32> to vector<16xf32>
    %53 = vector.shape_cast %52 : vector<16xf32> to vector<16x1xf32>
    %cst_33 = arith.constant 3.200000e+01 : f32
    %54 = vector.broadcast %cst_33 : f32 to vector<16x1xf32>
    %55 = arith.divf %53, %54 : vector<16x1xf32>
    %56 = vector.broadcast %55 : vector<16x1xf32> to vector<16x32xf32>
    %57 = arith.subf %51, %56 : vector<16x32xf32>
    %58 = arith.mulf %57, %57 : vector<16x32xf32>
    %cst_34 = arith.constant dense<0.000000e+00> : vector<16xf32>
    %59 = vector.multi_reduction <add>, %58, %cst_34 [1] : vector<16x32xf32> to vector<16xf32>
    %60 = vector.shape_cast %59 : vector<16xf32> to vector<16x1xf32>
    %cst_35 = arith.constant 3.200000e+01 : f32
    %61 = vector.broadcast %cst_35 : f32 to vector<16x1xf32>
    %62 = arith.divf %60, %61 : vector<16x1xf32>
    %63 = vector.broadcast %55 : vector<16x1xf32> to vector<16x32xf32>
    %64 = arith.subf %51, %63 : vector<16x32xf32>
    %cst_36 = arith.constant 9.99999997E-7 : f32
    %65 = vector.broadcast %cst_36 : f32 to vector<16x1xf32>
    %66 = arith.addf %62, %65 : vector<16x1xf32>
    %67 = math.rsqrt %66 : vector<16x1xf32>
    %68 = vector.broadcast %67 : vector<16x1xf32> to vector<16x32xf32>
    %69 = arith.mulf %64, %68 : vector<16x32xf32>
    %c0_37 = arith.constant 0 : index
    %c0_38 = arith.constant 0 : index
    %70 = vector.load %arg12[%c0_37, %c0_38] : memref<1x32xf32, #tpu.memory_space<vmem>>, vector<1x32xf32>
    %71 = vector.broadcast %70 : vector<1x32xf32> to vector<16x32xf32>
    %72 = arith.mulf %69, %71 : vector<16x32xf32>
    %c0_39 = arith.constant 0 : index
    %c0_40 = arith.constant 0 : index
    %73 = vector.load %arg13[%c0_39, %c0_40] : memref<1x32xf32, #tpu.memory_space<vmem>>, vector<1x32xf32>
    %74 = vector.broadcast %73 : vector<1x32xf32> to vector<16x32xf32>
    %75 = arith.addf %72, %74 : vector<16x32xf32>
    %76 = arith.truncf %75 : vector<16x32xf32> to vector<16x32xbf16>
    %c0_41 = arith.constant 0 : index
    %c0_42 = arith.constant 0 : index
    %77 = vector.load %arg14[%c0_41, %c0_42] : memref<32x128xbf16, #tpu.memory_space<vmem>>, vector<32x128xbf16>
    %cst_43 = arith.constant dense<0.000000e+00> : vector<16x128xf32>
    %78 = tpu.matmul %76, %77, %cst_43 {dimension_numbers = #tpu.dot_dimension_numbers<[1], [0], [0], [1], [0, 0, 1, 1], [], []>} : vector<16x32xbf16>, vector<32x128xbf16>, vector<16x128xf32> -> vector<16x128xf32>
    %c0_44 = arith.constant 0 : index
    %c0_45 = arith.constant 0 : index
    %79 = vector.load %arg15[%c0_44, %c0_45] : memref<1x128xf32, #tpu.memory_space<vmem>>, vector<1x128xf32>
    %80 = vector.broadcast %79 : vector<1x128xf32> to vector<16x128xf32>
    %81 = arith.addf %78, %80 : vector<16x128xf32>
    %cst_46 = arith.constant 0.000000e+00 : f32
    %82 = vector.broadcast %cst_46 : f32 to vector<16x128xf32>
    %83 = arith.maximumf %81, %82 : vector<16x128xf32>
    %84 = arith.truncf %83 : vector<16x128xf32> to vector<16x128xbf16>
    %c0_47 = arith.constant 0 : index
    %c0_48 = arith.constant 0 : index
    %85 = vector.load %arg16[%c0_47, %c0_48] : memref<128x32xbf16, #tpu.memory_space<vmem>>, vector<128x32xbf16>
    %cst_49 = arith.constant dense<0.000000e+00> : vector<16x32xf32>
    %86 = tpu.matmul %84, %85, %cst_49 {dimension_numbers = #tpu.dot_dimension_numbers<[1], [0], [0], [1], [0, 0, 1, 1], [], []>} : vector<16x128xbf16>, vector<128x32xbf16>, vector<16x32xf32> -> vector<16x32xf32>
    %c0_50 = arith.constant 0 : index
    %c0_51 = arith.constant 0 : index
    %87 = vector.load %arg17[%c0_50, %c0_51] : memref<1x32xf32, #tpu.memory_space<vmem>>, vector<1x32xf32>
    %88 = vector.broadcast %87 : vector<1x32xf32> to vector<16x32xf32>
    %89 = arith.addf %86, %88 : vector<16x32xf32>
    %90 = arith.addf %75, %89 : vector<16x32xf32>
    %cst_52 = arith.constant dense<0.000000e+00> : vector<16xf32>
    %91 = vector.multi_reduction <add>, %90, %cst_52 [1] : vector<16x32xf32> to vector<16xf32>
    %92 = vector.shape_cast %91 : vector<16xf32> to vector<16x1xf32>
    %cst_53 = arith.constant 3.200000e+01 : f32
    %93 = vector.broadcast %cst_53 : f32 to vector<16x1xf32>
    %94 = arith.divf %92, %93 : vector<16x1xf32>
    %95 = vector.broadcast %94 : vector<16x1xf32> to vector<16x32xf32>
    %96 = arith.subf %90, %95 : vector<16x32xf32>
    %97 = arith.mulf %96, %96 : vector<16x32xf32>
    %cst_54 = arith.constant dense<0.000000e+00> : vector<16xf32>
    %98 = vector.multi_reduction <add>, %97, %cst_54 [1] : vector<16x32xf32> to vector<16xf32>
    %99 = vector.shape_cast %98 : vector<16xf32> to vector<16x1xf32>
    %cst_55 = arith.constant 3.200000e+01 : f32
    %100 = vector.broadcast %cst_55 : f32 to vector<16x1xf32>
    %101 = arith.divf %99, %100 : vector<16x1xf32>
    %102 = vector.broadcast %94 : vector<16x1xf32> to vector<16x32xf32>
    %103 = arith.subf %90, %102 : vector<16x32xf32>
    %cst_56 = arith.constant 9.99999997E-7 : f32
    %104 = vector.broadcast %cst_56 : f32 to vector<16x1xf32>
    %105 = arith.addf %101, %104 : vector<16x1xf32>
    %106 = math.rsqrt %105 : vector<16x1xf32>
    %107 = vector.broadcast %106 : vector<16x1xf32> to vector<16x32xf32>
    %108 = arith.mulf %103, %107 : vector<16x32xf32>
    %c0_57 = arith.constant 0 : index
    %c0_58 = arith.constant 0 : index
    %109 = vector.load %arg18[%c0_57, %c0_58] : memref<1x32xf32, #tpu.memory_space<vmem>>, vector<1x32xf32>
    %110 = vector.broadcast %109 : vector<1x32xf32> to vector<16x32xf32>
    %111 = arith.mulf %108, %110 : vector<16x32xf32>
    %c0_59 = arith.constant 0 : index
    %c0_60 = arith.constant 0 : index
    %112 = vector.load %arg19[%c0_59, %c0_60] : memref<1x32xf32, #tpu.memory_space<vmem>>, vector<1x32xf32>
    %113 = vector.broadcast %112 : vector<1x32xf32> to vector<16x32xf32>
    %114 = arith.addf %111, %113 : vector<16x32xf32>
    %c0_61 = arith.constant 0 : index
    %c0_62 = arith.constant 0 : index
    %115 = vector.load %arg20[%c0_61, %c0_62] : memref<16x32xf32, #tpu.memory_space<vmem>>, vector<16x32xf32>
    tpu.vector_store %arg20[%c0_61, %c0_62], %114 {strides = array<i32>} : memref<16x32xf32, #tpu.memory_space<vmem>>, vector<16x32xf32>,
    return
  }
  func.func @transform_0(%arg0: i32) -> (i32, i32) {
    %c0_i32 = arith.constant 0 : i32
    %c0_i32_0 = arith.constant 0 : i32
    return %arg0, %c0_i32 : i32, i32
  }
  func.func @transform_1(%arg0: i32) -> (i32, i32) {
    %c0_i32 = arith.constant 0 : i32
    %c0_i32_0 = arith.constant 0 : i32
    return %arg0, %c0_i32 : i32, i32
  }
  func.func @transform_2(%arg0: i32) -> (i32, i32) {
    %c0_i32 = arith.constant 0 : i32
    %c0_i32_0 = arith.constant 0 : i32
    return %arg0, %c0_i32 : i32, i32
  }
  func.func @transform_3(%arg0: i32) -> (i32, i32) {
    %c0_i32 = arith.constant 0 : i32
    %c0_i32_0 = arith.constant 0 : i32
    %c0_i32_1 = arith.constant 0 : i32
    return %c0_i32, %c0_i32_0 : i32, i32
  }
  func.func @transform_4(%arg0: i32) -> (i32, i32) {
    %c0_i32 = arith.constant 0 : i32
    %c0_i32_0 = arith.constant 0 : i32
    %c0_i32_1 = arith.constant 0 : i32
    return %c0_i32, %c0_i32_0 : i32, i32
  }
  func.func @transform_5(%arg0: i32) -> (i32, i32) {
    %c0_i32 = arith.constant 0 : i32
    %c0_i32_0 = arith.constant 0 : i32
    %c0_i32_1 = arith.constant 0 : i32
    return %c0_i32, %c0_i32_0 : i32, i32
  }
  func.func @transform_6(%arg0: i32) -> (i32, i32) {
    %c0_i32 = arith.constant 0 : i32
    %c0_i32_0 = arith.constant 0 : i32
    %c0_i32_1 = arith.constant 0 : i32
    return %c0_i32, %c0_i32_0 : i32, i32
  }
  func.func @transform_7(%arg0: i32) -> (i32, i32) {
    %c0_i32 = arith.constant 0 : i32
    %c0_i32_0 = arith.constant 0 : i32
    %c0_i32_1 = arith.constant 0 : i32
    return %c0_i32, %c0_i32_0 : i32, i32
  }
  func.func @transform_8(%arg0: i32) -> (i32, i32) {
    %c0_i32 = arith.constant 0 : i32
    %c0_i32_0 = arith.constant 0 : i32
    %c0_i32_1 = arith.constant 0 : i32
    return %c0_i32, %c0_i32_0 : i32, i32
  }
  func.func @transform_9(%arg0: i32) -> (i32, i32) {
    %c0_i32 = arith.constant 0 : i32
    %c0_i32_0 = arith.constant 0 : i32
    %c0_i32_1 = arith.constant 0 : i32
    return %c0_i32, %c0_i32_0 : i32, i32
  }
  func.func @transform_10(%arg0: i32) -> (i32, i32) {
    %c0_i32 = arith.constant 0 : i32
    %c0_i32_0 = arith.constant 0 : i32
    %c0_i32_1 = arith.constant 0 : i32
    return %c0_i32, %c0_i32_0 : i32, i32
  }
  func.func @transform_11(%arg0: i32) -> (i32, i32) {
    %c0_i32 = arith.constant 0 : i32
    %c0_i32_0 = arith.constant 0 : i32
    %c0_i32_1 = arith.constant 0 : i32
    return %c0_i32, %c0_i32_0 : i32, i32
  }
  func.func @transform_12(%arg0: i32) -> (i32, i32) {
    %c0_i32 = arith.constant 0 : i32
    %c0_i32_0 = arith.constant 0 : i32
    %c0_i32_1 = arith.constant 0 : i32
    return %c0_i32, %c0_i32_0 : i32, i32
  }
  func.func @transform_13(%arg0: i32) -> (i32, i32) {
    %c0_i32 = arith.constant 0 : i32
    %c0_i32_0 = arith.constant 0 : i32
    %c0_i32_1 = arith.constant 0 : i32
    return %c0_i32, %c0_i32_0 : i32, i32
  }
  func.func @transform_14(%arg0: i32) -> (i32, i32) {
    %c0_i32 = arith.constant 0 : i32
    %c0_i32_0 = arith.constant 0 : i32
    %c0_i32_1 = arith.constant 0 : i32
    return %c0_i32, %c0_i32_0 : i32, i32
  }
  func.func @transform_15(%arg0: i32) -> (i32, i32) {
    %c0_i32 = arith.constant 0 : i32
    %c0_i32_0 = arith.constant 0 : i32
    %c0_i32_1 = arith.constant 0 : i32
    return %c0_i32, %c0_i32_0 : i32, i32
  }
  func.func @transform_16(%arg0: i32) -> (i32, i32) {
    %c0_i32 = arith.constant 0 : i32
    %c0_i32_0 = arith.constant 0 : i32
    %c0_i32_1 = arith.constant 0 : i32
    return %c0_i32, %c0_i32_0 : i32, i32
  }
  func.func @transform_17(%arg0: i32) -> (i32, i32) {
    %c0_i32 = arith.constant 0 : i32
    %c0_i32_0 = arith.constant 0 : i32
    %c0_i32_1 = arith.constant 0 : i32
    return %c0_i32, %c0_i32_0 : i32, i32
  }
  func.func @transform_18(%arg0: i32) -> (i32, i32) {
    %c0_i32 = arith.constant 0 : i32
    %c0_i32_0 = arith.constant 0 : i32
    %c0_i32_1 = arith.constant 0 : i32
    return %c0_i32, %c0_i32_0 : i32, i32
  }
  func.func @transform_19(%arg0: i32) -> (i32, i32) {
    %c0_i32 = arith.constant 0 : i32
    %c0_i32_0 = arith.constant 0 : i32
    return %arg0, %c0_i32 : i32, i32
  }
}

module attributes {stable_mosaic.version = 11 : i64} {
  func.func @_head_kernel(%arg0: i32, %arg1: memref<16x32xf32, #tpu.memory_space<vmem>>, %arg2: memref<16x1xf32, #tpu.memory_space<vmem>>, %arg3: memref<32x32xbf16, #tpu.memory_space<vmem>>, %arg4: memref<1x32xf32, #tpu.memory_space<vmem>>, %arg5: memref<1x32xf32, #tpu.memory_space<vmem>>, %arg6: memref<1x1xf32, #tpu.memory_space<vmem>>, %arg7: memref<32x128xbf16, #tpu.memory_space<vmem>>, %arg8: memref<1x128xf32, #tpu.memory_space<vmem>>, %arg9: memref<1x1x128xf32, #tpu.memory_space<vmem>>) attributes {dimension_semantics = [#tpu.dimension_semantics<parallel>], iteration_bounds = array<i64: 2>, scalar_prefetch = 0 : i64, scratch_operands = 0 : i64, tpu.core_type = #tpu.core_type<tc>, window_params = [{transform_indices = @transform_0, window_bounds = array<i64: 16, 32>}, {transform_indices = @transform_1, window_bounds = array<i64: 16, 1>}, {pipeline_mode = #tpu.pipeline_mode<synchronous>, transform_indices = @transform_2, window_bounds = array<i64: 32, 32>}, {pipeline_mode = #tpu.pipeline_mode<synchronous>, transform_indices = @transform_3, window_bounds = array<i64: 1, 32>}, {pipeline_mode = #tpu.pipeline_mode<synchronous>, transform_indices = @transform_4, window_bounds = array<i64: 1, 32>}, {pipeline_mode = #tpu.pipeline_mode<synchronous>, transform_indices = @transform_5, window_bounds = array<i64: 1, 1>}, {pipeline_mode = #tpu.pipeline_mode<synchronous>, transform_indices = @transform_6, window_bounds = array<i64: 32, 128>}, {pipeline_mode = #tpu.pipeline_mode<synchronous>, transform_indices = @transform_7, window_bounds = array<i64: 1, 128>}, {transform_indices = @transform_8, window_bounds = array<i64: 1, 1, 128>}]} {
    %c0 = arith.constant 0 : index
    %c0_0 = arith.constant 0 : index
    %0 = vector.load %arg1[%c0, %c0_0] : memref<16x32xf32, #tpu.memory_space<vmem>>, vector<16x32xf32>
    %1 = arith.truncf %0 : vector<16x32xf32> to vector<16x32xbf16>
    %c0_1 = arith.constant 0 : index
    %c0_2 = arith.constant 0 : index
    %2 = vector.load %arg3[%c0_1, %c0_2] : memref<32x32xbf16, #tpu.memory_space<vmem>>, vector<32x32xbf16>
    %cst = arith.constant dense<0.000000e+00> : vector<16x32xf32>
    %3 = tpu.matmul %1, %2, %cst {dimension_numbers = #tpu.dot_dimension_numbers<[1], [0], [0], [1], [0, 0, 1, 1], [], []>} : vector<16x32xbf16>, vector<32x32xbf16>, vector<16x32xf32> -> vector<16x32xf32>
    %c0_3 = arith.constant 0 : index
    %c0_4 = arith.constant 0 : index
    %4 = vector.load %arg4[%c0_3, %c0_4] : memref<1x32xf32, #tpu.memory_space<vmem>>, vector<1x32xf32>
    %5 = vector.broadcast %4 : vector<1x32xf32> to vector<16x32xf32>
    %6 = arith.addf %3, %5 : vector<16x32xf32>
    %c0_5 = arith.constant 0 : index
    %c0_6 = arith.constant 0 : index
    %7 = vector.load %arg5[%c0_5, %c0_6] : memref<1x32xf32, #tpu.memory_space<vmem>>, vector<1x32xf32>
    %8 = vector.broadcast %7 : vector<1x32xf32> to vector<16x32xf32>
    %9 = arith.mulf %6, %8 : vector<16x32xf32>
    %cst_7 = arith.constant dense<0.000000e+00> : vector<16xf32>
    %10 = vector.multi_reduction <add>, %9, %cst_7 [1] : vector<16x32xf32> to vector<16xf32>
    %11 = vector.shape_cast %10 : vector<16xf32> to vector<16x1xf32>
    %c0_8 = arith.constant 0 : index
    %c0_9 = arith.constant 0 : index
    %12 = vector.load %arg6[%c0_8, %c0_9] : memref<1x1xf32, #tpu.memory_space<vmem>>, vector<1x1xf32>
    %13 = vector.broadcast %12 : vector<1x1xf32> to vector<16x1xf32>
    %14 = arith.addf %11, %13 : vector<16x1xf32>
    %c0_10 = arith.constant 0 : index
    %c0_11 = arith.constant 0 : index
    %15 = vector.load %arg2[%c0_10, %c0_11] : memref<16x1xf32, #tpu.memory_space<vmem>>, vector<16x1xf32>
    %cst_12 = arith.constant 0.000000e+00 : f32
    %16 = vector.broadcast %cst_12 : f32 to vector<16x1xf32>
    %17 = arith.cmpf ogt, %15, %16 : vector<16x1xf32>
    %cst_13 = arith.constant -1.000000e+30 : f32
    %18 = vector.broadcast %cst_13 : f32 to vector<16x1xf32>
    %19 = arith.select %17, %14, %18 : vector<16x1xi1>, vector<16x1xf32>
    %20 = vector.shape_cast %19 : vector<16x1xf32> to vector<1x16x1xf32>
    %cst_14 = arith.constant dense<0xFF800000> : vector<1x1xf32>
    %21 = vector.multi_reduction <maximumf>, %20, %cst_14 [1] : vector<1x16x1xf32> to vector<1x1xf32>
    %22 = vector.shape_cast %21 : vector<1x1xf32> to vector<1x1x1xf32>
    %23 = vector.broadcast %22 : vector<1x1x1xf32> to vector<1x16x1xf32>
    %24 = arith.subf %20, %23 : vector<1x16x1xf32>
    %25 = math.exp %24 : vector<1x16x1xf32>
    %cst_15 = arith.constant dense<0.000000e+00> : vector<1x1xf32>
    %26 = vector.multi_reduction <add>, %25, %cst_15 [1] : vector<1x16x1xf32> to vector<1x1xf32>
    %27 = tpu.reciprocal %26 {approx = true} : vector<1x1xf32> -> vector<1x1xf32>
    %28 = vector.shape_cast %27 : vector<1x1xf32> to vector<1x1x1xf32>
    %29 = vector.broadcast %28 : vector<1x1x1xf32> to vector<1x16x1xf32>
    %30 = arith.mulf %25, %29 : vector<1x16x1xf32>
    %31 = vector.shape_cast %6 : vector<16x32xf32> to vector<1x16x32xf32>
    %32 = vector.broadcast %30 : vector<1x16x1xf32> to vector<1x16x32xf32>
    %33 = arith.mulf %32, %31 : vector<1x16x32xf32>
    %cst_16 = arith.constant dense<0.000000e+00> : vector<1x32xf32>
    %34 = vector.multi_reduction <add>, %33, %cst_16 [1] : vector<1x16x32xf32> to vector<1x32xf32>
    %cst_17 = arith.constant 0.000000e+00 : f32
    %35 = vector.broadcast %cst_17 : f32 to vector<1x32xf32>
    %36 = arith.maximumf %34, %35 : vector<1x32xf32>
    %37 = arith.truncf %36 : vector<1x32xf32> to vector<1x32xbf16>
    %c0_18 = arith.constant 0 : index
    %c0_19 = arith.constant 0 : index
    %38 = vector.load %arg7[%c0_18, %c0_19] : memref<32x128xbf16, #tpu.memory_space<vmem>>, vector<32x128xbf16>
    %cst_20 = arith.constant dense<0.000000e+00> : vector<1x128xf32>
    %39 = tpu.matmul %37, %38, %cst_20 {dimension_numbers = #tpu.dot_dimension_numbers<[1], [0], [0], [1], [0, 0, 1, 1], [], []>} : vector<1x32xbf16>, vector<32x128xbf16>, vector<1x128xf32> -> vector<1x128xf32>
    %c0_21 = arith.constant 0 : index
    %c0_22 = arith.constant 0 : index
    %40 = vector.load %arg8[%c0_21, %c0_22] : memref<1x128xf32, #tpu.memory_space<vmem>>, vector<1x128xf32>
    %41 = arith.addf %39, %40 : vector<1x128xf32>
    %c0_23 = arith.constant 0 : index
    %c0_24 = arith.constant 0 : index
    %c0_25 = arith.constant 0 : index
    %42 = vector.load %arg9[%c0_23, %c0_24, %c0_25] : memref<1x1x128xf32, #tpu.memory_space<vmem>>, vector<1x1x128xf32>
    %43 = vector.shape_cast %42 : vector<1x1x128xf32> to vector<1x128xf32>
    %44 = vector.shape_cast %41 : vector<1x128xf32> to vector<1x1x128xf32>
    tpu.vector_store %arg9[%c0_23, %c0_24, %c0_25], %44 {strides = array<i32>} : memref<1x1x128xf32, #tpu.memory_space<vmem>>, vector<1x1x128xf32>,
    return
  }
  func.func @transform_0(%arg0: i32) -> (i32, i32) {
    %c0_i32 = arith.constant 0 : i32
    %c0_i32_0 = arith.constant 0 : i32
    return %arg0, %c0_i32 : i32, i32
  }
  func.func @transform_1(%arg0: i32) -> (i32, i32) {
    %c0_i32 = arith.constant 0 : i32
    %c0_i32_0 = arith.constant 0 : i32
    return %arg0, %c0_i32 : i32, i32
  }
  func.func @transform_2(%arg0: i32) -> (i32, i32) {
    %c0_i32 = arith.constant 0 : i32
    %c0_i32_0 = arith.constant 0 : i32
    %c0_i32_1 = arith.constant 0 : i32
    return %c0_i32, %c0_i32_0 : i32, i32
  }
  func.func @transform_3(%arg0: i32) -> (i32, i32) {
    %c0_i32 = arith.constant 0 : i32
    %c0_i32_0 = arith.constant 0 : i32
    %c0_i32_1 = arith.constant 0 : i32
    return %c0_i32, %c0_i32_0 : i32, i32
  }
  func.func @transform_4(%arg0: i32) -> (i32, i32) {
    %c0_i32 = arith.constant 0 : i32
    %c0_i32_0 = arith.constant 0 : i32
    %c0_i32_1 = arith.constant 0 : i32
    return %c0_i32, %c0_i32_0 : i32, i32
  }
  func.func @transform_5(%arg0: i32) -> (i32, i32) {
    %c0_i32 = arith.constant 0 : i32
    %c0_i32_0 = arith.constant 0 : i32
    %c0_i32_1 = arith.constant 0 : i32
    return %c0_i32, %c0_i32_0 : i32, i32
  }
  func.func @transform_6(%arg0: i32) -> (i32, i32) {
    %c0_i32 = arith.constant 0 : i32
    %c0_i32_0 = arith.constant 0 : i32
    %c0_i32_1 = arith.constant 0 : i32
    return %c0_i32, %c0_i32_0 : i32, i32
  }
  func.func @transform_7(%arg0: i32) -> (i32, i32) {
    %c0_i32 = arith.constant 0 : i32
    %c0_i32_0 = arith.constant 0 : i32
    %c0_i32_1 = arith.constant 0 : i32
    return %c0_i32, %c0_i32_0 : i32, i32
  }
  func.func @transform_8(%arg0: i32) -> (i32, i32, i32) {
    %c0_i32 = arith.constant 0 : i32
    %c0_i32_0 = arith.constant 0 : i32
    %c0_i32_1 = arith.constant 0 : i32
    return %arg0, %c0_i32, %c0_i32_0 : i32, i32, i32
  }
}

</mosaic_0001>

<bundles_post_ra>
// kernel: mul.30
= control target key start
LH: loop header
LB: loop body
LE: loop exit
PB: predicated region body
PF: predicated region fallthrough
CT: control target
= control target key end

     0   :  { %s364_s0 = inlined_call_operand.vmem [shape: f32[2,16,8,1], index: 0, kind: input, shape index: {}]   ;;  %s365_s1 = inlined_call_operand.vmem [shape: f32[2,16,8,1], index: 1, kind: input, shape index: {}]   ;;  %s366_s2 = inlined_call_operand.vmem [shape: f32[2,16,8,1], index: 2, kind: output, shape index: {}]  }
   0x1   :  { %v3_v0 = vld [vmem:[%s364_s0] sm:$0x1]  ;;  %v160_v2 = vld [vmem:[%s364_s0 + $0x8] sm:$0x1]  ;;  %v163_v5 = vld [vmem:[%s364_s0 + $0x1] sm:$0x1] }
   0x2   :  { %v4_v1 = vld [vmem:[%s365_s1] sm:$0x1]  ;;  %v161_v4 = vld [vmem:[%s365_s1 + $0x8] sm:$0x1]  ;;  %v164_v6 = vld [vmem:[%s365_s1 + $0x1] sm:$0x1] }
   0x3   :  { %v7_v3 = vmul.f32 %v4_v1, %v3_v0  ;;  %v16_v7 = vmul.f32 %v161_v4, %v160_v2  ;;  %v26_v8 = vmul.f32 %v164_v6, %v163_v5  ;;  %v166_v9 = vld [vmem:[%s364_s0 + $0x9] sm:$0x1]  ;;  %v169_v11 = vld [vmem:[%s364_s0 + $0x2] sm:$0x1]  ;;  %v172_v14 = vld [vmem:[%s364_s0 + $0xa] sm:$0x1] }
   0x4   :  { %v167_v10 = vld [vmem:[%s365_s1 + $0x9] sm:$0x1]  ;;  %v170_v13 = vld [vmem:[%s365_s1 + $0x2] sm:$0x1]  ;;  %v173_v15 = vld [vmem:[%s365_s1 + $0xa] sm:$0x1] }
   0x5   :  { %9 = vst [vmem:[%s366_s2] sm:$0x1] %v7_v3  ;;  %v36_v12 = vmul.f32 %v167_v10, %v166_v9  ;;  %162 = vst [vmem:[%s366_s2 + $0x8] sm:$0x1] %v16_v7  ;;  %v46_v16 = vmul.f32 %v170_v13, %v169_v11  ;;  %v56_v17 = vmul.f32 %v173_v15, %v172_v14  ;;  %v175_v18 = vld [vmem:[%s364_s0 + $0x3] sm:$0x1] }
   0x6   :  { %165 = vst [vmem:[%s366_s2 + $0x1] sm:$0x1] %v26_v8  ;;  %v176_v19 = vld [vmem:[%s365_s1 + $0x3] sm:$0x1]  ;;  %v178_v20 = vld [vmem:[%s364_s0 + $0xb] sm:$0x1] }
   0x7   :  { %168 = vst [vmem:[%s366_s2 + $0x9] sm:$0x1] %v36_v12  ;;  %v66_v21 = vmul.f32 %v176_v19, %v175_v18  ;;  %v179_v22 = vld [vmem:[%s365_s1 + $0xb] sm:$0x1]  ;;  %v181_v23 = vld [vmem:[%s364_s0 + $0x4] sm:$0x1] }
   0x8   :  { %v182_v24 = vld [vmem:[%s365_s1 + $0x4] sm:$0x1]  ;;  %171 = vst [vmem:[%s366_s2 + $0x2] sm:$0x1] %v46_v16  ;;  %174 = vst [vmem:[%s366_s2 + $0xa] sm:$0x1] %v56_v17  ;;  %v76_v25 = vmul.f32 %v179_v22, %v178_v20 }
   0x9   :  { %v86_v26 = vmul.f32 %v182_v24, %v181_v23  ;;  %v184_v27 = vld [vmem:[%s364_s0 + $0xc] sm:$0x1]  ;;  %v187_v29 = vld [vmem:[%s364_s0 + $0x5] sm:$0x1]  ;;  %177 = vst [vmem:[%s366_s2 + $0x3] sm:$0x1] %v66_v21 }
   0xa   :  { %v185_v28 = vld [vmem:[%s365_s1 + $0xc] sm:$0x1]  ;;  %v188_v31 = vld [vmem:[%s365_s1 + $0x5] sm:$0x1]  ;;  %v190_v32 = vld [vmem:[%s364_s0 + $0xd] sm:$0x1] }
   0xb   :  { %v96_v30 = vmul.f32 %v185_v28, %v184_v27  ;;  %v191_v33 = vld [vmem:[%s365_s1 + $0xd] sm:$0x1]  ;;  %180 = vst [vmem:[%s366_s2 + $0xb] sm:$0x1] %v76_v25  ;;  %183 = vst [vmem:[%s366_s2 + $0x4] sm:$0x1] %v86_v26  ;;  %v106_v34 = vmul.f32 %v188_v31, %v187_v29 }
   0xc   :  { %v116_v35 = vmul.f32 %v191_v33, %v190_v32  ;;  %v193_v36 = vld [vmem:[%s364_s0 + $0x6] sm:$0x1]  ;;  %v196_v38 = vld [vmem:[%s364_s0 + $0xe] sm:$0x1]  ;;  %v199_v41 = vld [vmem:[%s364_s0 + $0x7] sm:$0x1] }
   0xd   :  { %v194_v37 = vld [vmem:[%s365_s1 + $0x6] sm:$0x1]  ;;  %186 = vst [vmem:[%s366_s2 + $0xc] sm:$0x1] %v96_v30  ;;  %v197_v40 = vld [vmem:[%s365_s1 + $0xe] sm:$0x1] }
   0xe   :  { %v126_v39 = vmul.f32 %v194_v37, %v193_v36  ;;  %v200_v42 = vld [vmem:[%s365_s1 + $0x7] sm:$0x1]  ;;  %189 = vst [vmem:[%s366_s2 + $0x5] sm:$0x1] %v106_v34  ;;  %192 = vst [vmem:[%s366_s2 + $0xd] sm:$0x1] %v116_v35  ;;  %v136_v43 = vmul.f32 %v197_v40, %v196_v38 }
   0xf   :  { %v146_v44 = vmul.f32 %v200_v42, %v199_v41  ;;  %v202_v45 = vld [vmem:[%s364_s0 + $0xf] sm:$0x1] }
  0x10   :  { %v203_v46 = vld [vmem:[%s365_s1 + $0xf] sm:$0x1]  ;;  %195 = vst [vmem:[%s366_s2 + $0x6] sm:$0x1] %v126_v39  ;;  %198 = vst [vmem:[%s366_s2 + $0xe] sm:$0x1] %v136_v43 }
  0x11   :  { %v156_v47 = vmul.f32 %v203_v46, %v202_v45  ;;  %201 = vst [vmem:[%s366_s2 + $0x7] sm:$0x1] %v146_v44 }
  0x13   :  { %204 = vst [vmem:[%s366_s2 + $0xf] sm:$0x1] %v156_v47 }

// kernel: struct2property_forward.6
= control target key start
LH: loop header
LB: loop body
LE: loop exit
PB: predicated region body
PF: predicated region fallthrough
CT: control target
= control target key end

     0   :  { %8 = vsyncpa [#allocation3], 0  ;;  %s932_s0 = inlined_call_operand.hbm [shape: bf16[32,16], index: 0, kind: input, shape index: {}]   ;;  %s933_s1 = inlined_call_operand.hbm [shape: bf16[16,32], index: 1, kind: input, shape index: {}]   ;;  %s934_s2 = inlined_call_operand.hbm [shape: f32[1,32], index: 2, kind: input, shape index: {}]   ;;  %s935_s3 = inlined_call_operand.hbm [shape: f32[32,32], index: 3, kind: output, shape index: {}]  }
   0x1   :  { %10 = vsyncpa [#allocation3 + $0x1], 0 }
   0x2   :  { %11 = vsyncpa [#allocation6], 0 }
   0x3   :  { %12 = vsyncpa [#allocation4], 0 }
   0x4   :  { %14 = vsyncpa [#allocation4 + $0x1], 0  ;;  %s690_s12 = smov 0   ;;  %s692_s13 = smov 0  }
   0x5   :  { %s694_s14 = smov 0   ;;  %s696_s15 = smov 0  }
   0x6 LB: > { %s711_s16 = sadd.s32 4294967295, %s658_s15   ;;  %s395_s17 = sadd.s32 4294967294, %s658_s15   ;;  %s658_s15 = sphi %s696_s15, %s955_s15   ;;  %s654_s14 = sphi %s694_s14, %s954_s14   ;;  %s650_s13 = sphi %s692_s13, %s953_s13   ;;  %s646_s12 = sphi %s690_s12, %s952_s12  }
   0x7   : > { %p40_p0 = scmp.ne.s32.totalorder %s650_s13, %s646_s12  ;;  %p936_p1 = scmp.eq.s32.totalorder %s711_s16, 0 }
   0x8   : > { %p112_p3 = scmp.eq.s32.totalorder %s395_s17, 1  ;;  %p396_p5 = scmp.ge.s32.totalorder %s658_s15, 1 }
   0x9   : > { %p720_p4 = por %p936_p1, %p40_p0  ;;  %p119_p7 = scmp.lt.s32.totalorder %s658_s15, 3 }
   0xa   : > { %p725_p6 = por %p112_p3, %p40_p0  ;;  %s660_s21 = smov [#allocation5]  }
   0xb   : > { %s939_s18 = scalar_select %p720_p4, 1, 0 }
   0xc   : > { %s940_s19 = scalar_select %p725_p6, 1, 0 }
   0xd   : > { %p730_p8 = pnand %p396_p5, %p119_p7  ;;  %s131_s22 = sshll.u32 %s660_s21, 4  ;;  %s734_s22 = int_to_ptr.vmem [resolvable:$true] %s131_s22 }
   0xe   : > { %s661_s24 = smov [#allocation7]   ;;  %s502_s28 = scalar_lea.hbm %s933_s1, 128 }
   0xf   : > { %p439_p9 = pneg %p730_p8  ;;  %s145_s25 = sshll.u32 %s661_s24, 4  ;;  %s745_s25 = int_to_ptr.vmem [resolvable:$true] %s145_s25 }
  0x10   : > { %p503_p12 = scmp.ne.s32.totalorder %s933_s1, %s502_s28  ;;  %p509_p5 = scmp.lt.u32.totalorder %s502_s28, %s933_s1 }
  0x11   : > { %p741_p11 = pnand %p439_p9, %p936_p1 }
  0x13   : > { %p504_p13 = pneg %p741_p11 }
  0x15   : > { %p505_p0 = pnand %p504_p13, %p503_p12 }
  0x17   : > { %p506_p3 = pneg %p505_p0 }
  0x19   : > { %p511_p7 = pnand %p509_p5, %p506_p3 }
  0x1b   : > { %514 = shalt.err (!%p511_p7)
}
  0x1c   : > { %s515_s6 = scalar_lea.vmem %s734_s22, 128  ;;  %p523_p2 = scmp.lt.s32.totalorder %s734_s22, %s734_s22 }
  0x1d   : > { %p516_p9 = scmp.ne.s32.totalorder %s734_s22, %s515_s6  ;;  %p524_p12 = scmp.lt.s32.totalorder %s515_s6, %s515_s6 }
  0x1f   : > { %p518_p10 = pnand %p516_p9, %p504_p13  ;;  %p525_p0 = por %p524_p12, %p523_p2 }
  0x21   : > { %p519_p1 = pneg %p518_p10 }
  0x23   : > { %p526_p6 = pnand %p525_p0, %p519_p1 }
  0x25   : > { %529 = shalt.err (!%p526_p6)
}
  0x26   : > { %s662_s7 = smov 64   ;;  %s663_s8 = smov 4  }
  0x27   : > { %442 = dma.hbm_to_vmem [thread:$0]  (!%p741_p11), %s933_s1, 128, %s734_s22, [#allocation6], %s662_s7, %s662_s7, %s663_s8  }
  0x28   : > { %s530_s21 = scalar_lea.hbm %s934_s2, 16 }
  0x29   : > { %p531_p1 = scmp.ne.s32.totalorder %s934_s2, %s530_s21  ;;  %p537_p10 = scmp.lt.u32.totalorder %s530_s21, %s934_s2 }
  0x2b   : > { %p533_p2 = pnand %p531_p1, %p504_p13 }
  0x2d   : > { %p534_p6 = pneg %p533_p2 }
  0x2f   : > { %p539_p3 = pnand %p537_p10, %p534_p6 }
  0x31   : > { %542 = shalt.err (!%p539_p3)
}
  0x32   : > { %s543_s22 = scalar_lea.vmem %s745_s25, 16  ;;  %s550_s29 = scalar_lea.vmem %s745_s25, 32 }
  0x33   : > { %p544_p5 = scmp.ne.s32.totalorder %s745_s25, %s543_s22  ;;  %p551_p12 = scmp.lt.s32.totalorder %s745_s25, %s745_s25 }
  0x34   : > { %p552_p0 = scmp.lt.s32.totalorder %s550_s29, %s543_s22 }
  0x35   : > { %p546_p7 = pnand %p544_p5, %p504_p13 }
  0x36   : > { %p553_p1 = por %p552_p0, %p551_p12 }
  0x37   : > { %p547_p9 = pneg %p546_p7 }
  0x39   : > { %p554_p2 = pnand %p553_p1, %p547_p9 }
  0x3b   : > { %557 = shalt.err (!%p554_p2)
}
  0x3c   : > { %445 = dma.hbm_to_vmem [thread:$0]  (!%p741_p11), %s934_s2, 16, %s745_s25, [#allocation6]  }
  0x3d   : > { %s804_s5 = sadd.s32 1, %s658_s15   ;;  %s27_s23 = sadd.s32 1, %s654_s14 }
  0x3e   : > { %s24_s6 = ssub.s32 %s658_s15, %s804_s5  ;;  %p34_p13 = scmp.ne.s32.totalorder %s654_s14, %s650_s13 }
  0x3f   : > { %p25_p6 = scmp.eq.s32.totalorder %s24_s6, 0  ;;  %p35_p10 = scmp.eq.s32.totalorder %s658_s15, 0 }
  0x40   : > { %p943_p3 = scmp.eq.s32.totalorder %s711_s16, 1  ;;  %p456_p7 = scmp.lt.s32.totalorder %s658_s15, 2 }
  0x41   : > { %s820_s10 = scalar_select %p25_p6, %s654_s14, %s27_s23  }
  0x42   : > { %p814_p5 = por %p943_p3, %p34_p13  ;;  %p36_p9 = por %p35_p10, %p34_p13 }
  0x43   : > { %s156_s11 = sand.u32 1, %s654_s14   ;;  %s417_s25 = sshll.u32 %s658_s15, 7 }
  0x44   : > { %s944_s9 = scalar_select %p814_p5, 1, 0 }
  0x45   : > { %s400_s17 = sshll.u32 %s156_s11, 3  ;;  %s827_s26 = scalar_lea.hbm %s932_s0, %s417_s25 }
  0x46   : > { %s160_s27 = scalar_lea.vmem [#allocation2], %s400_s17  ;;  %p831_p11 = pnand %p456_p7, %p36_p9 }
  0x47   : > { %s167_s28 = sshll.u32 %s160_s27, 4  ;;  %s835_s29 = scalar_lea.sflag [#allocation3], %s156_s11  ;;  %s829_s28 = int_to_ptr.vmem [resolvable:$true] %s167_s28 }
  0x48   : > { %s558_s30 = scalar_lea.hbm %s827_s26, 128  ;;  %p560_p0 = pneg %p831_p11 }
  0x49   : > { %p559_p12 = scmp.ne.s32.totalorder %s827_s26, %s558_s30  ;;  %s563_s6 = scalar_lea.hbm %s932_s0, 256 }
  0x4a   : > { %p564_p13 = scmp.lt.u32.totalorder %s827_s26, %s932_s0  ;;  %p565_p6 = scmp.lt.u32.totalorder %s563_s6, %s558_s30 }
  0x4b   : > { %p561_p1 = pnand %p560_p0, %p559_p12  ;;  %p567_p3 = scmp.lt.u32.totalorder %s558_s30, %s827_s26 }
  0x4c   : > { %p566_p10 = por %p565_p6, %p564_p13 }
  0x4d   : > { %p562_p2 = pneg %p561_p1 }
  0x4e   : > { %p568_p7 = por %p567_p3, %p566_p10 }
  0x50   : > { %p569_p9 = pnand %p568_p7, %p562_p2 }
  0x52   : > { %572 = shalt.err (!%p569_p9)
}
  0x53   : > { %s573_s11 = scalar_lea.vmem %s829_s28, 128  ;;  %s664_s21 = smov [#allocation2]  }
  0x54   : > { %p574_p12 = scmp.ne.s32.totalorder %s829_s28, %s573_s11  ;;  %s578_s24 = sshll.u32 %s664_s21, 4  ;;  %s579_s24 = int_to_ptr.vmem [resolvable:$false] %s578_s24 }
  0x55   : > { %s580_s27 = scalar_lea.vmem %s579_s24, 256  ;;  %p581_p4 = scmp.lt.s32.totalorder %s829_s28, %s579_s24 }
  0x56   : > { %p576_p1 = pnand %p574_p12, %p560_p0  ;;  %p582_p13 = scmp.lt.s32.totalorder %s580_s27, %s573_s11 }
  0x58   : > { %p577_p5 = pneg %p576_p1  ;;  %p583_p6 = por %p582_p13, %p581_p4 }
  0x5a   : > { %p584_p10 = pnand %p583_p6, %p577_p5 }
  0x5c   : > { %587 = shalt.err (!%p584_p10)
}
  0x5d   : > { %449 = dma.hbm_to_vmem [thread:$0]  (!%p831_p11), %s827_s26, 128, %s829_s28, %s835_s29, %s662_s7, %s662_s7, %s663_s8  }
  0x5e   : > { %179 = sbr.rel (%p730_p8) target bundleno = 341 (0x155), region = 32  ;;  %s869_s30 = sand.u32 (!%p730_p8), 1, %s650_s13  }
  0x5f   : > { %s404_s4 = sshll.u32 (!%p730_p8), %s869_s30, 3  ;;  %s182_s23 = scalar_lea.sflag (!%p730_p8), [#allocation3], %s869_s30 }
  0x60   : > { %s185_s6 = scalar_lea.vmem (!%p730_p8), [#allocation2], %s404_s4  ;;  %p946_p4 = scmp.ne.s32.totalorder (!%p730_p8), %s939_s18, 0 }
  0x65   : > { %633 = dma.done.wait (%p946_p4), %s182_s23, 128  }
  0x66   : > { %635 = vsyncadd (%p946_p4), %s182_s23, 4294967168  ;;  %p947_p5 = scmp.eq.s32.totalorder %s711_s16, 0 }
  0x68   : > { %637 = dma.done.wait (%p947_p5), [#allocation6], 144   ;;  %p948_p11 = pmov %p947_p5 }
  0x69   : > { %v665_v0 = vmov 0.0   ;;  %vm666_vm0 = vmmov 0   ;;  %v500_v1 = vld [vmem:[#allocation5] sm:$0xff]   ;;  %v501_v2 = vld [vmem:[%s185_s6] sm:$0xff]   ;;  %vm241_vm1 = vcmask 130048   ;;  %s407_s20 = sshll.u32 %s869_s30, 4 }
  0x6a   : > { %639 = vsyncadd (%p948_p11), [#allocation6], 4294967152  ;;  %421 = vmatprep.subr.bf16.mxu0 %v665_v0  ;;  %423 = vmatprep.mubr.msk.bf16.mxu0 %vm666_vm0, %v665_v0  ;;  %v408_v3 = vld [vmem:[#allocation7] ss:$0 sm:$0xff]  ;;  %s215_s18 = scalar_lea.vmem [#allocation8], %s407_s20  ;;  %s418_s8 = sshll.u32 %s711_s16, 8 }
  0x6b   : > { %422 = vmatpush3.bf16.msra.mxu0 %v500_v1  ;;  %s303_s7 = sshll.u32 %s215_s18, 4  ;;  %vm286_vm2 = vcmask 261120   ;;  %s888_s22 = scalar_lea.hbm %s935_s3, %s418_s8  ;;  %s883_s7 = int_to_ptr.vmem [resolvable:$true] %s303_s7 }
  0x6c   : > { %s290_s16 = scalar_lea.sflag [#allocation4], %s869_s30  ;;  %s588_s29 = scalar_lea.vmem %s883_s7, 256 }
  0x6d   : > { %p589_p8 = scmp.ne.s32.totalorder %s883_s7, %s588_s29  ;;  %p949_p0 = scmp.ne.s32.totalorder %s944_s9, 0 }
  0x6e   : > { %424 = vmatmul.mubr.msk.bf16.vlgmr.msra.gmra.mrb[0].mxu0 %vm241_vm1, %v501_v2  ;;  %s667_s17 = smov [#allocation8]  }
  0x6f   : > { %p590_p2 = pnand %p589_p8, %p949_p0  ;;  %s592_s25 = sshll.u32 %s667_s17, 4  ;;  %s593_s25 = int_to_ptr.vmem [resolvable:$false] %s592_s25 }
  0x70   : > { %s594_s11 = scalar_lea.vmem %s593_s25, 512  ;;  %p595_p7 = scmp.lt.s32.totalorder %s883_s7, %s593_s25 }
  0x71   : > { %p591_p3 = pneg %p590_p2  ;;  %p596_p9 = scmp.lt.s32.totalorder %s594_s11, %s588_s29 }
  0x73   : > { %p597_p12 = por %p596_p9, %p595_p7 }
  0x75   : > { %p598_p1 = pnand %p597_p12, %p591_p3 }
 0x141   : > { %v279_v4 = vpop.f32.mrb[0].mxu0 }
 0x142   : > { %v280_v5 = vadd.f32 %v408_v3, %v279_v4  ;;  %v425_v6 = vpop.f32.mrb[1].mxu0 }
 0x143   : > { %v282_v7 = vpop.f32.mrb[2].mxu0 }
 0x144   : > { %287 = vst.msk [vmem:[%s215_s18] sm:$0xff] %vm286_vm2, %v280_v5  ;;  %v283_v8 = vadd.f32 %v408_v3, %v282_v7  ;;  %v426_v9 = vpop.f32.mrb[3].mxu0 }
 0x146   : > { %288 = vst.msk [vmem:[%s215_s18 + $0x8] sm:$0xff] %vm286_vm2, %v283_v8 }
 0x147   : > { %601 = shalt.err (!%p598_p1)
}
 0x148   : > { %s602_s21 = scalar_lea.hbm %s888_s22, 256  ;;  %s606_s4 = scalar_lea.hbm %s935_s3, 512 }
 0x149   : > { %p603_p13 = scmp.ne.s32.totalorder %s888_s22, %s602_s21  ;;  %p607_p4 = scmp.lt.u32.totalorder %s888_s22, %s935_s3 }
 0x14a   : > { %p608_p5 = scmp.lt.u32.totalorder %s606_s4, %s602_s21  ;;  %p610_p8 = scmp.lt.u32.totalorder %s602_s21, %s888_s22 }
 0x14b   : > { %p604_p6 = pnand %p603_p13, %p949_p0 }
 0x14c   : > { %p609_p11 = por %p608_p5, %p607_p4 }
 0x14d   : > { %p605_p10 = pneg %p604_p6 }
 0x14e   : > { %p611_p2 = por %p610_p8, %p609_p11 }
 0x150   : > { %p612_p3 = pnand %p611_p2, %p605_p10 }
 0x152   : > { %615 = shalt.err (!%p612_p3)
}
 0x153   : > { %s668_s20 = smov 128   ;;  %s669_s18 = smov 8  }
 0x154   : > { %437 = dma.vmem_to_hbm [thread:$0]  (%p949_p0), %s883_s7, 256, %s888_s22, %s290_s16, %s668_s20, %s668_s20, %s669_s18  }
 0x155 PF: > { %s318_s8 = sand.u32 1, %s646_s12   ;;  %p950_p7 = scmp.ne.s32.totalorder %s940_s19, 0 }
 0x156   : > { %p951_p9 = scmp.ge.s32.totalorder %s658_s15, 2  ;;  %s319_s26 = scalar_lea.sflag [#allocation4], %s318_s8 }
 0x158   : > { %p451_p12 = pnand %p951_p9, %p950_p7 }
 0x15a   : > { %641 = dma.done.wait (!%p451_p12), %s319_s26, 256  }
 0x15b   : > { %643 = vsyncadd (!%p451_p12), %s319_s26, 4294967040  ;;  %p17_p1 = scmp.ge.s32.totalorder %s804_s5, 4   ;;  %s952_s12 = smov %s650_s13 }
 0x15c   : > { %s953_s13 = smov %s654_s14  ;;  %s954_s14 = smov %s820_s10 }
 0x15d   : > { %s955_s15 = smov %s804_s5  ;;  %19 = sbr.rel (!%p17_p1) target bundleno = 6 (0x6), region = 85 }
 0x164   :  { %324 = vsyncpa [#allocation3], 1 }
 0x165   :  { %326 = vsyncpa [#allocation3 + $0x1], 1 }
 0x166   :  { %327 = vsyncpa [#allocation6], 1 }
 0x167   :  { %328 = vsyncpa [#allocation4], 1 }
 0x168   :  { %330 = vsyncpa [#allocation4 + $0x1], 1 }

// kernel: struct2property_forward.7
= control target key start
LH: loop header
LB: loop body
LE: loop exit
PB: predicated region body
PF: predicated region fallthrough
CT: control target
= control target key end

     0   :  { %8 = vsyncpa [#allocation3], 0  ;;  %s1139_s0 = inlined_call_operand.hbm [shape: bf16[256,8], index: 0, kind: input, shape index: {}]   ;;  %s1140_s1 = inlined_call_operand.hbm [shape: bf16[8,32], index: 1, kind: input, shape index: {}]   ;;  %s1141_s2 = inlined_call_operand.hbm [shape: f32[1,32], index: 2, kind: input, shape index: {}]   ;;  %s1142_s3 = inlined_call_operand.hbm [shape: f32[256,32], index: 3, kind: output, shape index: {}]  }
   0x1   :  { %10 = vsyncpa [#allocation3 + $0x1], 0 }
   0x2   :  { %11 = vsyncpa [#allocation6], 0 }
   0x3   :  { %12 = vsyncpa [#allocation4], 0 }
   0x4   :  { %14 = vsyncpa [#allocation4 + $0x1], 0  ;;  %s863_s12 = smov 0   ;;  %s865_s13 = smov 0  }
   0x5   :  { %s867_s14 = smov 0   ;;  %s869_s15 = smov 0  }
   0x6 LB: > { %s884_s16 = sadd.s32 4294967295, %s833_s15   ;;  %s530_s17 = sadd.s32 4294967294, %s833_s15   ;;  %s833_s15 = sphi %s869_s15, %s1167_s15   ;;  %s829_s14 = sphi %s867_s14, %s1166_s14   ;;  %s825_s13 = sphi %s865_s13, %s1165_s13   ;;  %s821_s12 = sphi %s863_s12, %s1164_s12  }
   0x7   : > { %s888_s18 = sadd.s32 1, %s833_s15   ;;  %s27_s19 = sadd.s32 1, %s829_s14 }
   0x8   : > { %s24_s20 = ssub.s32 %s833_s15, %s888_s18  ;;  %p34_p0 = scmp.ne.s32.totalorder %s829_s14, %s825_s13 }
   0x9   : > { %p25_p1 = scmp.eq.s32.totalorder %s24_s20, 0  ;;  %p35_p2 = scmp.eq.s32.totalorder %s833_s15, 0 }
   0xa   : > { %p40_p3 = scmp.ne.s32.totalorder %s825_s13, %s821_s12  ;;  %p1143_p4 = scmp.eq.s32.totalorder %s884_s16, 0 }
   0xb   : > { %s900_s21 = scalar_select %p25_p1, %s829_s14, %s27_s19  }
   0xc   : > { %p902_p5 = por %p35_p2, %p34_p0  ;;  %p908_p6 = por %p1143_p4, %p40_p3 }
   0xd   : > { %p106_p7 = scmp.eq.s32.totalorder %s884_s16, 1  ;;  %p112_p8 = scmp.eq.s32.totalorder %s530_s17, 1 }
   0xe   : > { %s1149_s23 = scalar_select %p908_p6, 1, 0 }
   0xf   : > { %p531_p9 = scmp.ge.s32.totalorder %s833_s15, 1  ;;  %p119_p10 = scmp.lt.s32.totalorder %s833_s15, 3 }
  0x10   : > { %p915_p11 = por %p106_p7, %p34_p0  ;;  %p919_p12 = por %p112_p8, %p40_p3 }
  0x11   : > { %p923_p13 = pnand %p531_p9, %p119_p10  ;;  %s835_s27 = smov [#allocation5]  }
  0x12   : > { %s1150_s24 = scalar_select %p915_p11, 1, 0 }
  0x13   : > { %s1151_s25 = scalar_select %p919_p12, 1, 0 }
  0x14   : > { %s1152_s26 = scalar_select %p923_p13, 1, 0 }
  0x15   : > { %p610_p2 = pneg %p923_p13  ;;  %s132_s28 = sshll.u32 %s835_s27, 4  ;;  %s133_s28 = int_to_ptr.vmem [resolvable:$true] %s132_s28 }
  0x16   : > { %p627_p4 = scmp.lt.s32.totalorder %s833_s15, 2  ;;  %p1153_p0 = scmp.eq.s32.totalorder %s884_s16, 0 }
  0x17   : > { %s836_s4 = smov [#allocation7]   ;;  %s677_s8 = scalar_lea.hbm %s1140_s1, 64 }
  0x18   : > { %p933_p7 = pnand %p610_p2, %p1153_p0  ;;  %p939_p3 = pnand %p627_p4, %p902_p5 }
  0x19   : > { %s143_s5 = sshll.u32 %s836_s4, 4  ;;  %p678_p8 = scmp.ne.s32.totalorder %s1140_s1, %s677_s8  ;;  %s943_s5 = int_to_ptr.vmem [resolvable:$true] %s143_s5 }
  0x1a   : > { %s1155_s30 = scalar_select %p939_p3, 1, 0 }
  0x1b   : > { %p679_p9 = pneg %p933_p7  ;;  %p684_p10 = scmp.lt.u32.totalorder %s677_s8, %s1140_s1 }
  0x1d   : > { %p680_p4 = pnand %p679_p9, %p678_p8 }
  0x1f   : > { %p681_p5 = pneg %p680_p4 }
  0x21   : > { %p686_p2 = pnand %p684_p10, %p681_p5 }
  0x23   : > { %689 = shalt.err (!%p686_p2)
}
  0x24   : > { %s690_s19 = scalar_lea.vmem %s133_s28, 64  ;;  %p698_p11 = scmp.lt.s32.totalorder %s133_s28, %s133_s28 }
  0x25   : > { %p691_p0 = scmp.ne.s32.totalorder %s133_s28, %s690_s19  ;;  %p699_p6 = scmp.lt.s32.totalorder %s690_s19, %s690_s19 }
  0x27   : > { %p693_p1 = pnand %p691_p0, %p679_p9  ;;  %p700_p13 = por %p699_p6, %p698_p11 }
  0x29   : > { %p694_p12 = pneg %p693_p1 }
  0x2b   : > { %p701_p3 = pnand %p700_p13, %p694_p12 }
  0x2d   : > { %704 = shalt.err (!%p701_p3)
}
  0x2e   : > { %613 = dma.hbm_to_vmem [thread:$0]  (!%p933_p7), %s1140_s1, 64, %s133_s28, [#allocation6]  }
  0x2f   : > { %s154_s27 = sand.u32 1, %s829_s14   ;;  %s705_s7 = scalar_lea.hbm %s1141_s2, 16 }
  0x30   : > { %p706_p1 = scmp.ne.s32.totalorder %s1141_s2, %s705_s7  ;;  %p712_p12 = scmp.lt.u32.totalorder %s705_s7, %s1141_s2 }
  0x32   : > { %p708_p6 = pnand %p706_p1, %p679_p9 }
  0x34   : > { %p709_p11 = pneg %p708_p6 }
  0x36   : > { %p714_p13 = pnand %p712_p12, %p709_p11 }
  0x38   : > { %717 = shalt.err (!%p714_p13)
}
  0x39   : > { %s718_s28 = scalar_lea.vmem %s943_s5, 16  ;;  %s725_s17 = scalar_lea.vmem %s943_s5, 32 }
  0x3a   : > { %p719_p3 = scmp.ne.s32.totalorder %s943_s5, %s718_s28  ;;  %p726_p5 = scmp.lt.s32.totalorder %s943_s5, %s943_s5 }
  0x3b   : > { %p727_p10 = scmp.lt.s32.totalorder %s725_s17, %s718_s28 }
  0x3c   : > { %p721_p8 = pnand %p719_p3, %p679_p9 }
  0x3d   : > { %p728_p2 = por %p727_p10, %p726_p5 }
  0x3e   : > { %p722_p4 = pneg %p721_p8 }
  0x40   : > { %p729_p0 = pnand %p728_p2, %p722_p4 }
  0x42   : > { %732 = shalt.err (!%p729_p0)
}
  0x43   : > { %616 = dma.hbm_to_vmem [thread:$0]  (!%p933_p7), %s1141_s2, 16, %s943_s5, [#allocation6]  }
  0x44   : > { %s535_s22 = sshll.u32 %s154_s27, 6  ;;  %s565_s4 = sshll.u32 %s833_s15, 10 }
  0x45   : > { %s998_s8 = scalar_lea.hbm %s1139_s0, %s565_s4  ;;  %s158_s29 = scalar_lea.vmem [#allocation2], %s535_s22 }
  0x46   : > { %s165_s9 = sshll.u32 %s158_s29, 4  ;;  %s1002_s10 = scalar_lea.sflag [#allocation3], %s154_s27  ;;  %s1000_s9 = int_to_ptr.vmem [resolvable:$true] %s165_s9 }
  0x47   : > { %s733_s11 = scalar_lea.hbm %s998_s8, 1024  ;;  %p1156_p7 = scmp.ne.s32.totalorder %s1155_s30, 0 }
  0x48   : > { %p734_p9 = scmp.ne.s32.totalorder %s998_s8, %s733_s11  ;;  %s738_s17 = scalar_lea.hbm %s1139_s0, 2048 }
  0x49   : > { %p735_p1 = pneg %p1156_p7  ;;  %p739_p12 = scmp.lt.u32.totalorder %s998_s8, %s1139_s0 }
  0x4a   : > { %p740_p13 = scmp.lt.u32.totalorder %s738_s17, %s733_s11  ;;  %p742_p8 = scmp.lt.u32.totalorder %s733_s11, %s998_s8 }
  0x4b   : > { %p736_p6 = pnand %p735_p1, %p734_p9 }
  0x4c   : > { %p741_p3 = por %p740_p13, %p739_p12 }
  0x4d   : > { %p737_p11 = pneg %p736_p6 }
  0x4e   : > { %p743_p4 = por %p742_p8, %p741_p3 }
  0x50   : > { %p744_p5 = pnand %p743_p4, %p737_p11 }
  0x52   : > { %747 = shalt.err (!%p744_p5)
}
  0x53   : > { %s748_s27 = scalar_lea.vmem %s1000_s9, 1024  ;;  %s837_s22 = smov [#allocation2]  }
  0x54   : > { %p749_p10 = scmp.ne.s32.totalorder %s1000_s9, %s748_s27  ;;  %s753_s4 = sshll.u32 %s837_s22, 4  ;;  %s754_s4 = int_to_ptr.vmem [resolvable:$false] %s753_s4 }
  0x55   : > { %s755_s6 = scalar_lea.vmem %s754_s4, 2048  ;;  %p756_p9 = scmp.lt.s32.totalorder %s1000_s9, %s754_s4 }
  0x56   : > { %p751_p2 = pnand %p749_p10, %p735_p1  ;;  %p757_p6 = scmp.lt.s32.totalorder %s755_s6, %s748_s27 }
  0x58   : > { %p752_p0 = pneg %p751_p2  ;;  %p758_p12 = por %p757_p6, %p756_p9 }
  0x5a   : > { %p759_p13 = pnand %p758_p12, %p752_p0 }
  0x5c   : > { %762 = shalt.err (!%p759_p13)
}
  0x5d   : > { %s838_s7 = smov 64   ;;  %s839_s29 = smov 4  }
  0x5e   : > { %620 = dma.hbm_to_vmem [thread:$0]  (!%p1156_p7), %s998_s8, 1024, %s1000_s9, %s1002_s10, %s838_s7, %s838_s7, %s839_s29  }
  0x5f   : > { %p1157_p1 = scmp.ne.s32.totalorder %s1152_s26, 0 }
  0x60   : > { %s1033_s11 = sand.u32 (!%p1157_p1), 1, %s825_s13   ;;  %p1158_p11 = scmp.ne.s32.totalorder (!%p1157_p1), %s1149_s23, 0 }
  0x61   : > { %177 = sbr.rel (%p1157_p1) target bundleno = 353 (0x161), region = 32  ;;  %s539_s5 = sshll.u32 (!%p1157_p1), %s1033_s11, 6 }
  0x62   : > { %s180_s28 = scalar_lea.sflag (!%p1157_p1), [#allocation3], %s1033_s11  ;;  %s183_s17 = scalar_lea.vmem (!%p1157_p1), [#allocation2], %s539_s5 }
  0x68   : > { %808 = dma.done.wait (%p1158_p11), %s180_s28, 1024  }
  0x69   : > { %810 = vsyncadd (%p1158_p11), %s180_s28, 4294966272  ;;  %p1159_p3 = scmp.eq.s32.totalorder %s884_s16, 0 }
  0x6b   : > { %812 = dma.done.wait (%p1159_p3), [#allocation6], 80   ;;  %p1160_p7 = pmov %p1159_p3 }
  0x6c   : > { %vm306_vm0 = vcmask 1043456   ;;  %vm281_vm1 = vcmask 64512   ;;  %v233_v0 = vld [vmem:[#allocation5] sm:$0xf]  ;;  %v671_v4 = vld [vmem:[%s183_s17 + $0x8] sm:$0xff]   ;;  %v673_v6 = vld [vmem:[%s183_s17 + $0x10] sm:$0xff]  }
  0x6d   : > { %814 = vsyncadd (%p1160_p7), [#allocation6], 4294967216  ;;  %596 = vmatprep.subr.msk.bf16.mxu0 %vm306_vm0, %v233_v0  ;;  %597 = vmatprep.subr.msk.bf16.mxu1 %vm306_vm0, %v233_v0  ;;  %v308_v1 = vsel %vm306_vm0, %v233_v0, 0  ;;  %v669_v2 = vld [vmem:[%s183_s17] sm:$0xff]   ;;  %v672_v5 = vld [vmem:[%s183_s17 + $0x28] sm:$0xff]   ;;  %s542_s23 = sshll.u32 %s1033_s11, 7 }
  0x6e   : > { %577 = vmatpush3.bf16.msra.mxu0 %v308_v1  ;;  %595 = vmatpush3.bf16.msra.mxu1 %v308_v1  ;;  %v670_v3 = vld [vmem:[%s183_s17 + $0x20] sm:$0xff]   ;;  %v674_v7 = vld [vmem:[%s183_s17 + $0x30] sm:$0xff]   ;;  %v675_v8 = vld [vmem:[%s183_s17 + $0x18] sm:$0xff]   ;;  %vm407_vm2 = vcmask 261120   ;;  %s1054_s26 = scalar_lea.vmem [#allocation8], %s542_s23  ;;  %s566_s30 = sshll.u32 %s884_s16, 11 }
  0x6f   : > { %578 = vmatprep.mubr.msk.bf16.mxu0 %vm281_vm1, %v669_v2  ;;  %586 = vmatprep.mubr.msk.bf16.mxu1 %vm281_vm1, %v670_v3  ;;  %v676_v9 = vld [vmem:[%s183_s17 + $0x38] sm:$0xff]   ;;  %v543_v10 = vld [vmem:[#allocation7] ss:$0 sm:$0xff]  ;;  %s438_s8 = sshll.u32 %s1054_s26, 4  ;;  %s1083_s10 = scalar_lea.hbm %s1142_s3, %s566_s30  ;;  %s1085_s8 = int_to_ptr.vmem [resolvable:$true] %s438_s8 }
  0x70   : > { %s425_s19 = scalar_lea.sflag [#allocation4], %s1033_s11  ;;  %s763_s20 = scalar_lea.vmem %s1085_s8, 2048 }
  0x71   : > { %579 = vmatmul.mubr.msk.bf16.vlgmr.msra.gmra.mrb[0].mxu0 %vm281_vm1, %v671_v4  ;;  %587 = vmatmul.mubr.msk.bf16.vlgmr.msra.gmra.mrb[0].mxu1 %vm281_vm1, %v672_v5  ;;  %p764_p8 = scmp.ne.s32.totalorder %s1085_s8, %s763_s20  ;;  %p1161_p4 = scmp.ne.s32.totalorder %s1150_s24, 0 }
  0x72   : > { %582 = vmatprep.mubr.msk.bf16.mxu0 %vm281_vm1, %v673_v6  ;;  %590 = vmatprep.mubr.msk.bf16.mxu1 %vm281_vm1, %v674_v7  ;;  %s840_s27 = smov [#allocation8]  }
  0x73   : > { %p765_p5 = pnand %p764_p8, %p1161_p4  ;;  %s767_s22 = sshll.u32 %s840_s27, 4  ;;  %s768_s22 = int_to_ptr.vmem [resolvable:$false] %s767_s22 }
  0x74   : > { %s769_s4 = scalar_lea.vmem %s768_s22, 4096  ;;  %p770_p2 = scmp.lt.s32.totalorder %s1085_s8, %s768_s22 }
  0x75   : > { %p766_p10 = pneg %p765_p5  ;;  %p771_p0 = scmp.lt.s32.totalorder %s769_s4, %s763_s20 }
  0x77   : > { %p772_p9 = por %p771_p0, %p770_p2 }
  0x79   : > { %583 = vmatmul.mubr.msk.bf16.gmra.mrb[4].mxu0 %vm281_vm1, %v675_v8  ;;  %591 = vmatmul.mubr.msk.bf16.gmra.mrb[4].mxu1 %vm281_vm1, %v676_v9  ;;  %p773_p6 = pnand %p772_p9, %p766_p10 }
 0x144   : > { %v580_v11 = vpop.f32.mrb[0].mxu0  ;;  %v588_v13 = vpop.f32.mrb[0].mxu1 }
 0x145   : > { %v353_v12 = vadd.f32 %v580_v11, %v543_v10  ;;  %v344_v14 = vpop.f32.mrb[1].mxu0  ;;  %v385_v15 = vadd.f32 %v588_v13, %v543_v10  ;;  %v376_v17 = vpop.f32.mrb[1].mxu1 }
 0x146   : > { %v345_v16 = vadd.f32 %v543_v10, %v344_v14  ;;  %v581_v18 = vpop.f32.mrb[2].mxu0  ;;  %v377_v19 = vadd.f32 %v543_v10, %v376_v17  ;;  %v589_v21 = vpop.f32.mrb[2].mxu1 }
 0x147   : > { %410 = vst.msk [vmem:[%s1054_s26 + $0x10] sm:$0xff] %vm407_vm2, %v353_v12  ;;  %v356_v20 = vadd.f32 %v581_v18, %v543_v10  ;;  %v347_v22 = vpop.f32.mrb[3].mxu0  ;;  %418 = vst.msk [vmem:[%s1054_s26 + $0x50] sm:$0xff] %vm407_vm2, %v385_v15  ;;  %v388_v23 = vadd.f32 %v589_v21, %v543_v10  ;;  %v379_v25 = vpop.f32.mrb[3].mxu1 }
 0x148   : > { %408 = vst.msk [vmem:[%s1054_s26] sm:$0xff] %vm407_vm2, %v345_v16  ;;  %v348_v24 = vadd.f32 %v543_v10, %v347_v22  ;;  %416 = vst.msk [vmem:[%s1054_s26 + $0x40] sm:$0xff] %vm407_vm2, %v377_v19  ;;  %v380_v26 = vadd.f32 %v543_v10, %v379_v25 }
 0x149   : > { %411 = vst.msk [vmem:[%s1054_s26 + $0x18] sm:$0xff] %vm407_vm2, %v356_v20  ;;  %419 = vst.msk [vmem:[%s1054_s26 + $0x58] sm:$0xff] %vm407_vm2, %v388_v23 }
 0x14a   : > { %409 = vst.msk [vmem:[%s1054_s26 + $0x8] sm:$0xff] %vm407_vm2, %v348_v24  ;;  %417 = vst.msk [vmem:[%s1054_s26 + $0x48] sm:$0xff] %vm407_vm2, %v380_v26 }
 0x14c   : > { %v584_v27 = vpop.f32.mrb[4].mxu0  ;;  %v592_v29 = vpop.f32.mrb[4].mxu1 }
 0x14d   : > { %v369_v28 = vadd.f32 %v584_v27, %v543_v10  ;;  %v360_v30 = vpop.f32.mrb[5].mxu0  ;;  %v401_v31 = vadd.f32 %v592_v29, %v543_v10  ;;  %v392_v33 = vpop.f32.mrb[5].mxu1 }
 0x14e   : > { %v361_v32 = vadd.f32 %v543_v10, %v360_v30  ;;  %v585_v34 = vpop.f32.mrb[6].mxu0  ;;  %v393_v35 = vadd.f32 %v543_v10, %v392_v33  ;;  %v593_v37 = vpop.f32.mrb[6].mxu1 }
 0x14f   : > { %414 = vst.msk [vmem:[%s1054_s26 + $0x30] sm:$0xff] %vm407_vm2, %v369_v28  ;;  %v372_v36 = vadd.f32 %v585_v34, %v543_v10  ;;  %v363_v38 = vpop.f32.mrb[7].mxu0  ;;  %422 = vst.msk [vmem:[%s1054_s26 + $0x70] sm:$0xff] %vm407_vm2, %v401_v31  ;;  %v404_v39 = vadd.f32 %v593_v37, %v543_v10  ;;  %v395_v41 = vpop.f32.mrb[7].mxu1 }
 0x150   : > { %412 = vst.msk [vmem:[%s1054_s26 + $0x20] sm:$0xff] %vm407_vm2, %v361_v32  ;;  %v364_v40 = vadd.f32 %v543_v10, %v363_v38  ;;  %420 = vst.msk [vmem:[%s1054_s26 + $0x60] sm:$0xff] %vm407_vm2, %v393_v35  ;;  %v396_v42 = vadd.f32 %v543_v10, %v395_v41 }
 0x151   : > { %415 = vst.msk [vmem:[%s1054_s26 + $0x38] sm:$0xff] %vm407_vm2, %v372_v36  ;;  %423 = vst.msk [vmem:[%s1054_s26 + $0x78] sm:$0xff] %vm407_vm2, %v404_v39 }
 0x152   : > { %413 = vst.msk [vmem:[%s1054_s26 + $0x28] sm:$0xff] %vm407_vm2, %v364_v40  ;;  %421 = vst.msk [vmem:[%s1054_s26 + $0x68] sm:$0xff] %vm407_vm2, %v396_v42 }
 0x153   : > { %776 = shalt.err (!%p773_p6)
}
 0x154   : > { %s777_s6 = scalar_lea.hbm %s1083_s10, 2048  ;;  %s781_s5 = scalar_lea.hbm %s1142_s3, 4096 }
 0x155   : > { %p778_p12 = scmp.ne.s32.totalorder %s1083_s10, %s777_s6  ;;  %p782_p11 = scmp.lt.u32.totalorder %s1083_s10, %s1142_s3 }
 0x156   : > { %p783_p3 = scmp.lt.u32.totalorder %s781_s5, %s777_s6  ;;  %p785_p8 = scmp.lt.u32.totalorder %s777_s6, %s1083_s10 }
 0x157   : > { %p779_p13 = pnand %p778_p12, %p1161_p4 }
 0x158   : > { %p784_p7 = por %p783_p3, %p782_p11 }
 0x159   : > { %p780_p1 = pneg %p779_p13 }
 0x15a   : > { %p786_p5 = por %p785_p8, %p784_p7 }
 0x15c   : > { %p787_p10 = pnand %p786_p5, %p780_p1 }
 0x15e   : > { %790 = shalt.err (!%p787_p10)
}
 0x15f   : > { %s841_s23 = smov 128   ;;  %s842_s26 = smov 8  }
 0x160   : > { %608 = dma.vmem_to_hbm [thread:$0]  (%p1161_p4), %s1085_s8, 2048, %s1083_s10, %s425_s19, %s841_s23, %s841_s23, %s842_s26  }
 0x161 PF: > { %s453_s30 = sand.u32 1, %s821_s12   ;;  %p1162_p2 = scmp.ne.s32.totalorder %s1151_s25, 0 }
 0x162   : > { %p1163_p0 = scmp.ge.s32.totalorder %s833_s15, 2  ;;  %s454_s16 = scalar_lea.sflag [#allocation4], %s453_s30 }
 0x164   : > { %p622_p9 = pnand %p1163_p0, %p1162_p2 }
 0x166   : > { %816 = dma.done.wait (!%p622_p9), %s454_s16, 2048  }
 0x167   : > { %818 = vsyncadd (!%p622_p9), %s454_s16, 4294965248  ;;  %p17_p6 = scmp.ge.s32.totalorder %s888_s18, 4   ;;  %s1164_s12 = smov %s825_s13 }
 0x168   : > { %s1165_s13 = smov %s829_s14  ;;  %s1166_s14 = smov %s900_s21 }
 0x169   : > { %s1167_s15 = smov %s888_s18  ;;  %19 = sbr.rel (!%p17_p6) target bundleno = 6 (0x6), region = 85 }
 0x170   :  { %459 = vsyncpa [#allocation3], 1 }
 0x171   :  { %461 = vsyncpa [#allocation3 + $0x1], 1 }
 0x172   :  { %462 = vsyncpa [#allocation6], 1 }
 0x173   :  { %463 = vsyncpa [#allocation4], 1 }
 0x174   :  { %465 = vsyncpa [#allocation4 + $0x1], 1 }

// kernel: struct2property_forward.11
= control target key start
LH: loop header
LB: loop body
LE: loop exit
PB: predicated region body
PF: predicated region fallthrough
CT: control target
= control target key end

     0   :  { %s1710_s0 = inlined_call_operand.hbm [shape: f32[32,32], index: 0, kind: input, shape index: {}]   ;;  %s1711_s1 = inlined_call_operand.hbm [shape: f32[32,1], index: 1, kind: input, shape index: {}]   ;;  %s1712_s2 = inlined_call_operand.hbm [shape: bf16[32,32], index: 2, kind: input, shape index: {}]   ;;  %s1713_s3 = inlined_call_operand.hbm [shape: f32[1,32], index: 3, kind: input, shape index: {}]   ;;  %s1714_s4 = inlined_call_operand.hbm [shape: f32[1,32], index: 4, kind: input, shape index: {}]   ;;  %s1715_s5 = inlined_call_operand.<no memory space> [shape: f32[1,1], index: 5, kind: input, shape index: {}]   ;;  %s1716_s6 = inlined_call_operand.hbm [shape: bf16[32,128], index: 6, kind: input, shape index: {}]   ;;  %s1717_s7 = inlined_call_operand.hbm [shape: f32[1,128], index: 7, kind: input, shape index: {}]   ;;  %s1718_s8 = inlined_call_operand.hbm [shape: f32[2,1,128], index: 8, kind: output, shape index: {}]  }
   0x1   :  { %1723 = sst [smem:[#allocation22_spill]] %s1710_s0  ;;  %v13_v0 = vstv %s1715_s5 }
   0x2   :  { %1724 = sst [smem:[#allocation23_spill]] %s1712_s2  ;;  %14 = vst [vmem:[#allocation2] sm:$0x1] %v13_v0 }
   0x3   :  { %1725 = sst [smem:[#allocation24_spill]] %s1713_s3 }
   0x4   :  { %1726 = sst [smem:[#allocation25_spill]] %s1714_s4 }
   0x5   :  { %15 = vsyncpa [#allocation4], 0 }
   0x6   :  { %17 = vsyncpa [#allocation4 + $0x1], 0 }
   0x7   :  { %18 = vsyncpa [#allocation7], 0 }
   0x8   :  { %20 = vsyncpa [#allocation7 + $0x1], 0 }
   0x9   :  { %21 = vsyncpa [#allocation10], 0 }
   0xa   :  { %22 = vsyncpa [#allocation13], 0 }
   0xb   :  { %23 = vsyncpa [#allocation5], 0 }
   0xc   :  { %25 = vsyncpa [#allocation5 + $0x1], 0  ;;  %s1322_s29 = smov 0   ;;  %s1324_s30 = smov 0  }
   0xd   :  { %s1326_s9 = smov 0   ;;  %s1328_s10 = smov 0  }
   0xe LB: > { %s1259_s5 = smov [#allocation8]   ;;  %s1343_s12 = sadd.s32 4294967295, %s1257_s10   ;;  %s1257_s10 = sphi %s1328_s10, %s1753_s10   ;;  %s1253_s9 = sphi %s1326_s9, %s1752_s9   ;;  %s1249_s30 = sphi %s1324_s30, %s1751_s30   ;;  %s1245_s29 = sphi %s1322_s29, %s1750_s29  }
   0xf   : > { %s252_s11 = sshll.u32 %s1259_s5, 4  ;;  %p797_p0 = scmp.ge.s32.totalorder %s1257_s10, 1  ;;  %s1348_s11 = int_to_ptr.vmem [resolvable:$true] %s252_s11 }
  0x10   : > { %p1719_p1 = scmp.eq.s32.totalorder %s1343_s12, 0  ;;  %p240_p2 = scmp.lt.s32.totalorder %s1257_s10, 3 }
  0x11   : > { %s1260_s14 = smov [#allocation9]   ;;  %s1261_s17 = smov [#allocation12]  }
  0x12   : > { %p1350_p3 = pnand %p797_p0, %p240_p2  ;;  %s266_s15 = sshll.u32 %s1260_s14, 4  ;;  %s1363_s15 = int_to_ptr.vmem [resolvable:$true] %s266_s15 }
  0x13   : > { %s290_s18 = sshll.u32 %s1261_s17, 4  ;;  %s1729_s2 = sld [smem:[#allocation23_spill]]  ;;  %s1365_s18 = int_to_ptr.vmem [resolvable:$true] %s290_s18 }
  0x14   : > { %s1727_s13 = scalar_select %p1350_p3, 1, 0 }
  0x15   : > { %p880_p5 = pneg %p1350_p3 }
  0x17   : > { %p1359_p6 = pnand %p880_p5, %p1719_p1 }
  0x19   : > { %s975_s21 = scalar_lea.hbm %s1729_s2, 256  ;;  %p1375_p8 = pneg %p1359_p6 }
  0x1a   : > { %p976_p7 = scmp.ne.s32.totalorder %s1729_s2, %s975_s21  ;;  %p982_p11 = scmp.lt.u32.totalorder %s975_s21, %s1729_s2 }
  0x1c   : > { %p978_p9 = pnand %p1375_p8, %p976_p7 }
  0x1e   : > { %p979_p10 = pneg %p978_p9 }
  0x20   : > { %p984_p12 = pnand %p982_p11, %p979_p10 }
  0x22   : > { %987 = shalt.err (!%p984_p12)
}
  0x23   : > { %s988_s27 = scalar_lea.vmem %s1348_s11, 256  ;;  %p996_p5 = scmp.lt.s32.totalorder %s1348_s11, %s1348_s11 }
  0x24   : > { %p989_p13 = scmp.ne.s32.totalorder %s1348_s11, %s988_s27  ;;  %p997_p4 = scmp.lt.s32.totalorder %s988_s27, %s988_s27 }
  0x26   : > { %p991_p0 = pnand %p989_p13, %p1375_p8  ;;  %p998_p7 = por %p997_p4, %p996_p5 }
  0x28   : > { %p992_p2 = pneg %p991_p0 }
  0x2a   : > { %p999_p9 = pnand %p998_p7, %p992_p2 }
  0x2c   : > { %1002 = shalt.err (!%p999_p9)
}
  0x2d   : > { %s1262_s28 = smov 64   ;;  %s1263_s5 = smov 4  }
  0x2e   : > { %883 = dma.hbm_to_vmem [thread:$0]  (!%p1359_p6), %s1729_s2, 256, %s1348_s11, [#allocation7], %s1262_s28, %s1262_s28, %s1263_s5  }
  0x2f   : > { %s1731_s3 = sld [smem:[#allocation24_spill]] }
  0x35   : > { %s1003_s21 = scalar_lea.hbm %s1731_s3, 16 }
  0x36   : > { %p1004_p4 = scmp.ne.s32.totalorder %s1731_s3, %s1003_s21  ;;  %p1010_p12 = scmp.lt.u32.totalorder %s1003_s21, %s1731_s3 }
  0x38   : > { %p1006_p10 = pnand %p1004_p4, %p1375_p8 }
  0x3a   : > { %p1007_p11 = pneg %p1006_p10 }
  0x3c   : > { %p1012_p13 = pnand %p1010_p12, %p1007_p11 }
  0x3e   : > { %1015 = shalt.err (!%p1012_p13)
}
  0x3f   : > { %s1016_s11 = scalar_lea.vmem %s1363_s15, 16  ;;  %s1023_s27 = scalar_lea.vmem %s1363_s15, 32 }
  0x40   : > { %p1017_p0 = scmp.ne.s32.totalorder %s1363_s15, %s1016_s11  ;;  %p1024_p7 = scmp.lt.s32.totalorder %s1363_s15, %s1363_s15 }
  0x41   : > { %p1025_p9 = scmp.lt.s32.totalorder %s1023_s27, %s1016_s11 }
  0x42   : > { %p1019_p2 = pnand %p1017_p0, %p1375_p8 }
  0x43   : > { %p1026_p4 = por %p1025_p9, %p1024_p7 }
  0x44   : > { %p1020_p5 = pneg %p1019_p2 }
  0x46   : > { %p1027_p10 = pnand %p1026_p4, %p1020_p5 }
  0x48   : > { %1030 = shalt.err (!%p1027_p10)
}
  0x49   : > { %886 = dma.hbm_to_vmem [thread:$0]  (!%p1359_p6), %s1731_s3, 16, %s1363_s15, [#allocation10]  }
  0x4a   : > { %s1031_s21 = scalar_lea.hbm %s1716_s6, 256 }
  0x4b   : > { %p1032_p11 = scmp.ne.s32.totalorder %s1716_s6, %s1031_s21  ;;  %p1038_p0 = scmp.lt.u32.totalorder %s1031_s21, %s1716_s6 }
  0x4d   : > { %p1034_p12 = pnand %p1032_p11, %p1375_p8 }
  0x4f   : > { %p1035_p13 = pneg %p1034_p12 }
  0x51   : > { %p1040_p2 = pnand %p1038_p0, %p1035_p13 }
  0x53   : > { %1043 = shalt.err (!%p1040_p2)
}
  0x54   : > { %s1044_s15 = scalar_lea.vmem %s1365_s18, 256  ;;  %p1052_p4 = scmp.lt.s32.totalorder %s1365_s18, %s1365_s18 }
  0x55   : > { %p1045_p5 = scmp.ne.s32.totalorder %s1365_s18, %s1044_s15  ;;  %p1053_p10 = scmp.lt.s32.totalorder %s1044_s15, %s1044_s15 }
  0x57   : > { %p1047_p7 = pnand %p1045_p5, %p1375_p8  ;;  %p1054_p11 = por %p1053_p10, %p1052_p4 }
  0x59   : > { %p1048_p9 = pneg %p1047_p7 }
  0x5b   : > { %p1055_p12 = pnand %p1054_p11, %p1048_p9 }
  0x5d   : > { %1058 = shalt.err (!%p1055_p12)
}
  0x5e   : > { %892 = dma.hbm_to_vmem [thread:$0]  (!%p1359_p6), %s1716_s6, 256, %s1365_s18, [#allocation13], %s1262_s28, %s1262_s28, %s1263_s5  }
  0x5f   : > { %s1264_s14 = smov [#allocation11]   ;;  %s1265_s19 = smov [#allocation14]  }
  0x60   : > { %s277_s17 = sshll.u32 %s1264_s14, 4  ;;  %s304_s20 = sshll.u32 %s1265_s19, 4  ;;  %s278_s17 = int_to_ptr.vmem [resolvable:$true] %s277_s17  ;;  %s305_s20 = int_to_ptr.vmem [resolvable:$true] %s304_s20 }
  0x61   : > { %s1732_s4 = sld [smem:[#allocation25_spill]] }
  0x67   : > { %s1059_s23 = scalar_lea.hbm %s1732_s4, 16 }
  0x68   : > { %p1060_p13 = scmp.ne.s32.totalorder %s1732_s4, %s1059_s23  ;;  %p1066_p5 = scmp.lt.u32.totalorder %s1059_s23, %s1732_s4 }
  0x6a   : > { %p1062_p0 = pnand %p1060_p13, %p1375_p8 }
  0x6c   : > { %p1063_p2 = pneg %p1062_p0 }
  0x6e   : > { %p1068_p7 = pnand %p1066_p5, %p1063_p2 }
  0x70   : > { %1071 = shalt.err (!%p1068_p7)
}
  0x71   : > { %s1072_s18 = scalar_lea.vmem %s278_s17, 16  ;;  %s1079_s28 = scalar_lea.vmem %s278_s17, 32 }
  0x72   : > { %p1073_p9 = scmp.ne.s32.totalorder %s278_s17, %s1072_s18  ;;  %p1080_p11 = scmp.lt.s32.totalorder %s278_s17, %s278_s17 }
  0x73   : > { %p1081_p12 = scmp.lt.s32.totalorder %s1079_s28, %s1072_s18 }
  0x74   : > { %p1075_p4 = pnand %p1073_p9, %p1375_p8 }
  0x75   : > { %p1082_p1 = por %p1081_p12, %p1080_p11 }
  0x76   : > { %p1076_p10 = pneg %p1075_p4 }
  0x78   : > { %p1083_p3 = pnand %p1082_p1, %p1076_p10 }
  0x7a   : > { %1086 = shalt.err (!%p1083_p3)
}
  0x7b   : > { %889 = dma.hbm_to_vmem [thread:$0]  (!%p1359_p6), %s1732_s4, 16, %s278_s17, [#allocation10]  }
  0x7c   : > { %s1087_s21 = scalar_lea.hbm %s1717_s7, 16 }
  0x7d   : > { %p1088_p13 = scmp.ne.s32.totalorder %s1717_s7, %s1087_s21  ;;  %p1094_p3 = scmp.lt.u32.totalorder %s1087_s21, %s1717_s7 }
  0x7f   : > { %p1090_p0 = pnand %p1088_p13, %p1375_p8 }
  0x81   : > { %p1091_p1 = pneg %p1090_p0 }
  0x83   : > { %p1096_p2 = pnand %p1094_p3, %p1091_p1 }
  0x85   : > { %1099 = shalt.err (!%p1096_p2)
}
  0x86   : > { %s1100_s15 = scalar_lea.vmem %s305_s20, 16  ;;  %s1107_s17 = scalar_lea.vmem %s305_s20, 32 }
  0x87   : > { %p1101_p5 = scmp.ne.s32.totalorder %s305_s20, %s1100_s15  ;;  %p1108_p4 = scmp.lt.s32.totalorder %s305_s20, %s305_s20 }
  0x88   : > { %p1109_p10 = scmp.lt.s32.totalorder %s1107_s17, %s1100_s15 }
  0x89   : > { %p1103_p7 = pnand %p1101_p5, %p1375_p8 }
  0x8a   : > { %p1110_p11 = por %p1109_p10, %p1108_p4 }
  0x8b   : > { %p1104_p9 = pneg %p1103_p7 }
  0x8d   : > { %p1111_p12 = pnand %p1110_p11, %p1104_p9 }
  0x8f   : > { %1114 = shalt.err (!%p1111_p12)
}
  0x90   : > { %895 = dma.hbm_to_vmem [thread:$0]  (!%p1359_p6), %s1717_s7, 16, %s305_s20, [#allocation13]  }
  0x91   : > { %s796_s24 = sadd.s32 4294967294, %s1257_s10   ;;  %s1487_s16 = sadd.s32 1, %s1257_s10  }
  0x92   : > { %s38_s28 = sadd.s32 1, %s1253_s9  ;;  %s35_s5 = ssub.s32 %s1257_s10, %s1487_s16 }
  0x93   : > { %p45_p8 = scmp.ne.s32.totalorder %s1253_s9, %s1249_s30  ;;  %p36_p13 = scmp.eq.s32.totalorder %s35_s5, 0 }
  0x94   : > { %p46_p0 = scmp.eq.s32.totalorder %s1257_s10, 0  ;;  %p51_p1 = scmp.ne.s32.totalorder %s1249_s30, %s1245_s29 }
  0x95   : > { %p227_p3 = scmp.eq.s32.totalorder %s1343_s12, 1  ;;  %p1733_p5 = scmp.eq.s32.totalorder %s1343_s12, 0 }
  0x96   : > { %s1499_s27 = scalar_select %p36_p13, %s1253_s9, %s38_s28  }
  0x97   : > { %p47_p2 = por %p46_p0, %p45_p8  ;;  %p1503_p7 = por %p1733_p5, %p51_p1 }
  0x98   : > { %p1507_p6 = por %p227_p3, %p45_p8  ;;  %p233_p9 = scmp.eq.s32.totalorder %s796_s24, 1 }
  0x99   : > { %p912_p4 = scmp.lt.s32.totalorder %s1257_s10, 2  ;;  %s315_s19 = sand.u32 1, %s1253_s9  }
  0x9a   : > { %s1735_s14 = scalar_select %p1507_p6, 1, 0 }
  0x9b   : > { %p1513_p10 = por %p233_p9, %p51_p1  ;;  %s1517_s22 = sshll.u32 %s315_s19, 4 }
  0x9c   : > { %s1721_s23 = sshll.u32 %s1257_s10, 8  ;;  %s1737_s0 = sld [smem:[#allocation22_spill]] }
  0x9d   : > { %s1736_s21 = scalar_select %p1513_p10, 1, 0 }
  0x9e   : > { %s319_s17 = scalar_lea.vmem [#allocation3], %s1517_s22  ;;  %p1528_p11 = pnand %p912_p4, %p47_p2 }
  0x9f   : > { %s326_s11 = sshll.u32 %s319_s17, 4  ;;  %s1534_s24 = scalar_lea.sflag [#allocation4], %s315_s19  ;;  %s1532_s11 = int_to_ptr.vmem [resolvable:$true] %s326_s11 }
  0xa0   : > { %p1117_p8 = pneg %p1528_p11 }
  0xa2   : > { %s1525_s15 = scalar_lea.hbm %s1737_s0, %s1721_s23  ;;  %s1120_s26 = scalar_lea.hbm %s1737_s0, 512 }
  0xa3   : > { %s1115_s28 = scalar_lea.hbm %s1525_s15, 256  ;;  %p1121_p1 = scmp.lt.u32.totalorder %s1525_s15, %s1737_s0 }
  0xa4   : > { %p1116_p12 = scmp.ne.s32.totalorder %s1525_s15, %s1115_s28  ;;  %p1122_p3 = scmp.lt.u32.totalorder %s1120_s26, %s1115_s28 }
  0xa5   : > { %p1124_p5 = scmp.lt.u32.totalorder %s1115_s28, %s1525_s15 }
  0xa6   : > { %p1118_p13 = pnand %p1117_p8, %p1116_p12  ;;  %p1123_p2 = por %p1122_p3, %p1121_p1 }
  0xa8   : > { %p1119_p0 = pneg %p1118_p13  ;;  %p1125_p9 = por %p1124_p5, %p1123_p2 }
  0xaa   : > { %p1126_p4 = pnand %p1125_p9, %p1119_p0 }
  0xac   : > { %1129 = shalt.err (!%p1126_p4)
}
  0xad   : > { %s1130_s19 = scalar_lea.vmem %s1532_s11, 256  ;;  %s1266_s5 = smov [#allocation3]  }
  0xae   : > { %p1131_p12 = scmp.ne.s32.totalorder %s1532_s11, %s1130_s19  ;;  %s1135_s25 = sshll.u32 %s1266_s5, 4  ;;  %s1136_s25 = int_to_ptr.vmem [resolvable:$false] %s1135_s25 }
  0xaf   : > { %s1137_s23 = scalar_lea.vmem %s1136_s25, 512  ;;  %p1138_p6 = scmp.lt.s32.totalorder %s1532_s11, %s1136_s25 }
  0xb0   : > { %p1133_p13 = pnand %p1131_p12, %p1117_p8  ;;  %p1139_p1 = scmp.lt.s32.totalorder %s1137_s23, %s1130_s19 }
  0xb2   : > { %p1134_p10 = pneg %p1133_p13  ;;  %p1140_p3 = por %p1139_p1, %p1138_p6 }
  0xb4   : > { %p1141_p2 = pnand %p1140_p3, %p1134_p10 }
  0xb6   : > { %1144 = shalt.err (!%p1141_p2)
}
  0xb7   : > { %s1267_s28 = smov 128   ;;  %s1268_s26 = smov 8  }
  0xb8   : > { %899 = dma.hbm_to_vmem [thread:$0]  (!%p1528_p11), %s1525_s15, 256, %s1532_s11, %s1534_s24, %s1267_s28, %s1267_s28, %s1268_s26  }
  0xb9   : > { %s1739_s17 = sshll.u32 %s1257_s10, 8  ;;  %s340_s23 = scalar_lea.vmem [#allocation6], %s1517_s22 }
  0xba   : > { %s1570_s25 = scalar_lea.hbm %s1711_s1, %s1739_s17  ;;  %s347_s0 = sshll.u32 %s340_s23, 4  ;;  %s1574_s0 = int_to_ptr.vmem [resolvable:$true] %s347_s0 }
  0xbb   : > { %s336_s2 = sand.u32 1, %s1257_s10   ;;  %s1145_s4 = scalar_lea.hbm %s1570_s25, 256 }
  0xbc   : > { %s1576_s3 = scalar_lea.sflag [#allocation7], %s336_s2  ;;  %p1146_p6 = scmp.ne.s32.totalorder %s1570_s25, %s1145_s4 }
  0xbd   : > { %s1150_s24 = scalar_lea.hbm %s1711_s1, 512  ;;  %p1151_p5 = scmp.lt.u32.totalorder %s1570_s25, %s1711_s1 }
  0xbe   : > { %p1148_p10 = pnand %p1146_p6, %p1117_p8  ;;  %p1152_p9 = scmp.lt.u32.totalorder %s1150_s24, %s1145_s4 }
  0xbf   : > { %p1154_p12 = scmp.lt.u32.totalorder %s1145_s4, %s1570_s25 }
  0xc0   : > { %p1149_p0 = pneg %p1148_p10  ;;  %p1153_p4 = por %p1152_p9, %p1151_p5 }
  0xc2   : > { %p1155_p13 = por %p1154_p12, %p1153_p4 }
  0xc4   : > { %p1156_p1 = pnand %p1155_p13, %p1149_p0 }
  0xc6   : > { %1159 = shalt.err (!%p1156_p1)
}
  0xc7   : > { %s1160_s2 = scalar_lea.vmem %s1574_s0, 256  ;;  %s1269_s22 = smov [#allocation6]  }
  0xc8   : > { %p1161_p3 = scmp.ne.s32.totalorder %s1574_s0, %s1160_s2  ;;  %s1165_s5 = sshll.u32 %s1269_s22, 4  ;;  %s1166_s5 = int_to_ptr.vmem [resolvable:$false] %s1165_s5 }
  0xc9   : > { %s1167_s23 = scalar_lea.vmem %s1166_s5, 512  ;;  %p1168_p10 = scmp.lt.s32.totalorder %s1574_s0, %s1166_s5 }
  0xca   : > { %p1163_p2 = pnand %p1161_p3, %p1117_p8  ;;  %p1169_p5 = scmp.lt.s32.totalorder %s1167_s23, %s1160_s2 }
  0xcc   : > { %p1164_p6 = pneg %p1163_p2  ;;  %p1170_p9 = por %p1169_p5, %p1168_p10 }
  0xce   : > { %p1171_p4 = pnand %p1170_p9, %p1164_p6 }
  0xd0   : > { %1174 = shalt.err (!%p1171_p4)
}
  0xd1   : > { %902 = dma.hbm_to_vmem [thread:$0]  (!%p1528_p11), %s1570_s25, 256, %s1574_s0, %s1576_s3, %s1267_s28, %s1267_s28, %s1268_s26  }
  0xd2   : > { %p1740_p8 = scmp.ne.s32.totalorder %s1727_s13, 0 }
  0xd3   : > { %s1608_s4 = sand.u32 (!%p1740_p8), 1, %s1249_s30  }
  0xd4   : > { %359 = sbr.rel (%p1740_p8) target bundleno = 1049 (0x419), region = 52  ;;  %s811_s15 = sshll.u32 (!%p1740_p8), %s1608_s4, 4 }
  0xd5   : > { %s362_s11 = scalar_lea.sflag (!%p1740_p8), [#allocation4], %s1608_s4  ;;  %s365_s24 = scalar_lea.vmem (!%p1740_p8), [#allocation3], %s811_s15 }
  0xdb   : > { %1220 = dma.done.wait (%p1503_p7), %s362_s11, 256  }
  0xdc   : > { %1222 = vsyncadd (%p1503_p7), %s362_s11, 4294967040  ;;  %s370_s0 = sand.u32 1, %s1343_s12   ;;  %s1617_s13 = scalar_lea.vmem [#allocation6], %s811_s15 }
  0xdd   : > { %s371_s3 = scalar_lea.sflag [#allocation7], %s370_s0 }
  0xde   : > { %1224 = dma.done.wait (%p1503_p7), %s371_s3, 256  }
  0xdf   : > { %1226 = vsyncadd (%p1503_p7), %s371_s3, 4294967040  ;;  %p1741_p11 = scmp.eq.s32.totalorder %s1343_s12, 0 }
  0xe1   : > { %1228 = dma.done.wait (%p1741_p11), [#allocation7], 256   ;;  %p1742_p0 = pmov %p1741_p11 }
  0xe3   : > { %1230 = vsyncadd (%p1742_p0), [#allocation7], 4294967040  ;;  %p1743_p12 = pmov %p1742_p0 }
  0xe4   : > { %p1744_p13 = pmov %p1742_p0 }
  0xe5   : > { %1232 = dma.done.wait (%p1743_p12), [#allocation10], 32  }
  0xe6   : > { %1234 = vsyncadd (%p1744_p13), [#allocation10], 4294967264  ;;  %p1745_p1 = pmov %p1742_p0 }
  0xe7   : > { %p1746_p3 = pmov %p1742_p0 }
  0xe8   : > { %1236 = dma.done.wait (%p1745_p1), [#allocation13], 272  }
  0xe9   : > { %1238 = vsyncadd (%p1746_p3), [#allocation13], 4294967024  ;;  %v1270_v1 = vmov 0.0   ;;  %vm1271_vm0 = vmmov 0   ;;  %v965_v2 = vld [vmem:[#allocation8] sm:$0xff]   ;;  %v966_v3 = vld [vmem:[#allocation8 + $0x8] sm:$0xff]  }
  0xea   : > { %838 = vmatprep.subr.bf16.mxu0 %v1270_v1  ;;  %842 = vmatprep.mubr.msk.bf16.mxu0 %vm1271_vm0, %v1270_v1  ;;  %v434_v4 = vld [vmem:[%s365_s24] sm:$0xff]  ;;  %v435_v5 = vld [vmem:[%s365_s24 + $0x8] sm:$0xff]  ;;  %vm460_vm1 = vcmask 261120   ;;  %v1272_v19 = vmov 0   ;;  %vm535_vm4 = vcmask 7168   ;;  %s827_s20 = sshll.u32 %s1343_s12, 4 }
  0xeb   : > { %846 = vmatprep.subr.bf16.mxu1 %v1270_v1  ;;  %850 = vmatprep.mubr.msk.bf16.mxu1 %vm1271_vm0, %v1270_v1  ;;  %v436_v6 = vpack.c.bf16 %v435_v5, %v434_v4  ;;  %v818_v7 = vld [vmem:[#allocation9] ss:$0 sm:$0xff]  ;;  %v822_v9 = vld [vmem:[#allocation11] ss:$0 sm:$0xff]  ;;  %v823_v20 = vld [vmem:[#allocation2] ss:$0 sm:$0xff]  ;;  %s1666_s17 = scalar_lea.hbm %s1718_s8, %s827_s20 }
  0xec   : > { %839 = vmatpush3.bf16.msra.mxu0 %v965_v2  ;;  %963 = vset.pattern.permute.xlu1 %v1272_v19  ;;  %v529_v21 = vld [vmem:[%s1617_s13] sm:$0xff]  ;;  %v530_v24 = vld [vmem:[%s1617_s13 + $0x8] sm:$0xff]  ;;  %s430_s18 = scalar_lea.vmem [#allocation15], %s1608_s4  ;;  %s648_s19 = scalar_lea.sflag [#allocation5], %s1608_s4 }
  0xed   : > { %840 = vmatprep.subr.bf16.mxu0 %v1270_v1  ;;  %964 = vset.pattern.permute.xlu0 %v1272_v19  ;;  %vm531_vm2 = vcmp.gt.f32.partialorder %v529_v21, 0.0  ;;  %vm532_vm3 = vcmp.gt.f32.partialorder %v530_v24, 0.0  ;;  %v967_v56 = vld [vmem:[#allocation12] sm:$0xff]   ;;  %v968_v57 = vld [vmem:[#allocation12 + $0x8] sm:$0xff]   ;;  %s660_s28 = sshll.u32 %s430_s18, 4  ;;  %p1747_p2 = scmp.ne.s32.totalorder %s1735_s14, 0  ;;  %s1668_s28 = int_to_ptr.vmem [resolvable:$true] %s660_s28 }
  0xee   : > { %847 = vmatpush3.bf16.msra.mxu1 %v967_v56  ;;  %s1175_s12 = scalar_lea.vmem %s1668_s28, 16  ;;  %s1273_s2 = smov [#allocation15]  }
  0xef   : > { %848 = vmatprep.subr.bf16.mxu1 %v1270_v1  ;;  %p1176_p7 = scmp.ne.s32.totalorder %s1668_s28, %s1175_s12  ;;  %s1179_s22 = sshll.u32 %s1273_s2, 4  ;;  %s1180_s22 = int_to_ptr.vmem [resolvable:$false] %s1179_s22 }
  0xf0   : > { %841 = vmatpush3.bf16.msra.mxu0 %v966_v3  ;;  %s1181_s5 = scalar_lea.vmem %s1180_s22, 32  ;;  %p1182_p5 = scmp.lt.s32.totalorder %s1668_s28, %s1180_s22 }
  0xf1   : > { %p1177_p6 = pnand %p1176_p7, %p1747_p2  ;;  %p1183_p9 = scmp.lt.s32.totalorder %s1181_s5, %s1175_s12 }
  0xf2   : > { %849 = vmatpush3.bf16.msra.mxu1 %v968_v57 }
  0xf3   : > { %843 = vmatmul.mubr.msk.bf16.vlgmr.msra.gmra.mrb[0].mxu0 %vm460_vm1, %v436_v6  ;;  %p1178_p10 = pneg %p1177_p6  ;;  %p1184_p4 = por %p1183_p9, %p1182_p5 }
  0xf5   : > { %p1185_p8 = pnand %p1184_p4, %p1178_p10 }
 0x1c6   : > { %v498_v8 = vpop.f32.mrb[0].mxu0 }
 0x1c7   : > { %v1641_v10 = vadd.f32 %v818_v7, %v498_v8  ;;  %v844_v11 = vpop.f32.mrb[1].mxu0 }
 0x1c8   : > { %v501_v12 = vpop.f32.mrb[2].mxu0 }
 0x1c9   : > { %v1643_v13 = vadd.f32 %v818_v7, %v501_v12  ;;  %v845_v14 = vpop.f32.mrb[3].mxu0  ;;  %v512_v15 = vmul.f32 %v822_v9, %v1641_v10 }
 0x1cb   : > { %v514_v16 = vsel %vm460_vm1, %v512_v15, 0.0  ;;  %v513_v17 = vmul.f32 %v822_v9, %v1643_v13  ;;  %v590_v9 = vld [vmem:[#allocation14] sm:$0x1] }
 0x1cc   : > { %515 = vadd.xlane.f32.xlu0 %v514_v16 }
 0x1cd   : > { %v517_v18 = vsel %vm460_vm1, %v513_v17, 0.0 }
 0x1d0   : > { %518 = vadd.xlane.f32.xlu0 %v517_v18 }
 0x259   : > { %v516_v22 = vpop.xlane.xlu0 %515 }
 0x25a   : > { %v527_v23 = vadd.f32 %v823_v20, %v516_v22 }
 0x25c   : > { %v533_v26 = vsel %vm531_vm2, %v527_v23, -1e+30 }
 0x25d   : > { %v519_v25 = vpop.xlane.xlu0 %518  ;;  %v536_v29 = vsel %vm535_vm4, %v533_v26, -inf }
 0x25e   : > { %v528_v27 = vadd.f32 %v823_v20, %v519_v25 }
 0x260   : > { %v534_v28 = vsel %vm532_vm3, %v528_v27, -1e+30 }
 0x261   : > { %v537_v30 = vsel %vm535_vm4, %v534_v28, -inf }
 0x262   : > { %v538_v31 = vmax.f32 %v536_v29, %v537_v30 }
 0x264   : > { %v539_v32 = vrot.slane %v538_v31, 4 }
 0x266   : > { %v540_v33 = vmax.f32 %v538_v31, %v539_v32 }
 0x268   : > { %v541_v34 = vrot.slane %v540_v33, 2 }
 0x26a   : > { %v542_v35 = vmax.f32 %v540_v33, %v541_v34 }
 0x26c   : > { %v543_v36 = vrot.slane %v542_v35, 1 }
 0x26e   : > { %v544_v37 = vmax.f32 %v542_v35, %v543_v36 }
 0x270   : > { %v545_v38 = vsub.f32 %v533_v26, %v544_v37  ;;  %v546_v39 = vsub.f32 %v534_v28, %v544_v37 }
 0x272   : > { %v547_v40 = vmul.f32 1.442695, %v545_v38  ;;  %v549_v41 = vmul.f32 1.442695, %v546_v39 }
 0x274   : > { %969 = vpow2.f32 %v547_v40 }
 0x275   : > { %971 = vpow2.f32 %v549_v41 }
 0x27e   : > { %v970_v42 = vpop.eup %969 }
 0x27f   : > { %v972_v43 = vpop.eup %971  ;;  %v551_v44 = vsel %vm535_vm4, %v970_v42, 0.0 }
 0x280   : > { %v552_v45 = vsel %vm535_vm4, %v972_v43, 0.0 }
 0x281   : > { %v553_v46 = vadd.f32 %v552_v45, %v551_v44 }
 0x283   : > { %v554_v47 = vrot.slane %v553_v46, 4 }
 0x285   : > { %v555_v48 = vadd.f32 %v554_v47, %v553_v46 }
 0x287   : > { %v556_v49 = vrot.slane %v555_v48, 2 }
 0x289   : > { %v557_v50 = vadd.f32 %v556_v49, %v555_v48 }
 0x28b   : > { %v558_v51 = vrot.slane %v557_v50, 1 }
 0x28d   : > { %v559_v52 = vadd.f32 %v558_v51, %v557_v50 }
 0x28f   : > { %973 = vrcp.f32 %v559_v52 }
 0x299   : > { %v974_v53 = vpop.eup %973 }
 0x29a   : > { %v561_v54 = vmul.f32 %v974_v53, %v970_v42  ;;  %v562_v55 = vmul.f32 %v974_v53, %v972_v43 }
 0x29c   : > { %565 = vperm.xlu1 %963, %v561_v54  }
 0x2a0   : > { %570 = vperm.xlu1 %963, %v562_v55  }
 0x31b   : > { %v566_v58 = vpop.permute.xlu1 %565 }
 0x31c   : > { %v573_v59 = vmul.f32 %v566_v58, %v1641_v10 }
 0x31e   : > { %v575_v62 = vsel %vm460_vm1, %v573_v59, 0.0 }
 0x31f   : > { %v571_v60 = vpop.permute.xlu1 %570 }
 0x320   : > { %v574_v61 = vmul.f32 %v571_v60, %v1643_v13 }
 0x322   : > { %v576_v63 = vsel %vm460_vm1, %v574_v61, 0.0 }
 0x323   : > { %v577_v0 = vadd.f32 %v576_v63, %v575_v62 }
 0x325   : > { %v578_v2 = vrot.slane %v577_v0, 4 }
 0x327   : > { %v579_v3 = vadd.f32 %v578_v2, %v577_v0 }
 0x329   : > { %v580_v4 = vrot.slane %v579_v3, 2 }
 0x32b   : > { %v581_v5 = vadd.f32 %v580_v4, %v579_v3 }
 0x32d   : > { %v582_v6 = vrot.slane %v581_v5, 1 }
 0x32f   : > { %v583_v1 = vadd.f32 %v582_v6, %v581_v5 }
 0x331   : > { %v584_v7 = vmax.f32 %v583_v1, 0.0 }
 0x333   : > { %v585_v8 = vpack.c.bf16 %v584_v7, %v584_v7 }
 0x335   : > { %851 = vmatmul.mubr.msk.bf16.vlgmr.msra.gmra.mrb[0].mxu1 %vm460_vm1, %v585_v8 }
 0x408   : > { %v640_v10 = vpop.f32.mrb[0].mxu1 }
 0x409   : > { %v641_v11 = vadd.f32 %v640_v10, %v590_v9  ;;  %v852_v12 = vpop.f32.mrb[1].mxu1 }
 0x40a   : > { %v643_v13 = vpop.f32.mrb[2].mxu1 }
 0x40b   : > { %646 = vst [vmem:[%s430_s18] sm:$0x1] %v641_v11  ;;  %v853_v14 = vpop.f32.mrb[3].mxu1 }
 0x40c   : > { %1188 = shalt.err (!%p1185_p8)
}
 0x40d   : > { %s1189_s23 = scalar_lea.hbm %s1666_s17, 16  ;;  %s1193_s11 = scalar_lea.hbm %s1718_s8, 32 }
 0x40e   : > { %p1190_p11 = scmp.ne.s32.totalorder %s1666_s17, %s1189_s23  ;;  %p1194_p13 = scmp.lt.u32.totalorder %s1666_s17, %s1718_s8 }
 0x40f   : > { %p1195_p1 = scmp.lt.u32.totalorder %s1193_s11, %s1189_s23  ;;  %p1197_p7 = scmp.lt.u32.totalorder %s1189_s23, %s1666_s17 }
 0x410   : > { %p1191_p0 = pnand %p1190_p11, %p1747_p2 }
 0x411   : > { %p1196_p3 = por %p1195_p1, %p1194_p13 }
 0x412   : > { %p1192_p12 = pneg %p1191_p0 }
 0x413   : > { %p1198_p6 = por %p1197_p7, %p1196_p3 }
 0x415   : > { %p1199_p10 = pnand %p1198_p6, %p1192_p12 }
 0x417   : > { %1202 = shalt.err (!%p1199_p10)
}
 0x418   : > { %878 = dma.vmem_to_hbm [thread:$0]  (%p1747_p2), %s1668_s28, 16, %s1666_s17, %s648_s19  }
 0x419 PF: > { %s672_s3 = sand.u32 1, %s1245_s29   ;;  %p1748_p5 = scmp.ne.s32.totalorder %s1736_s21, 0 }
 0x41a   : > { %p1749_p9 = scmp.ge.s32.totalorder %s1257_s10, 2  ;;  %s673_s13 = scalar_lea.sflag [#allocation5], %s672_s3 }
 0x41c   : > { %p904_p4 = pnand %p1749_p9, %p1748_p5 }
 0x41e   : > { %1240 = dma.done.wait (!%p904_p4), %s673_s13, 16  }
 0x41f   : > { %1242 = vsyncadd (!%p904_p4), %s673_s13, 4294967280  ;;  %p28_p8 = scmp.ge.s32.totalorder %s1487_s16, 4   ;;  %s1750_s29 = smov %s1249_s30 }
 0x420   : > { %s1751_s30 = smov %s1253_s9  ;;  %s1752_s9 = smov %s1499_s27 }
 0x421   : > { %s1753_s10 = smov %s1487_s16  ;;  %30 = sbr.rel (!%p28_p8) target bundleno = 14 (0xe), region = 130 }
 0x428   :  { %677 = vsyncpa [#allocation4], 1 }
 0x429   :  { %679 = vsyncpa [#allocation4 + $0x1], 1 }
 0x42a   :  { %680 = vsyncpa [#allocation7], 1 }
 0x42b   :  { %682 = vsyncpa [#allocation7 + $0x1], 1 }
 0x42c   :  { %683 = vsyncpa [#allocation10], 1 }
 0x42d   :  { %684 = vsyncpa [#allocation13], 1 }
 0x42e   :  { %685 = vsyncpa [#allocation5], 1 }
 0x42f   :  { %687 = vsyncpa [#allocation5 + $0x1], 1 }

// kernel: struct2property_forward.8
= control target key start
LH: loop header
LB: loop body
LE: loop exit
PB: predicated region body
PF: predicated region fallthrough
CT: control target
= control target key end

     0   :  { %s5974_s0 = inlined_call_operand.hbm [shape: f32[32,32], index: 0, kind: input, shape index: {}]   ;;  %s5975_s1 = inlined_call_operand.hbm [shape: bf16[256,64], index: 1, kind: input, shape index: {}]   ;;  %s5976_s2 = inlined_call_operand.hbm [shape: bf16[256,32], index: 2, kind: input, shape index: {}]   ;;  %s5977_s3 = inlined_call_operand.hbm [shape: bf16[32,32], index: 3, kind: input, shape index: {}]   ;;  %s5978_s4 = inlined_call_operand.hbm [shape: bf16[64,32], index: 4, kind: input, shape index: {}]   ;;  %s5979_s5 = inlined_call_operand.hbm [shape: bf16[32,32], index: 5, kind: input, shape index: {}]   ;;  %s5980_s6 = inlined_call_operand.hbm [shape: bf16[64,32], index: 6, kind: input, shape index: {}]   ;;  %s5981_s7 = inlined_call_operand.hbm [shape: bf16[32,32], index: 7, kind: input, shape index: {}]   ;;  %s5982_s8 = inlined_call_operand.hbm [shape: bf16[32,32], index: 8, kind: input, shape index: {}]   ;;  %s5983_s9 = inlined_call_operand.hbm [shape: bf16[32,4], index: 9, kind: input, shape index: {}]   ;;  %s5984_s10 = inlined_call_operand.hbm [shape: bf16[4,32], index: 10, kind: input, shape index: {}]   ;;  %s5985_s11 = inlined_call_operand.hbm [shape: f32[1,32], index: 11, kind: input, shape index: {}]   ;;  %s5986_s12 = inlined_call_operand.hbm [shape: f32[1,32], index: 12, kind: input, shape index: {}]   ;;  %s5987_s13 = inlined_call_operand.hbm [shape: bf16[32,128], index: 13, kind: input, shape index: {}]   ;;  %s5988_s14 = inlined_call_operand.hbm [shape: f32[1,128], index: 14, kind: input, shape index: {}]   ;;  %s5989_s15 = inlined_call_operand.hbm [shape: bf16[128,32], index: 15, kind: input, shape index: {}]   ;;  %s5990_s16 = inlined_call_operand.hbm [shape: f32[1,32], index: 16, kind: input, shape index: {}]   ;;  %s5991_s17 = inlined_call_operand.hbm [shape: f32[1,32], index: 17, kind: input, shape index: {}]   ;;  %s5992_s18 = inlined_call_operand.hbm [shape: f32[1,32], index: 18, kind: input, shape index: {}]   ;;  %s5993_s19 = inlined_call_operand.hbm [shape: f32[32,32], index: 19, kind: output, shape index: {}]  }
   0x1   :  { %6034 = sst [smem:[#allocation50_spill]] %s5974_s0 }
   0x2   :  { %6035 = sst [smem:[#allocation51_spill]] %s5975_s1 }
   0x3   :  { %6036 = sst [smem:[#allocation52_spill]] %s5976_s2 }
   0x4   :  { %6037 = sst [smem:[#allocation53_spill]] %s5977_s3 }
   0x5   :  { %6038 = sst [smem:[#allocation54_spill]] %s5978_s4 }
   0x6   :  { %6039 = sst [smem:[#allocation55_spill]] %s5979_s5 }
   0x7   :  { %6040 = sst [smem:[#allocation56_spill]] %s5980_s6 }
   0x8   :  { %6041 = sst [smem:[#allocation57_spill]] %s5981_s7 }
   0x9   :  { %6042 = sst [smem:[#allocation58_spill]] %s5982_s8 }
   0xa   :  { %6043 = sst [smem:[#allocation59_spill]] %s5983_s9 }
   0xb   :  { %6044 = sst [smem:[#allocation60_spill]] %s5984_s10 }
   0xc   :  { %6045 = sst [smem:[#allocation61_spill]] %s5985_s11 }
   0xd   :  { %6046 = sst [smem:[#allocation62_spill]] %s5986_s12 }
   0xe   :  { %6047 = sst [smem:[#allocation63_spill]] %s5987_s13 }
   0xf   :  { %6048 = sst [smem:[#allocation64_spill]] %s5988_s14 }
  0x10   :  { %6049 = sst [smem:[#allocation65_spill]] %s5989_s15 }
  0x11   :  { %6050 = sst [smem:[#allocation66_spill]] %s5990_s16 }
  0x12   :  { %6051 = sst [smem:[#allocation67_spill]] %s5991_s17 }
  0x13   :  { %6052 = sst [smem:[#allocation68_spill]] %s5992_s18 }
  0x14   :  { %6053 = sst [smem:[#allocation69_spill]] %s5993_s19 }
  0x15   :  { %24 = vsyncpa [#allocation3], 0 }
  0x16   :  { %26 = vsyncpa [#allocation3 + $0x1], 0 }
  0x17   :  { %27 = vsyncpa [#allocation6], 0 }
  0x18   :  { %29 = vsyncpa [#allocation6 + $0x1], 0 }
  0x19   :  { %30 = vsyncpa [#allocation9], 0 }
  0x1a   :  { %31 = vsyncpa [#allocation12], 0 }
  0x1b   :  { %32 = vsyncpa [#allocation15], 0 }
  0x1c   :  { %33 = vsyncpa [#allocation18], 0 }
  0x1d   :  { %34 = vsyncpa [#allocation21], 0 }
  0x1e   :  { %35 = vsyncpa [#allocation24], 0 }
  0x1f   :  { %36 = vsyncpa [#allocation27], 0 }
  0x20   :  { %37 = vsyncpa [#allocation30], 0 }
  0x21   :  { %38 = vsyncpa [#allocation4], 0 }
  0x22   :  { %40 = vsyncpa [#allocation4 + $0x1], 0  ;;  %s4942_s0 = smov 0   ;;  %s4944_s30 = smov 0  }
  0x23   :  { %s4946_s20 = smov 0   ;;  %s4948_s21 = smov 0  }
  0x24 LB: > { %6054 = sst [smem:[#allocation44_spill]] %s4799_s0  ;;  %s4813_s1 = smov [#allocation8]   ;;  %s4811_s21 = sphi %s4948_s21, %s6121_s21   ;;  %s4807_s20 = sphi %s4946_s20, %s6123_s20   ;;  %s4803_s30 = sphi %s4944_s30, %s6125_s30   ;;  %s4799_s0 = sphi %s4942_s0, %s6124_s0  }
  0x25   : > { %6055 = sst [smem:[#allocation45_spill]] %s4807_s20  ;;  %s503_s22 = sshll.u32 %s4813_s1, 4  ;;  %s4968_s22 = int_to_ptr.vmem [resolvable:$true] %s503_s22 }
  0x26   : > { %s4963_s2 = sadd.s32 4294967295, %s4811_s21   ;;  %p3349_p0 = scmp.ge.s32.totalorder %s4811_s21, 1 }
  0x27   : > { %p6007_p1 = scmp.eq.s32.totalorder %s4963_s2, 0  ;;  %p491_p2 = scmp.lt.s32.totalorder %s4811_s21, 3 }
  0x28   : > { %s4814_s24 = smov [#allocation11]   ;;  %s4815_s26 = smov [#allocation14]  }
  0x29   : > { %p4970_p3 = pnand %p3349_p0, %p491_p2  ;;  %s529_s25 = sshll.u32 %s4814_s24, 4  ;;  %s4983_s25 = int_to_ptr.vmem [resolvable:$true] %s529_s25 }
  0x2a   : > { %s555_s27 = sshll.u32 %s4815_s26, 4  ;;  %s6059_s1 = sld [smem:[#allocation53_spill]]  ;;  %s4985_s27 = int_to_ptr.vmem [resolvable:$true] %s555_s27 }
  0x2b   : > { %s6056_s23 = scalar_select %p4970_p3, 1, 0 }
  0x2c   : > { %p3899_p5 = pneg %p4970_p3 }
  0x2d   : > { %6057 = sst [smem:[#allocation46_spill]] %s6056_s23 }
  0x2e   : > { %p4979_p6 = pnand %p3899_p5, %p6007_p1 }
  0x30   : > { %s6058_s3 = scalar_select %p4979_p6, 1, 0 }
  0x31   : > { %s4171_s19 = scalar_lea.hbm %s6059_s1, 256  ;;  %p4995_p8 = pneg %p4979_p6 }
  0x32   : > { %p4172_p7 = scmp.ne.s32.totalorder %s6059_s1, %s4171_s19  ;;  %p4178_p11 = scmp.lt.u32.totalorder %s4171_s19, %s6059_s1 }
  0x33   : > { %s6060_s24 = scalar_select %p4995_p8, 1, 0 }
  0x34   : > { %p4174_p9 = pnand %p4995_p8, %p4172_p7 }
  0x36   : > { %p4175_p10 = pneg %p4174_p9 }
  0x38   : > { %p4180_p12 = pnand %p4178_p11, %p4175_p10 }
  0x3a   : > { %4183 = shalt.err (!%p4180_p12)
}
  0x3b   : > { %s4184_s18 = scalar_lea.vmem %s4968_s22, 256  ;;  %p4192_p5 = scmp.lt.s32.totalorder %s4968_s22, %s4968_s22 }
  0x3c   : > { %p4185_p13 = scmp.ne.s32.totalorder %s4968_s22, %s4184_s18  ;;  %p4193_p4 = scmp.lt.s32.totalorder %s4184_s18, %s4184_s18 }
  0x3e   : > { %p4187_p0 = pnand %p4185_p13, %p4995_p8  ;;  %p4194_p7 = por %p4193_p4, %p4192_p5 }
  0x40   : > { %p4188_p2 = pneg %p4187_p0 }
  0x42   : > { %p4195_p9 = pnand %p4194_p7, %p4188_p2 }
  0x44   : > { %4198 = shalt.err (!%p4195_p9)
}
  0x45   : > { %s6009_s23 = smov 64   ;;  %s6011_s16 = smov 4  }
  0x46   : > { %3902 = dma.hbm_to_vmem [thread:$0]  (!%p4979_p6), %s6059_s1, 256, %s4968_s22, [#allocation9], %s6009_s23, %s6009_s23, %s6011_s16  }
  0x47   : > { %s6061_s5 = sld [smem:[#allocation55_spill]] }
  0x4d   : > { %s4199_s18 = scalar_lea.hbm %s6061_s5, 256 }
  0x4e   : > { %p4200_p4 = scmp.ne.s32.totalorder %s6061_s5, %s4199_s18  ;;  %p4206_p12 = scmp.lt.u32.totalorder %s4199_s18, %s6061_s5 }
  0x50   : > { %p4202_p10 = pnand %p4200_p4, %p4995_p8 }
  0x52   : > { %p4203_p11 = pneg %p4202_p10 }
  0x54   : > { %p4208_p13 = pnand %p4206_p12, %p4203_p11 }
  0x56   : > { %4211 = shalt.err (!%p4208_p13)
}
  0x57   : > { %s4212_s22 = scalar_lea.vmem %s4983_s25, 256  ;;  %p4220_p7 = scmp.lt.s32.totalorder %s4983_s25, %s4983_s25 }
  0x58   : > { %p4213_p0 = scmp.ne.s32.totalorder %s4983_s25, %s4212_s22  ;;  %p4221_p9 = scmp.lt.s32.totalorder %s4212_s22, %s4212_s22 }
  0x5a   : > { %p4215_p2 = pnand %p4213_p0, %p4995_p8  ;;  %p4222_p4 = por %p4221_p9, %p4220_p7 }
  0x5c   : > { %p4216_p5 = pneg %p4215_p2 }
  0x5e   : > { %p4223_p10 = pnand %p4222_p4, %p4216_p5 }
  0x60   : > { %4226 = shalt.err (!%p4223_p10)
}
  0x61   : > { %3908 = dma.hbm_to_vmem [thread:$0]  (!%p4979_p6), %s6061_s5, 256, %s4983_s25, [#allocation12], %s6009_s23, %s6009_s23, %s6011_s16  }
  0x62   : > { %s6062_s7 = sld [smem:[#allocation57_spill]] }
  0x68   : > { %s4227_s19 = scalar_lea.hbm %s6062_s7, 256 }
  0x69   : > { %p4228_p11 = scmp.ne.s32.totalorder %s6062_s7, %s4227_s19  ;;  %p4234_p0 = scmp.lt.u32.totalorder %s4227_s19, %s6062_s7 }
  0x6b   : > { %p4230_p12 = pnand %p4228_p11, %p4995_p8 }
  0x6d   : > { %p4231_p13 = pneg %p4230_p12 }
  0x6f   : > { %p4236_p2 = pnand %p4234_p0, %p4231_p13 }
  0x71   : > { %4239 = shalt.err (!%p4236_p2)
}
  0x72   : > { %s4240_s25 = scalar_lea.vmem %s4985_s27, 256  ;;  %p4248_p4 = scmp.lt.s32.totalorder %s4985_s27, %s4985_s27 }
  0x73   : > { %p4241_p5 = scmp.ne.s32.totalorder %s4985_s27, %s4240_s25  ;;  %p4249_p10 = scmp.lt.s32.totalorder %s4240_s25, %s4240_s25 }
  0x75   : > { %p4243_p7 = pnand %p4241_p5, %p4995_p8  ;;  %p4250_p11 = por %p4249_p10, %p4248_p4 }
  0x77   : > { %p4244_p9 = pneg %p4243_p7 }
  0x79   : > { %p4251_p12 = pnand %p4250_p11, %p4244_p9 }
  0x7b   : > { %4254 = shalt.err (!%p4251_p12)
}
  0x7c   : > { %3914 = dma.hbm_to_vmem [thread:$0]  (!%p4979_p6), %s6062_s7, 256, %s4985_s27, [#allocation15], %s6009_s23, %s6009_s23, %s6011_s16  }
  0x7d   : > { %s4818_s10 = smov [#allocation17]   ;;  %s4819_s14 = smov [#allocation20]  }
  0x7e   : > { %s581_s12 = sshll.u32 %s4818_s10, 4  ;;  %s606_s19 = sshll.u32 %s4819_s14, 4  ;;  %s582_s12 = int_to_ptr.vmem [resolvable:$true] %s581_s12  ;;  %s607_s19 = int_to_ptr.vmem [resolvable:$true] %s606_s19 }
  0x7f   : > { %s6063_s9 = sld [smem:[#allocation59_spill]] }
  0x85   : > { %s4255_s26 = scalar_lea.hbm %s6063_s9, 256 }
  0x86   : > { %p4256_p13 = scmp.ne.s32.totalorder %s6063_s9, %s4255_s26  ;;  %p4262_p5 = scmp.lt.u32.totalorder %s4255_s26, %s6063_s9 }
  0x88   : > { %p4258_p0 = pnand %p4256_p13, %p4995_p8 }
  0x8a   : > { %p4259_p2 = pneg %p4258_p0 }
  0x8c   : > { %p4264_p7 = pnand %p4262_p5, %p4259_p2 }
  0x8e   : > { %4267 = shalt.err (!%p4264_p7)
}
  0x8f   : > { %s4268_s27 = scalar_lea.vmem %s582_s12, 256  ;;  %p4276_p11 = scmp.lt.s32.totalorder %s582_s12, %s582_s12 }
  0x90   : > { %p4269_p9 = scmp.ne.s32.totalorder %s582_s12, %s4268_s27  ;;  %p4277_p12 = scmp.lt.s32.totalorder %s4268_s27, %s4268_s27 }
  0x92   : > { %p4271_p4 = pnand %p4269_p9, %p4995_p8  ;;  %p4278_p1 = por %p4277_p12, %p4276_p11 }
  0x94   : > { %p4272_p10 = pneg %p4271_p4 }
  0x96   : > { %p4279_p3 = pnand %p4278_p1, %p4272_p10 }
  0x98   : > { %4282 = shalt.err (!%p4279_p3)
}
  0x99   : > { %3920 = dma.hbm_to_vmem [thread:$0]  (!%p4979_p6), %s6063_s9, 256, %s582_s12, [#allocation18], %s6009_s23, %s6009_s23, %s6011_s16  }
  0x9a   : > { %s6064_s11 = sld [smem:[#allocation61_spill]] }
  0xa0   : > { %s4283_s28 = scalar_lea.hbm %s6064_s11, 16 }
  0xa1   : > { %p4284_p1 = scmp.ne.s32.totalorder %s6064_s11, %s4283_s28  ;;  %p4290_p0 = scmp.lt.u32.totalorder %s4283_s28, %s6064_s11 }
  0xa3   : > { %p4286_p3 = pnand %p4284_p1, %p4995_p8 }
  0xa5   : > { %p4287_p13 = pneg %p4286_p3 }
  0xa7   : > { %p4292_p2 = pnand %p4290_p0, %p4287_p13 }
  0xa9   : > { %4295 = shalt.err (!%p4292_p2)
}
  0xaa   : > { %s4296_s22 = scalar_lea.vmem %s607_s19, 16  ;;  %s4303_s12 = scalar_lea.vmem %s607_s19, 32 }
  0xab   : > { %p4297_p5 = scmp.ne.s32.totalorder %s607_s19, %s4296_s22  ;;  %p4304_p4 = scmp.lt.s32.totalorder %s607_s19, %s607_s19 }
  0xac   : > { %p4305_p10 = scmp.lt.s32.totalorder %s4303_s12, %s4296_s22 }
  0xad   : > { %p4299_p7 = pnand %p4297_p5, %p4995_p8 }
  0xae   : > { %p4306_p11 = por %p4305_p10, %p4304_p4 }
  0xaf   : > { %p4300_p9 = pneg %p4299_p7 }
  0xb1   : > { %p4307_p12 = pnand %p4306_p11, %p4300_p9 }
  0xb3   : > { %4310 = shalt.err (!%p4307_p12)
}
  0xb4   : > { %3926 = dma.hbm_to_vmem [thread:$0]  (!%p4979_p6), %s6064_s11, 16, %s607_s19, [#allocation21]  }
  0xb5   : > { %s4820_s8 = smov [#allocation23]   ;;  %s4821_s14 = smov [#allocation26]  }
  0xb6   : > { %s627_s10 = sshll.u32 %s4820_s8, 4  ;;  %s651_s28 = sshll.u32 %s4821_s14, 4  ;;  %s628_s10 = int_to_ptr.vmem [resolvable:$true] %s627_s10  ;;  %s652_s28 = int_to_ptr.vmem [resolvable:$true] %s651_s28 }
  0xb7   : > { %s6065_s13 = sld [smem:[#allocation63_spill]] }
  0xbd   : > { %s4311_s18 = scalar_lea.hbm %s6065_s13, 256 }
  0xbe   : > { %p4312_p1 = scmp.ne.s32.totalorder %s6065_s13, %s4311_s18  ;;  %p4318_p0 = scmp.lt.u32.totalorder %s4311_s18, %s6065_s13 }
  0xc0   : > { %p4314_p3 = pnand %p4312_p1, %p4995_p8 }
  0xc2   : > { %p4315_p13 = pneg %p4314_p3 }
  0xc4   : > { %p4320_p2 = pnand %p4318_p0, %p4315_p13 }
  0xc6   : > { %4323 = shalt.err (!%p4320_p2)
}
  0xc7   : > { %s4324_s19 = scalar_lea.vmem %s628_s10, 256  ;;  %p4332_p4 = scmp.lt.s32.totalorder %s628_s10, %s628_s10 }
  0xc8   : > { %p4325_p5 = scmp.ne.s32.totalorder %s628_s10, %s4324_s19  ;;  %p4333_p10 = scmp.lt.s32.totalorder %s4324_s19, %s4324_s19 }
  0xca   : > { %p4327_p7 = pnand %p4325_p5, %p4995_p8  ;;  %p4334_p11 = por %p4333_p10, %p4332_p4 }
  0xcc   : > { %p4328_p9 = pneg %p4327_p7 }
  0xce   : > { %p4335_p12 = pnand %p4334_p11, %p4328_p9 }
  0xd0   : > { %4338 = shalt.err (!%p4335_p12)
}
  0xd1   : > { %3932 = dma.hbm_to_vmem [thread:$0]  (!%p4979_p6), %s6065_s13, 256, %s628_s10, [#allocation24], %s6009_s23, %s6009_s23, %s6011_s16  }
  0xd2   : > { %s6066_s15 = sld [smem:[#allocation65_spill]] }
  0xd8   : > { %s4339_s26 = scalar_lea.hbm %s6066_s15, 1024 }
  0xd9   : > { %p4340_p1 = scmp.ne.s32.totalorder %s6066_s15, %s4339_s26  ;;  %p4346_p0 = scmp.lt.u32.totalorder %s4339_s26, %s6066_s15 }
  0xdb   : > { %p4342_p3 = pnand %p4340_p1, %p4995_p8 }
  0xdd   : > { %p4343_p13 = pneg %p4342_p3 }
  0xdf   : > { %p4348_p2 = pnand %p4346_p0, %p4343_p13 }
  0xe1   : > { %4351 = shalt.err (!%p4348_p2)
}
  0xe2   : > { %s4352_s27 = scalar_lea.vmem %s652_s28, 1024  ;;  %p4360_p4 = scmp.lt.s32.totalorder %s652_s28, %s652_s28 }
  0xe3   : > { %p4353_p5 = scmp.ne.s32.totalorder %s652_s28, %s4352_s27  ;;  %p4361_p10 = scmp.lt.s32.totalorder %s4352_s27, %s4352_s27 }
  0xe5   : > { %p4355_p7 = pnand %p4353_p5, %p4995_p8  ;;  %p4362_p11 = por %p4361_p10, %p4360_p4 }
  0xe7   : > { %p4356_p9 = pneg %p4355_p7 }
  0xe9   : > { %p4363_p12 = pnand %p4362_p11, %p4356_p9 }
  0xeb   : > { %4366 = shalt.err (!%p4363_p12)
}
  0xec   : > { %3938 = dma.hbm_to_vmem [thread:$0]  (!%p4979_p6), %s6066_s15, 1024, %s652_s28, [#allocation27], %s6009_s23, %s6009_s23, %s6011_s16  }
  0xed   : > { %s4822_s1 = smov [#allocation29]   ;;  %s6067_s17 = sld [smem:[#allocation67_spill]] }
  0xee   : > { %s676_s8 = sshll.u32 %s4822_s1, 4  ;;  %s677_s8 = int_to_ptr.vmem [resolvable:$true] %s676_s8 }
  0xf3   : > { %s4367_s26 = scalar_lea.hbm %s6067_s17, 16 }
  0xf4   : > { %p4368_p1 = scmp.ne.s32.totalorder %s6067_s17, %s4367_s26  ;;  %p4374_p0 = scmp.lt.u32.totalorder %s4367_s26, %s6067_s17 }
  0xf6   : > { %p4370_p3 = pnand %p4368_p1, %p4995_p8 }
  0xf8   : > { %p4371_p13 = pneg %p4370_p3 }
  0xfa   : > { %p4376_p2 = pnand %p4374_p0, %p4371_p13 }
  0xfc   : > { %4379 = shalt.err (!%p4376_p2)
}
  0xfd   : > { %s4380_s28 = scalar_lea.vmem %s677_s8, 16  ;;  %s4387_s27 = scalar_lea.vmem %s677_s8, 32 }
  0xfe   : > { %p4381_p5 = scmp.ne.s32.totalorder %s677_s8, %s4380_s28  ;;  %p4388_p4 = scmp.lt.s32.totalorder %s677_s8, %s677_s8 }
  0xff   : > { %p4389_p10 = scmp.lt.s32.totalorder %s4387_s27, %s4380_s28 }
 0x100   : > { %p4383_p7 = pnand %p4381_p5, %p4995_p8 }
 0x101   : > { %p4390_p11 = por %p4389_p10, %p4388_p4 }
 0x102   : > { %p4384_p9 = pneg %p4383_p7 }
 0x104   : > { %p4391_p12 = pnand %p4390_p11, %p4384_p9 }
 0x106   : > { %4394 = shalt.err (!%p4391_p12)
}
 0x107   : > { %3944 = dma.hbm_to_vmem [thread:$0]  (!%p4979_p6), %s6067_s17, 16, %s677_s8, [#allocation30]  }
 0x108   : > { %s3348_s1 = sadd.s32 4294967294, %s4811_s21   ;;  %s5172_s14 = sadd.s32 1, %s4811_s21  }
 0x109   : > { %6068 = sst [smem:[#allocation47_spill]] %s5172_s14  ;;  %s50_s29 = ssub.s32 %s4811_s21, %s5172_s14 }
 0x10a   : > { %s53_s26 = sadd.s32 1, %s4807_s20  ;;  %p51_p1 = scmp.eq.s32.totalorder %s50_s29, 0 }
 0x10b   : > { %p60_p3 = scmp.ne.s32.totalorder %s4807_s20, %s4803_s30  ;;  %p61_p13 = scmp.eq.s32.totalorder %s4811_s21, 0 }
 0x10c   : > { %p66_p0 = scmp.ne.s32.totalorder %s4803_s30, %s4799_s0  ;;  %p6070_p5 = scmp.eq.s32.totalorder %s4963_s2, 0 }
 0x10d   : > { %s5183_s18 = scalar_select %p51_p1, %s4807_s20, %s53_s26  }
 0x10e   : > { %p62_p2 = por %p61_p13, %p60_p3  ;;  %p5187_p7 = por %p6070_p5, %p66_p0 }
 0x10f   : > { %6069 = sst [smem:[#allocation48_spill]] %s5183_s18  ;;  %p478_p9 = scmp.eq.s32.totalorder %s4963_s2, 1 }
 0x110   : > { %s6071_s25 = scalar_select %p5187_p7, 1, 0 }
 0x111   : > { %p484_p4 = scmp.eq.s32.totalorder %s3348_s1, 1  ;;  %p3978_p10 = scmp.lt.s32.totalorder %s4811_s21, 2 }
 0x112   : > { %s5194_s8 = sand.u32 1, %s4807_s20   ;;  %p5196_p11 = por %p478_p9, %p60_p3 }
 0x113   : > { %p5200_p12 = por %p484_p4, %p66_p0  ;;  %p5204_p1 = pnand %p3978_p10, %p62_p2 }
 0x114   : > { %s6072_s22 = scalar_select %p5196_p11, 1, 0 }
 0x115   : > { %s6073_s12 = scalar_select %p5200_p12, 1, 0 }
 0x116   : > { %s6075_s28 = scalar_select %p5204_p1, 1, 0 }
 0x117   : > { %6074 = sst [smem:[#allocation49_spill]] %s6073_s12  ;;  %s719_s27 = sand.u32 1, %s4811_s21  }
 0x118   : > { %s6013_s10 = sshll.u32 %s5194_s8, 6  ;;  %s6014_s19 = sshll.u32 %s4811_s21, 10 }
 0x119   : > { %s723_s1 = scalar_lea.vmem [#allocation5], %s6013_s10  ;;  %s6076_s16 = sld [smem:[#allocation51_spill]] }
 0x11a   : > { %s730_s29 = sshll.u32 %s723_s1, 4  ;;  %s5222_s7 = scalar_lea.sflag [#allocation6], %s719_s27  ;;  %s5220_s29 = int_to_ptr.vmem [resolvable:$true] %s730_s29 }
 0x11b   : > { %p5228_p13 = pneg %p5204_p1 }
 0x11d   : > { %s6077_s10 = scalar_select %p5228_p13, 1, 0 }
 0x11f   : > { %s5218_s5 = scalar_lea.hbm %s6076_s16, %s6014_s19  ;;  %s4400_s26 = scalar_lea.hbm %s6076_s16, 2048 }
 0x120   : > { %s4395_s9 = scalar_lea.hbm %s5218_s5, 1024  ;;  %p4401_p5 = scmp.lt.u32.totalorder %s5218_s5, %s6076_s16 }
 0x121   : > { %p4396_p3 = scmp.ne.s32.totalorder %s5218_s5, %s4395_s9  ;;  %p4402_p9 = scmp.lt.u32.totalorder %s4400_s26, %s4395_s9 }
 0x122   : > { %p4404_p10 = scmp.lt.u32.totalorder %s4395_s9, %s5218_s5 }
 0x123   : > { %p4398_p0 = pnand %p5228_p13, %p4396_p3  ;;  %p4403_p4 = por %p4402_p9, %p4401_p5 }
 0x125   : > { %p4399_p2 = pneg %p4398_p0  ;;  %p4405_p12 = por %p4404_p10, %p4403_p4 }
 0x127   : > { %p4406_p11 = pnand %p4405_p12, %p4399_p2 }
 0x129   : > { %4409 = shalt.err (!%p4406_p11)
}
 0x12a   : > { %s4410_s27 = scalar_lea.vmem %s5220_s29, 1024  ;;  %s4823_s23 = smov [#allocation5]  }
 0x12b   : > { %p4411_p3 = scmp.ne.s32.totalorder %s5220_s29, %s4410_s27  ;;  %s4415_s1 = sshll.u32 %s4823_s23, 4  ;;  %s4416_s1 = int_to_ptr.vmem [resolvable:$false] %s4415_s1 }
 0x12c   : > { %s4417_s11 = scalar_lea.vmem %s4416_s1, 2048  ;;  %p4418_p6 = scmp.lt.s32.totalorder %s5220_s29, %s4416_s1 }
 0x12d   : > { %p4413_p0 = pnand %p4411_p3, %p5228_p13  ;;  %p4419_p8 = scmp.lt.s32.totalorder %s4417_s11, %s4410_s27 }
 0x12f   : > { %p4414_p7 = pneg %p4413_p0  ;;  %p4420_p5 = por %p4419_p8, %p4418_p6 }
 0x131   : > { %p4421_p9 = pnand %p4420_p5, %p4414_p7 }
 0x133   : > { %4424 = shalt.err (!%p4421_p9)
}
 0x134   : > { %s6078_s9 = smov 4   ;;  %s6079_s19 = smov 64  }
 0x135   : > { %3954 = dma.hbm_to_vmem [thread:$0]  (!%p5204_p1), %s5218_s5, 1024, %s5220_s29, %s5222_s7, %s6079_s19, %s6079_s19, %s6078_s9  }
 0x136   : > { %s6080_s26 = sshll.u32 %s4811_s21, 10  ;;  %s6081_s1 = sld [smem:[#allocation52_spill]] }
 0x137   : > { %s6082_s11 = sshll.u32 %s5194_s8, 6  ;;  %s4824_s17 = smov [#allocation10]  }
 0x138   : > { %s744_s15 = scalar_lea.vmem [#allocation7], %s6082_s11  ;;  %s516_s18 = sshll.u32 %s4824_s17, 4  ;;  %s517_s18 = int_to_ptr.vmem [resolvable:$true] %s516_s18 }
 0x139   : > { %s751_s16 = sshll.u32 %s744_s15, 4  ;;  %s6083_s4 = sld [smem:[#allocation54_spill]]  ;;  %s5264_s16 = int_to_ptr.vmem [resolvable:$true] %s751_s16 }
 0x13a   : > { %p6084_p8 = scmp.ne.s32.totalorder %s6060_s24, 0 }
 0x13c   : > { %s5260_s27 = scalar_lea.hbm %s6081_s1, %s6080_s26 }
 0x13f   : > { %s4425_s12 = scalar_lea.hbm %s6083_s4, 512 }
 0x140   : > { %p4426_p6 = scmp.ne.s32.totalorder %s6083_s4, %s4425_s12  ;;  %p4432_p12 = scmp.lt.u32.totalorder %s4425_s12, %s6083_s4 }
 0x142   : > { %p4428_p7 = pnand %p4426_p6, %p6084_p8 }
 0x144   : > { %p4429_p11 = pneg %p4428_p7 }
 0x146   : > { %p4434_p2 = pnand %p4432_p12, %p4429_p11 }
 0x148   : > { %4437 = shalt.err (!%p4434_p2)
}
 0x149   : > { %s4438_s15 = scalar_lea.vmem %s517_s18, 512  ;;  %p4446_p0 = scmp.lt.s32.totalorder %s517_s18, %s517_s18 }
 0x14a   : > { %p4439_p4 = scmp.ne.s32.totalorder %s517_s18, %s4438_s15  ;;  %p4447_p5 = scmp.lt.s32.totalorder %s4438_s15, %s4438_s15 }
 0x14c   : > { %p4441_p10 = pnand %p4439_p4, %p6084_p8  ;;  %p4448_p9 = por %p4447_p5, %p4446_p0 }
 0x14e   : > { %p4442_p3 = pneg %p4441_p10 }
 0x150   : > { %p4449_p1 = pnand %p4448_p9, %p4442_p3 }
 0x152   : > { %4452 = shalt.err (!%p4449_p1)
}
 0x153   : > { %p6085_p6 = scmp.ne.s32.totalorder %s6058_s3, 0  ;;  %s4825_s20 = smov [#allocation13]  }
 0x154   : > { %s542_s14 = sshll.u32 %s4825_s20, 4  ;;  %s4826_s12 = smov [#allocation16]   ;;  %s543_s14 = int_to_ptr.vmem [resolvable:$true] %s542_s14 }
 0x155   : > { %3905 = dma.hbm_to_vmem [thread:$0]  (!%p6085_p6), %s6083_s4, 512, %s517_s18, [#allocation9], %s6079_s19, %s6079_s19, %s6078_s9  }
 0x156   : > { %s568_s26 = sshll.u32 %s4826_s12, 4  ;;  %s6086_s6 = sld [smem:[#allocation56_spill]]  ;;  %s569_s26 = int_to_ptr.vmem [resolvable:$true] %s568_s26 }
 0x15c   : > { %s4453_s5 = scalar_lea.hbm %s6086_s6, 512 }
 0x15d   : > { %p4454_p1 = scmp.ne.s32.totalorder %s6086_s6, %s4453_s5  ;;  %p4460_p12 = scmp.lt.u32.totalorder %s4453_s5, %s6086_s6 }
 0x15f   : > { %p4456_p7 = pnand %p4454_p1, %p6084_p8 }
 0x161   : > { %p4457_p11 = pneg %p4456_p7 }
 0x163   : > { %p4462_p2 = pnand %p4460_p12, %p4457_p11 }
 0x165   : > { %4465 = shalt.err (!%p4462_p2)
}
 0x166   : > { %s4466_s18 = scalar_lea.vmem %s543_s14, 512  ;;  %p4474_p0 = scmp.lt.s32.totalorder %s543_s14, %s543_s14 }
 0x167   : > { %p4467_p4 = scmp.ne.s32.totalorder %s543_s14, %s4466_s18  ;;  %p4475_p5 = scmp.lt.s32.totalorder %s4466_s18, %s4466_s18 }
 0x169   : > { %p4469_p10 = pnand %p4467_p4, %p6084_p8  ;;  %p4476_p9 = por %p4475_p5, %p4474_p0 }
 0x16b   : > { %p4470_p3 = pneg %p4469_p10 }
 0x16d   : > { %p4477_p13 = pnand %p4476_p9, %p4470_p3 }
 0x16f   : > { %4480 = shalt.err (!%p4477_p13)
}
 0x170   : > { %3911 = dma.hbm_to_vmem [thread:$0]  (!%p6085_p6), %s6086_s6, 512, %s543_s14, [#allocation12], %s6079_s19, %s6079_s19, %s6078_s9  }
 0x171   : > { %s6087_s11 = sld [smem:[#allocation58_spill]] }
 0x177   : > { %s4481_s5 = scalar_lea.hbm %s6087_s11, 256 }
 0x178   : > { %p4482_p1 = scmp.ne.s32.totalorder %s6087_s11, %s4481_s5  ;;  %p4488_p11 = scmp.lt.u32.totalorder %s4481_s5, %s6087_s11 }
 0x17a   : > { %p4484_p13 = pnand %p4482_p1, %p6084_p8 }
 0x17c   : > { %p4485_p7 = pneg %p4484_p13 }
 0x17e   : > { %p4490_p12 = pnand %p4488_p11, %p4485_p7 }
 0x180   : > { %4493 = shalt.err (!%p4490_p12)
}
 0x181   : > { %s4494_s18 = scalar_lea.vmem %s569_s26, 256  ;;  %p4502_p3 = scmp.lt.s32.totalorder %s569_s26, %s569_s26 }
 0x182   : > { %p4495_p2 = scmp.ne.s32.totalorder %s569_s26, %s4494_s18  ;;  %p4503_p0 = scmp.lt.s32.totalorder %s4494_s18, %s4494_s18 }
 0x184   : > { %p4497_p4 = pnand %p4495_p2, %p6084_p8  ;;  %p4504_p5 = por %p4503_p0, %p4502_p3 }
 0x186   : > { %p4498_p10 = pneg %p4497_p4 }
 0x188   : > { %p4505_p9 = pnand %p4504_p5, %p4498_p10 }
 0x18a   : > { %4508 = shalt.err (!%p4505_p9)
}
 0x18b   : > { %3917 = dma.hbm_to_vmem [thread:$0]  (!%p6085_p6), %s6087_s11, 256, %s569_s26, [#allocation15], %s6079_s19, %s6079_s19, %s6078_s9  }
 0x18c   : > { %s4827_s20 = smov [#allocation19]   ;;  %s4828_s23 = smov [#allocation22]  }
 0x18d   : > { %s595_s12 = sshll.u32 %s4827_s20, 4  ;;  %s617_s5 = sshll.u32 %s4828_s23, 4  ;;  %s596_s12 = int_to_ptr.vmem [resolvable:$true] %s595_s12  ;;  %s618_s5 = int_to_ptr.vmem [resolvable:$true] %s617_s5 }
 0x18e   : > { %s6088_s15 = sld [smem:[#allocation60_spill]] }
 0x194   : > { %s4509_s17 = scalar_lea.hbm %s6088_s15, 32 }
 0x195   : > { %p4510_p1 = scmp.ne.s32.totalorder %s6088_s15, %s4509_s17  ;;  %p4516_p11 = scmp.lt.u32.totalorder %s4509_s17, %s6088_s15 }
 0x197   : > { %p4512_p13 = pnand %p4510_p1, %p6084_p8 }
 0x199   : > { %p4513_p7 = pneg %p4512_p13 }
 0x19b   : > { %p4518_p12 = pnand %p4516_p11, %p4513_p7 }
 0x19d   : > { %4521 = shalt.err (!%p4518_p12)
}
 0x19e   : > { %s4522_s26 = scalar_lea.vmem %s596_s12, 32  ;;  %p4530_p3 = scmp.lt.s32.totalorder %s596_s12, %s596_s12 }
 0x19f   : > { %p4523_p2 = scmp.ne.s32.totalorder %s596_s12, %s4522_s26  ;;  %p4531_p0 = scmp.lt.s32.totalorder %s4522_s26, %s4522_s26 }
 0x1a1   : > { %p4525_p4 = pnand %p4523_p2, %p6084_p8  ;;  %p4532_p5 = por %p4531_p0, %p4530_p3 }
 0x1a3   : > { %p4526_p10 = pneg %p4525_p4 }
 0x1a5   : > { %p4533_p9 = pnand %p4532_p5, %p4526_p10 }
 0x1a7   : > { %4536 = shalt.err (!%p4533_p9)
}
 0x1a8   : > { %3923 = dma.hbm_to_vmem [thread:$0]  (!%p6085_p6), %s6088_s15, 32, %s596_s12, [#allocation18]  }
 0x1a9   : > { %s6089_s23 = sld [smem:[#allocation62_spill]] }
 0x1af   : > { %s4537_s13 = scalar_lea.hbm %s6089_s23, 16 }
 0x1b0   : > { %p4538_p1 = scmp.ne.s32.totalorder %s6089_s23, %s4537_s13  ;;  %p4544_p11 = scmp.lt.u32.totalorder %s4537_s13, %s6089_s23 }
 0x1b2   : > { %p4540_p13 = pnand %p4538_p1, %p6084_p8 }
 0x1b4   : > { %p4541_p7 = pneg %p4540_p13 }
 0x1b6   : > { %p4546_p12 = pnand %p4544_p11, %p4541_p7 }
 0x1b8   : > { %4549 = shalt.err (!%p4546_p12)
}
 0x1b9   : > { %s4550_s26 = scalar_lea.vmem %s618_s5, 16  ;;  %s4557_s12 = scalar_lea.vmem %s618_s5, 32 }
 0x1ba   : > { %p4551_p2 = scmp.ne.s32.totalorder %s618_s5, %s4550_s26  ;;  %p4558_p3 = scmp.lt.s32.totalorder %s618_s5, %s618_s5 }
 0x1bb   : > { %p4559_p0 = scmp.lt.s32.totalorder %s4557_s12, %s4550_s26 }
 0x1bc   : > { %p4553_p4 = pnand %p4551_p2, %p6084_p8 }
 0x1bd   : > { %p4560_p5 = por %p4559_p0, %p4558_p3 }
 0x1be   : > { %p4554_p10 = pneg %p4553_p4 }
 0x1c0   : > { %p4561_p9 = pnand %p4560_p5, %p4554_p10 }
 0x1c2   : > { %4564 = shalt.err (!%p4561_p9)
}
 0x1c3   : > { %3929 = dma.hbm_to_vmem [thread:$0]  (!%p6085_p6), %s6089_s23, 16, %s618_s5, [#allocation21]  }
 0x1c4   : > { %s4829_s6 = smov [#allocation25]   ;;  %s4830_s13 = smov [#allocation28]  }
 0x1c5   : > { %s641_s20 = sshll.u32 %s4829_s6, 4  ;;  %s665_s29 = sshll.u32 %s4830_s13, 4  ;;  %s642_s20 = int_to_ptr.vmem [resolvable:$true] %s641_s20  ;;  %s666_s29 = int_to_ptr.vmem [resolvable:$true] %s665_s29 }
 0x1c6   : > { %s6090_s14 = sld [smem:[#allocation64_spill]] }
 0x1cc   : > { %s4565_s11 = scalar_lea.hbm %s6090_s14, 16 }
 0x1cd   : > { %p4566_p1 = scmp.ne.s32.totalorder %s6090_s14, %s4565_s11  ;;  %p4572_p11 = scmp.lt.u32.totalorder %s4565_s11, %s6090_s14 }
 0x1cf   : > { %p4568_p13 = pnand %p4566_p1, %p6084_p8 }
 0x1d1   : > { %p4569_p7 = pneg %p4568_p13 }
 0x1d3   : > { %p4574_p12 = pnand %p4572_p11, %p4569_p7 }
 0x1d5   : > { %4577 = shalt.err (!%p4574_p12)
}
 0x1d6   : > { %s4578_s5 = scalar_lea.vmem %s642_s20, 16  ;;  %s4585_s0 = scalar_lea.vmem %s642_s20, 32 }
 0x1d7   : > { %p4579_p2 = scmp.ne.s32.totalorder %s642_s20, %s4578_s5  ;;  %p4586_p3 = scmp.lt.s32.totalorder %s642_s20, %s642_s20 }
 0x1d8   : > { %p4587_p0 = scmp.lt.s32.totalorder %s4585_s0, %s4578_s5 }
 0x1d9   : > { %p4581_p4 = pnand %p4579_p2, %p6084_p8 }
 0x1da   : > { %p4588_p5 = por %p4587_p0, %p4586_p3 }
 0x1db   : > { %p4582_p10 = pneg %p4581_p4 }
 0x1dd   : > { %p4589_p9 = pnand %p4588_p5, %p4582_p10 }
 0x1df   : > { %4592 = shalt.err (!%p4589_p9)
}
 0x1e0   : > { %3935 = dma.hbm_to_vmem [thread:$0]  (!%p6085_p6), %s6090_s14, 16, %s642_s20, [#allocation24]  }
 0x1e1   : > { %s6091_s17 = sld [smem:[#allocation66_spill]] }
 0x1e7   : > { %s4593_s18 = scalar_lea.hbm %s6091_s17, 16 }
 0x1e8   : > { %p4594_p1 = scmp.ne.s32.totalorder %s6091_s17, %s4593_s18  ;;  %p4600_p11 = scmp.lt.u32.totalorder %s4593_s18, %s6091_s17 }
 0x1ea   : > { %p4596_p13 = pnand %p4594_p1, %p6084_p8 }
 0x1ec   : > { %p4597_p7 = pneg %p4596_p13 }
 0x1ee   : > { %p4602_p12 = pnand %p4600_p11, %p4597_p7 }
 0x1f0   : > { %4605 = shalt.err (!%p4602_p12)
}
 0x1f1   : > { %s4606_s0 = scalar_lea.vmem %s666_s29, 16  ;;  %s4613_s20 = scalar_lea.vmem %s666_s29, 32 }
 0x1f2   : > { %p4607_p2 = scmp.ne.s32.totalorder %s666_s29, %s4606_s0  ;;  %p4614_p3 = scmp.lt.s32.totalorder %s666_s29, %s666_s29 }
 0x1f3   : > { %p4615_p0 = scmp.lt.s32.totalorder %s4613_s20, %s4606_s0 }
 0x1f4   : > { %p4609_p4 = pnand %p4607_p2, %p6084_p8 }
 0x1f5   : > { %p4616_p5 = por %p4615_p0, %p4614_p3 }
 0x1f6   : > { %p4610_p10 = pneg %p4609_p4 }
 0x1f8   : > { %p4617_p9 = pnand %p4616_p5, %p4610_p10 }
 0x1fa   : > { %4620 = shalt.err (!%p4617_p9)
}
 0x1fb   : > { %3941 = dma.hbm_to_vmem [thread:$0]  (!%p6085_p6), %s6091_s17, 16, %s666_s29, [#allocation27]  }
 0x1fc   : > { %s4831_s11 = smov [#allocation31]   ;;  %s3367_s18 = sshll.u32 %s5194_s8, 4 }
 0x1fd   : > { %s687_s15 = sshll.u32 %s4831_s11, 4  ;;  %s6092_s4 = sld [smem:[#allocation68_spill]]  ;;  %s688_s15 = int_to_ptr.vmem [resolvable:$true] %s687_s15 }
 0x203   : > { %s4621_s5 = scalar_lea.hbm %s6092_s4, 16 }
 0x204   : > { %p4622_p1 = scmp.ne.s32.totalorder %s6092_s4, %s4621_s5  ;;  %p4628_p11 = scmp.lt.u32.totalorder %s4621_s5, %s6092_s4 }
 0x206   : > { %p4624_p13 = pnand %p4622_p1, %p6084_p8 }
 0x208   : > { %p4625_p7 = pneg %p4624_p13 }
 0x20a   : > { %p4630_p12 = pnand %p4628_p11, %p4625_p7 }
 0x20c   : > { %4633 = shalt.err (!%p4630_p12)
}
 0x20d   : > { %s4634_s29 = scalar_lea.vmem %s688_s15, 16  ;;  %s4641_s13 = scalar_lea.vmem %s688_s15, 32 }
 0x20e   : > { %p4635_p2 = scmp.ne.s32.totalorder %s688_s15, %s4634_s29  ;;  %p4642_p3 = scmp.lt.s32.totalorder %s688_s15, %s688_s15 }
 0x20f   : > { %p4643_p0 = scmp.lt.s32.totalorder %s4641_s13, %s4634_s29 }
 0x210   : > { %p4637_p4 = pnand %p4635_p2, %p6084_p8 }
 0x211   : > { %p4644_p5 = por %p4643_p0, %p4642_p3 }
 0x212   : > { %p4638_p10 = pneg %p4637_p4 }
 0x214   : > { %p4645_p9 = pnand %p4644_p5, %p4638_p10 }
 0x216   : > { %4648 = shalt.err (!%p4645_p9)
}
 0x217   : > { %3947 = dma.hbm_to_vmem [thread:$0]  (!%p6085_p6), %s6092_s4, 16, %s688_s15, [#allocation30]  }
 0x218   : > { %s3519_s14 = sshll.u32 %s4811_s21, 8  ;;  %s6093_s5 = sld [smem:[#allocation50_spill]] }
 0x219   : > { %s702_s20 = scalar_lea.vmem [#allocation2], %s3367_s18  ;;  %s699_s3 = scalar_lea.sflag [#allocation3], %s5194_s8 }
 0x21a   : > { %s709_s6 = sshll.u32 %s702_s20, 4  ;;  %p6094_p1 = scmp.ne.s32.totalorder %s6077_s10, 0  ;;  %s5426_s6 = int_to_ptr.vmem [resolvable:$true] %s709_s6 }
 0x21e   : > { %s5424_s0 = scalar_lea.hbm %s6093_s5, %s3519_s14  ;;  %s4654_s11 = scalar_lea.hbm %s6093_s5, 512 }
 0x21f   : > { %s4649_s29 = scalar_lea.hbm %s5424_s0, 256  ;;  %p4655_p7 = scmp.lt.u32.totalorder %s5424_s0, %s6093_s5 }
 0x220   : > { %p4650_p8 = scmp.ne.s32.totalorder %s5424_s0, %s4649_s29  ;;  %p4656_p11 = scmp.lt.u32.totalorder %s4654_s11, %s4649_s29 }
 0x221   : > { %p4658_p2 = scmp.lt.u32.totalorder %s4649_s29, %s5424_s0 }
 0x222   : > { %p4652_p13 = pnand %p4650_p8, %p6094_p1  ;;  %p4657_p12 = por %p4656_p11, %p4655_p7 }
 0x224   : > { %p4653_p6 = pneg %p4652_p13  ;;  %p4659_p4 = por %p4658_p2, %p4657_p12 }
 0x226   : > { %p4660_p10 = pnand %p4659_p4, %p4653_p6 }
 0x228   : > { %4663 = shalt.err (!%p4660_p10)
}
 0x229   : > { %s4664_s18 = scalar_lea.vmem %s5426_s6, 256  ;;  %s4832_s12 = smov [#allocation2]  }
 0x22a   : > { %p4665_p3 = scmp.ne.s32.totalorder %s5426_s6, %s4664_s18  ;;  %s4669_s24 = sshll.u32 %s4832_s12, 4  ;;  %s4670_s24 = int_to_ptr.vmem [resolvable:$false] %s4669_s24 }
 0x22b   : > { %s4671_s20 = scalar_lea.vmem %s4670_s24, 512  ;;  %p4672_p9 = scmp.lt.s32.totalorder %s5426_s6, %s4670_s24 }
 0x22c   : > { %p4667_p0 = pnand %p4665_p3, %p6094_p1  ;;  %p4673_p8 = scmp.lt.s32.totalorder %s4671_s20, %s4664_s18 }
 0x22e   : > { %p4668_p5 = pneg %p4667_p0  ;;  %p4674_p13 = por %p4673_p8, %p4672_p9 }
 0x230   : > { %p4675_p7 = pnand %p4674_p13, %p4668_p5 }
 0x232   : > { %4678 = shalt.err (!%p4675_p7)
}
 0x233   : > { %s4833_s29 = smov 128   ;;  %s4834_s15 = smov 8  }
 0x234   : > { %p6095_p6 = scmp.ne.s32.totalorder %s6075_s28, 0  ;;  %s4679_s13 = scalar_lea.hbm %s5260_s27, 1024 }
 0x235   : > { %p4680_p11 = scmp.ne.s32.totalorder %s5260_s27, %s4679_s13  ;;  %s4684_s14 = scalar_lea.hbm %s6081_s1, 2048 }
 0x236   : > { %3951 = dma.hbm_to_vmem [thread:$0]  (!%p6095_p6), %s5424_s0, 256, %s5426_s6, %s699_s3, %s4833_s29, %s4833_s29, %s4834_s15  }
 0x237   : > { %p4682_p12 = pnand %p4680_p11, %p6094_p1  ;;  %p4685_p4 = scmp.lt.u32.totalorder %s5260_s27, %s6081_s1 }
 0x238   : > { %p4686_p10 = scmp.lt.u32.totalorder %s4684_s14, %s4679_s13  ;;  %p4688_p0 = scmp.lt.u32.totalorder %s4679_s13, %s5260_s27 }
 0x239   : > { %p4683_p2 = pneg %p4682_p12 }
 0x23a   : > { %p4687_p3 = por %p4686_p10, %p4685_p4 }
 0x23c   : > { %p4689_p5 = por %p4688_p0, %p4687_p3 }
 0x23e   : > { %p4690_p9 = pnand %p4689_p5, %p4683_p2 }
 0x240   : > { %4693 = shalt.err (!%p4690_p9)
}
 0x241   : > { %s4694_s8 = scalar_lea.vmem %s5264_s16, 1024  ;;  %s4835_s0 = smov [#allocation7]  }
 0x242   : > { %p4695_p8 = scmp.ne.s32.totalorder %s5264_s16, %s4694_s8  ;;  %s4699_s6 = sshll.u32 %s4835_s0, 4  ;;  %s4700_s6 = int_to_ptr.vmem [resolvable:$false] %s4699_s6 }
 0x243   : > { %s4701_s3 = scalar_lea.vmem %s4700_s6, 2048  ;;  %p4702_p11 = scmp.lt.s32.totalorder %s5264_s16, %s4700_s6 }
 0x244   : > { %p4697_p13 = pnand %p4695_p8, %p6094_p1  ;;  %p4703_p12 = scmp.lt.s32.totalorder %s4701_s3, %s4694_s8 }
 0x246   : > { %p4698_p7 = pneg %p4697_p13  ;;  %p4704_p4 = por %p4703_p12, %p4702_p11 }
 0x248   : > { %p4705_p10 = pnand %p4704_p4, %p4698_p7 }
 0x24a   : > { %4708 = shalt.err (!%p4705_p10)
}
 0x24b   : > { %3957 = dma.hbm_to_vmem [thread:$0]  (!%p6095_p6), %s5260_s27, 1024, %s5264_s16, %s5222_s7, %s6079_s19, %s6079_s19, %s6078_s9  }
 0x24c   : > { %s6096_s10 = sld [smem:[#allocation46_spill]] }
 0x252   : > { %p6097_p1 = scmp.ne.s32.totalorder %s6096_s10, 0 }
 0x253   : > { %s5480_s24 = sand.u32 (!%p6097_p1), 1, %s4803_s30   ;;  %p6098_p2 = scmp.ne.s32.totalorder (!%p6097_p1), %s6071_s25, 0 }
 0x254   : > { %763 = sbr.rel (%p6097_p1) target bundleno = 2791 (0xae7), region = 96  ;;  %s3377_s20 = sshll.u32 (!%p6097_p1), %s5480_s24, 4 }
 0x255   : > { %s766_s29 = scalar_lea.sflag (!%p6097_p1), [#allocation3], %s5480_s24  ;;  %s5486_s28 = scalar_lea.vmem (!%p6097_p1), [#allocation2], %s3377_s20 }
 0x25b   : > { %4754 = dma.done.wait (%p6098_p2), %s766_s29, 256  }
 0x25c   : > { %4756 = vsyncadd (%p6098_p2), %s766_s29, 4294967040  ;;  %s774_s7 = sand.u32 1, %s4963_s2   ;;  %s3378_s16 = sshll.u32 %s5480_s24, 6 }
 0x25d   : > { %s775_s9 = scalar_lea.sflag [#allocation6], %s774_s7  ;;  %s5494_s19 = scalar_lea.vmem [#allocation5], %s3378_s16 }
 0x25e   : > { %4758 = dma.done.wait (%p6098_p2), %s775_s9, 2048  }
 0x25f   : > { %4760 = vsyncadd (%p6098_p2), %s775_s9, 4294965248  ;;  %s5500_s27 = scalar_lea.vmem [#allocation7], %s3378_s16  ;;  %p6099_p6 = scmp.eq.s32.totalorder %s4963_s2, 0 }
 0x261   : > { %4762 = dma.done.wait (%p6099_p6), [#allocation9], 768   ;;  %p6100_p3 = pmov %p6099_p6 }
 0x263   : > { %4764 = vsyncadd (%p6100_p3), [#allocation9], 4294966528  ;;  %p6101_p0 = pmov %p6100_p3 }
 0x265   : > { %4766 = dma.done.wait (%p6101_p0), [#allocation12], 768   ;;  %p6102_p5 = pmov %p6101_p0 }
 0x266   : > { %p6103_p9 = pmov %p6101_p0 }
 0x267   : > { %4768 = vsyncadd (%p6102_p5), [#allocation12], 4294966528 }
 0x268   : > { %4770 = dma.done.wait (%p6103_p9), [#allocation15], 512   ;;  %p6104_p8 = pmov %p6101_p0 }
 0x269   : > { %p6105_p13 = pmov %p6101_p0 }
 0x26a   : > { %4772 = vsyncadd (%p6104_p8), [#allocation15], 4294966784 }
 0x26b   : > { %4774 = dma.done.wait (%p6105_p13), [#allocation18], 288   ;;  %p6106_p7 = pmov %p6101_p0 }
 0x26c   : > { %p6107_p11 = pmov %p6101_p0 }
 0x26d   : > { %4776 = vsyncadd (%p6106_p7), [#allocation18], 4294967008 }
 0x26e   : > { %4778 = dma.done.wait (%p6107_p11), [#allocation21], 32   ;;  %p6108_p12 = pmov %p6101_p0 }
 0x26f   : > { %p6109_p4 = pmov %p6101_p0 }
 0x270   : > { %4780 = vsyncadd (%p6108_p12), [#allocation21], 4294967264 }
 0x271   : > { %4782 = dma.done.wait (%p6109_p4), [#allocation24], 272   ;;  %p6110_p10 = pmov %p6101_p0 }
 0x272   : > { %p6111_p1 = pmov %p6101_p0 }
 0x273   : > { %4784 = vsyncadd (%p6110_p10), [#allocation24], 4294967024 }
 0x274   : > { %4786 = dma.done.wait (%p6111_p1), [#allocation27], 1040   ;;  %p6112_p2 = pmov %p6101_p0 }
 0x275   : > { %p6113_p6 = pmov %p6101_p0 }
 0x276   : > { %4788 = vsyncadd (%p6112_p2), [#allocation27], 4294966256 }
 0x277   : > { %4790 = dma.done.wait (%p6113_p6), [#allocation30], 32   ;;  %p6114_p3 = pmov %p6101_p0 }
 0x278   : > { %v4053_v0 = vld [vmem:[#allocation11] sm:$0xff]   ;;  %v4054_v1 = vld [vmem:[#allocation11 + $0x8] sm:$0xff]   ;;  %vm1019_vm0 = vcmask 261120   ;;  %v4055_v2 = vld [vmem:[%s5500_s27] sm:$0xff]   ;;  %vm1205_vm1 = vcmask 523264   ;;  %v4836_v15 = vmov 0.0   ;;  %v1708_v54 = vlaneseq }
 0x279   : > { %4792 = vsyncadd (%p6114_p3), [#allocation30], 4294967264  ;;  %3620 = vmatprep.subr.bf16.mxu0 %v4053_v0  ;;  %3790 = vmatprep.subr.bf16.mxu1 %v4053_v0  ;;  %v4057_v3 = vld [vmem:[#allocation10] sm:$0xff]   ;;  %v4056_v4 = vld [vmem:[%s5500_s27 + $0x8] sm:$0xff]   ;;  %vm4837_vm2 = vmmov 0   ;;  %vm2413_vm3 = vcmask 1041408  }
 0x27a   : > { %3621 = vmatpush3.bf16.msra.mxu0 %v4053_v0  ;;  %3792 = vmatpush3.bf16.msra.mxu1 %v4053_v0  ;;  %v4059_v5 = vld [vmem:[%s5500_s27 + $0x10] sm:$0xff]   ;;  %v4058_v6 = vld [vmem:[#allocation10 + $0x8] sm:$0xff]   ;;  %v4061_v7 = vld [vmem:[#allocation10 + $0x10] sm:$0xff]   ;;  %v4838_v52 = vmov 1966171168   ;;  %v1709_v57 = vshrl.u32 %v1708_v54, 7 }
 0x27b   : > { %3622 = vmatprep.subr.bf16.mxu0 %v4054_v1  ;;  %3624 = vmatprep.mubr.msk.bf16.mxu0 %vm1019_vm0, %v4055_v2  ;;  %v4060_v8 = vld [vmem:[%s5500_s27 + $0x18] sm:$0xff]   ;;  %v4062_v9 = vld [vmem:[%s5500_s27 + $0x20] sm:$0xff]   ;;  %v4064_v10 = vld [vmem:[#allocation10 + $0x18] sm:$0xff]   ;;  %v1706_v53 = vunpack.c.l.s4 %v4838_v52  ;;  %vm2075_vm4 = vcmask 31744   ;;  %vm2710_vm5 = vcmask 1041409   ;;  %vm2712_vm6 = vcmask 1042434  }
 0x27c   : > { %3791 = vmatprep.subr.bf16.mxu1 %v4054_v1  ;;  %v4073_v11 = vld [vmem:[%s5500_s27 + $0x30] sm:$0xff]   ;;  %v4063_v12 = vld [vmem:[%s5500_s27 + $0x28] sm:$0xff]   ;;  %v4075_v13 = vld [vmem:[%s5500_s27 + $0x38] sm:$0xff]   ;;  %vm2714_vm7 = vcmask 1043459   ;;  %vm2716_vm8 = vcmask 1044484   ;;  %vm2718_vm9 = vcmask 1045509  }
 0x27d   : > { %3636 = vmatprep.mubr.msk.bf16.mxu1 %vm1019_vm0, %v4073_v11  ;;  %v4065_v14 = vld [vmem:[%s5494_s19] sm:$0xff]   ;;  %v4078_v17 = vld [vmem:[#allocation14 + $0x8] sm:$0xff]   ;;  %v4068_v21 = vld [vmem:[%s5494_s19 + $0x10] sm:$0xff]   ;;  %v1707_v56 = vunpack.c.0.s8 %v1706_v53  ;;  %vm2720_vm10 = vcmask 1046534   ;;  %vm2722_vm11 = vcmask 1047559   ;;  %s3538_s25 = sshll.u32 %s4963_s2, 8 }
 0x27e   : > { %3623 = vmatpush3.bf16.msra.mxu0 %v4054_v1  ;;  %3793 = vmatpush3.bf16.msra.mxu1 %v4054_v1  ;;  %v4077_v16 = vld [vmem:[#allocation14] sm:$0xff]   ;;  %v4066_v18 = vld [vmem:[%s5494_s19 + $0x8] sm:$0xff]   ;;  %v4069_v24 = vld [vmem:[%s5494_s19 + $0x18] sm:$0xff]   ;;  %s915_s15 = scalar_lea.vmem [#allocation32], %s3377_s20  ;;  %s6115_s14 = sld [smem:[#allocation69_spill]] }
 0x27f   : > { %3640 = vmatprep.subr.bf16.mxu0 %v4057_v3  ;;  %3664 = vmatprep.subr.bf16.mxu1 %v4077_v16  ;;  %v4067_v19 = vld [vmem:[#allocation8] sm:$0xff]   ;;  %v4080_v22 = vld [vmem:[#allocation13 + $0x8] sm:$0xff]   ;;  %v4081_v25 = vld [vmem:[#allocation13 + $0x10] sm:$0xff]   ;;  %s3080_s13 = sshll.u32 %s915_s15, 4  ;;  %s3067_s2 = scalar_lea.sflag [#allocation4], %s5480_s24  ;;  %s5928_s13 = int_to_ptr.vmem [resolvable:$true] %s3080_s13 }
 0x280   : > { %v4079_v20 = vld [vmem:[#allocation13] sm:$0xff]   ;;  %v4072_v23 = vld [vmem:[#allocation8 + $0x8] sm:$0xff]   ;;  %v4082_v27 = vld [vmem:[#allocation13 + $0x18] sm:$0xff]   ;;  %s4709_s12 = scalar_lea.vmem %s5928_s13, 256  ;;  %p6116_p5 = scmp.ne.s32.totalorder %s6072_s22, 0 }
 0x281   : > { %3625 = vmatmul.mubr.msk.bf16.vlgmr.msra.gmra.mrb[0].mxu0 %vm1019_vm0, %v4056_v4  ;;  %3637 = vmatmul.mubr.msk.bf16.vlgmr.msra.gmra.mrb[0].mxu1 %vm1019_vm0, %v4075_v13  ;;  %v4070_v26 = vld [vmem:[%s5494_s19 + $0x20] sm:$0xff]   ;;  %v4071_v28 = vld [vmem:[%s5494_s19 + $0x28] sm:$0xff]   ;;  %v4074_v29 = vld [vmem:[%s5494_s19 + $0x30] sm:$0xff]   ;;  %p4710_p0 = scmp.ne.s32.totalorder %s5928_s13, %s4709_s12  ;;  %s4839_s8 = smov [#allocation32]  }
 0x282   : > { %3641 = vmatpush3.bf16.msra.mxu0 %v4057_v3  ;;  %3628 = vmatprep.mubr.msk.bf16.mxu0 %vm1019_vm0, %v4059_v5  ;;  %v4076_v30 = vld [vmem:[%s5494_s19 + $0x38] sm:$0xff]   ;;  %v921_v31 = vld [vmem:[%s5486_s28] sm:$0xff]  ;;  %v4084_v35 = vld [vmem:[#allocation17 + $0x8] sm:$0xff]   ;;  %s4713_s0 = sshll.u32 %s4839_s8, 4  ;;  %s4714_s0 = int_to_ptr.vmem [resolvable:$false] %s4713_s0 }
 0x283   : > { %3642 = vmatprep.subr.bf16.mxu0 %v4058_v6  ;;  %3668 = vmatprep.mubr.msk.bf16.mxu1 %vm1019_vm0, %v4055_v2  ;;  %v922_v32 = vld [vmem:[%s5486_s28 + $0x8] sm:$0xff]  ;;  %v4083_v34 = vld [vmem:[#allocation17] sm:$0xff]   ;;  %p4711_p9 = pnand %p4710_p0, %p6116_p5  ;;  %s4715_s6 = scalar_lea.vmem %s4714_s0, 512 }
 0x284   : > { %3665 = vmatpush3.bf16.msra.mxu1 %v4077_v16  ;;  %v1585_v33 = vpack.c.bf16 %v922_v32, %v921_v31  ;;  %s5926_s18 = scalar_lea.hbm %s6115_s14, %s3538_s25  ;;  %p4716_p13 = scmp.lt.s32.totalorder %s5928_s13, %s4714_s0 }
 0x285   : > { %3666 = vmatprep.subr.bf16.mxu1 %v4078_v17  ;;  %p4712_p8 = pneg %p4711_p9  ;;  %p4717_p7 = scmp.lt.s32.totalorder %s4715_s6, %s4709_s12 }
 0x286   : > { %3643 = vmatpush3.bf16.msra.mxu0 %v4058_v6 }
 0x287   : > { %3644 = vmatprep.subr.bf16.mxu0 %v4061_v7  ;;  %p4718_p11 = por %p4717_p7, %p4716_p13 }
 0x288   : > { %3667 = vmatpush3.bf16.msra.mxu1 %v4078_v17 }
 0x289   : > { %3629 = vmatmul.mubr.msk.bf16.gmra.mrb[4].mxu0 %vm1019_vm0, %v4060_v8  ;;  %3684 = vmatprep.subr.bf16.mxu1 %v4079_v20  ;;  %p4719_p12 = pnand %p4718_p11, %p4712_p8 }
 0x28a   : > { %3645 = vmatpush3.bf16.msra.mxu0 %v4061_v7  ;;  %3632 = vmatprep.mubr.msk.bf16.mxu0 %vm1019_vm0, %v4062_v9 }
 0x28b   : > { %3646 = vmatprep.subr.bf16.mxu0 %v4064_v10  ;;  %3669 = vmatmul.mubr.msk.bf16.vlgmr.msra.gmra.mrb[4].mxu1 %vm1019_vm0, %v4056_v4 }
 0x28c   : > { %3672 = vmatprep.mubr.msk.bf16.mxu1 %vm1019_vm0, %v4059_v5  ;;  %3685 = vmatpush3.bf16.msra.mxu1 %v4079_v20 }
 0x28d   : > { %3686 = vmatprep.subr.bf16.mxu1 %v4080_v22 }
 0x28e   : > { %3647 = vmatpush3.bf16.msra.mxu0 %v4064_v10 }
 0x28f   : > { %3708 = vmatprep.subr.bf16.mxu0 %v4836_v15 }
 0x290   : > { %3687 = vmatpush3.bf16.msra.mxu1 %v4080_v22 }
 0x291   : > { %3633 = vmatmul.mubr.msk.bf16.gmra.mrb[8].mxu0 %vm1019_vm0, %v4063_v12  ;;  %3688 = vmatprep.subr.bf16.mxu1 %v4081_v25 }
 0x292   : > { %3648 = vmatprep.mubr.msk.bf16.mxu0 %vm1205_vm1, %v4065_v14 }
 0x293   : > { %3673 = vmatmul.mubr.msk.bf16.gmra.mrb[8].mxu1 %vm1019_vm0, %v4060_v8  ;;  %v5590_v8 = vsub.s32 %v1707_v56, %v1709_v57 }
 0x294   : > { %3676 = vmatprep.mubr.msk.bf16.mxu1 %vm1019_vm0, %v4062_v9  ;;  %3689 = vmatpush3.bf16.msra.mxu1 %v4081_v25  ;;  %v5592_v9 = vsub.s32 0, %v1709_v57 }
 0x295   : > { %3690 = vmatprep.subr.bf16.mxu1 %v4082_v27 }
 0x298   : > { %3691 = vmatpush3.bf16.msra.mxu1 %v4082_v27 }
 0x299   : > { %3649 = vmatmul.mubr.msk.bf16.vlgmr.msra.gmra.mrb[0].mxu0 %vm1205_vm1, %v4066_v18  ;;  %3716 = vmatprep.subr.bf16.mxu1 %v4083_v34 }
 0x29a   : > { %3709 = vmatpush3.bf16.msra.mxu0 %v4067_v19  ;;  %3652 = vmatprep.mubr.msk.bf16.mxu0 %vm1205_vm1, %v4068_v21 }
 0x29b   : > { %3710 = vmatprep.subr.bf16.mxu0 %v4836_v15  ;;  %3677 = vmatmul.mubr.msk.bf16.gmra.mrb[12].mxu1 %vm1019_vm0, %v4063_v12 }
 0x29c   : > { %3680 = vmatprep.mubr.msk.bf16.mxu1 %vm1019_vm0, %v4073_v11 }
 0x29e   : > { %3711 = vmatpush3.bf16.msra.mxu0 %v4072_v23 }
 0x2a1   : > { %3653 = vmatmul.mubr.msk.bf16.gmra.mrb[4].mxu0 %vm1205_vm1, %v4069_v24 }
 0x2a2   : > { %3656 = vmatprep.mubr.msk.bf16.mxu0 %vm1205_vm1, %v4070_v26 }
 0x2a3   : > { %3681 = vmatmul.mubr.msk.bf16.gmra.mrb[16].mxu1 %vm1019_vm0, %v4075_v13 }
 0x2a4   : > { %3692 = vmatprep.mubr.msk.bf16.mxu1 %vm1205_vm1, %v4065_v14 }
 0x2a9   : > { %3657 = vmatmul.mubr.msk.bf16.gmra.mrb[8].mxu0 %vm1205_vm1, %v4071_v28 }
 0x2aa   : > { %3660 = vmatprep.mubr.msk.bf16.mxu0 %vm1205_vm1, %v4074_v29 }
 0x2ab   : > { %3693 = vmatmul.mubr.msk.bf16.vlgmr.msra.gmra.mrb[4].mxu1 %vm1205_vm1, %v4066_v18 }
 0x2ac   : > { %3696 = vmatprep.mubr.msk.bf16.mxu1 %vm1205_vm1, %v4068_v21  ;;  %3717 = vmatpush3.bf16.msra.mxu1 %v4083_v34 }
 0x2ad   : > { %3718 = vmatprep.subr.bf16.mxu1 %v4084_v35 }
 0x2b0   : > { %3719 = vmatpush3.bf16.msra.mxu1 %v4084_v35 }
 0x2b1   : > { %3661 = vmatmul.mubr.msk.bf16.gmra.mrb[12].mxu0 %vm1205_vm1, %v4076_v30  ;;  %3770 = vmatprep.subr.bf16.mxu1 %v4836_v15 }
 0x2b2   : > { %3712 = vmatprep.mubr.msk.bf16.mxu0 %vm4837_vm2, %v4836_v15 }
 0x2b3   : > { %3697 = vmatmul.mubr.msk.bf16.gmra.mrb[8].mxu1 %vm1205_vm1, %v4069_v24 }
 0x2b4   : > { %3700 = vmatprep.mubr.msk.bf16.mxu1 %vm1205_vm1, %v4070_v26 }
 0x2b9   : > { %3713 = vmatmul.mubr.msk.bf16.vlgmr.msra.gmra.mrb[16].mxu0 %vm1019_vm0, %v1585_v33 }
 0x2bb   : > { %3701 = vmatmul.mubr.msk.bf16.gmra.mrb[12].mxu1 %vm1205_vm1, %v4071_v28 }
 0x2bc   : > { %3704 = vmatprep.mubr.msk.bf16.mxu1 %vm1205_vm1, %v4074_v29 }
 0x2c3   : > { %3705 = vmatmul.mubr.msk.bf16.gmra.mrb[16].mxu1 %vm1205_vm1, %v4076_v30 }
 0x354   : > { %v3638_v36 = vpop.f32.mrb[0].mxu1 }
 0x355   : > { %v1126_v37 = vpop.f32.mrb[1].mxu1 }
 0x356   : > { %v3639_v38 = vpop.f32.mrb[2].mxu1 }
 0x357   : > { %v1129_v39 = vpop.f32.mrb[3].mxu1 }
 0x36c   : > { %v3650_v40 = vpop.f32.mrb[0].mxu0 }
 0x36d   : > { %v1264_v41 = vpop.f32.mrb[1].mxu0  ;;  %v3524_v58 = vpack.c.bf16 %v3650_v40, %v3650_v40 }
 0x36e   : > { %v3651_v42 = vpop.f32.mrb[2].mxu0  ;;  %v3522_v59 = vpack.c.bf16 %v1264_v41, %v1264_v41 }
 0x36f   : > { %v1267_v43 = vpop.f32.mrb[3].mxu0  ;;  %v3525_v62 = vpack.c.bf16 %v3651_v42, %v3651_v42  ;;  %v1804_v10 = vunpack.c.l.bf16 %v3524_v58 }
 0x370   : > { %v3523_v1 = vpack.c.bf16 %v1267_v43, %v1267_v43  ;;  %v1802_v11 = vunpack.c.l.bf16 %v3522_v59 }
 0x371   : > { %v1805_v19 = vunpack.c.l.bf16 %v3525_v62 }
 0x372   : > { %v1803_v20 = vunpack.c.l.bf16 %v3523_v1 }
 0x374   : > { %v3654_v44 = vpop.f32.mrb[4].mxu0 }
 0x375   : > { %v1280_v45 = vpop.f32.mrb[5].mxu0  ;;  %v3528_v2 = vpack.c.bf16 %v3654_v44, %v3654_v44 }
 0x376   : > { %v3655_v46 = vpop.f32.mrb[6].mxu0  ;;  %v3526_v3 = vpack.c.bf16 %v1280_v45, %v1280_v45 }
 0x377   : > { %v1283_v47 = vpop.f32.mrb[7].mxu0  ;;  %v3529_v6 = vpack.c.bf16 %v3655_v46, %v3655_v46  ;;  %v5594_v21 = vunpack.c.l.bf16 %v3528_v2 }
 0x378   : > { %v3527_v12 = vpack.c.bf16 %v1283_v47, %v1283_v47  ;;  %v5596_v22 = vunpack.c.l.bf16 %v3526_v3 }
 0x379   : > { %v5598_v23 = vunpack.c.l.bf16 %v3529_v6 }
 0x37a   : > { %v5600_v28 = vunpack.c.l.bf16 %v3527_v12 }
 0x37c   : > { %v3658_v48 = vpop.f32.mrb[8].mxu0 }
 0x37d   : > { %v1296_v49 = vpop.f32.mrb[9].mxu0  ;;  %v3532_v13 = vpack.c.bf16 %v3658_v48, %v3658_v48 }
 0x37e   : > { %v3659_v50 = vpop.f32.mrb[10].mxu0  ;;  %v3530_v14 = vpack.c.bf16 %v1296_v49, %v1296_v49 }
 0x37f   : > { %v1299_v51 = vpop.f32.mrb[11].mxu0  ;;  %v3533_v16 = vpack.c.bf16 %v3659_v50, %v3659_v50  ;;  %v5602_v29 = vunpack.c.l.bf16 %v3532_v13 }
 0x380   : > { %v3531_v17 = vpack.c.bf16 %v1299_v51, %v1299_v51  ;;  %v1810_v33 = vunpack.c.l.bf16 %v3530_v14 }
 0x381   : > { %v5605_v34 = vunpack.c.l.bf16 %v3533_v16 }
 0x382   : > { %v5607_v35 = vunpack.c.l.bf16 %v3531_v17 }
 0x384   : > { %v3662_v55 = vpop.f32.mrb[12].mxu0 }
 0x385   : > { %v1321_v60 = vadd.f32 %v3662_v55, %v3638_v36  ;;  %v1312_v61 = vpop.f32.mrb[13].mxu0 }
 0x386   : > { %v1313_v63 = vadd.f32 %v1312_v61, %v1126_v37  ;;  %v3663_v0 = vpop.f32.mrb[14].mxu0 }
 0x387   : > { %v1324_v4 = vadd.f32 %v3663_v0, %v3639_v38  ;;  %v1315_v5 = vpop.f32.mrb[15].mxu0  ;;  %v3536_v18 = vpack.c.bf16 %v1321_v60, %v1321_v60  ;;  %v5611_v38 = vpop.f32.mrb[4].mxu1 }
 0x388   : > { %v1316_v7 = vadd.f32 %v1315_v5, %v1129_v39  ;;  %v3534_v24 = vpack.c.bf16 %v1313_v63, %v1313_v63  ;;  %v5615_v44 = vpop.f32.mrb[5].mxu1 }
 0x389   : > { %v3537_v25 = vpack.c.bf16 %v1324_v4, %v1324_v4  ;;  %v5609_v36 = vunpack.c.l.bf16 %v3536_v18  ;;  %v5620_v49 = vpop.f32.mrb[6].mxu1 }
 0x38a   : > { %v3535_v26 = vpack.c.bf16 %v1316_v7, %v1316_v7  ;;  %v1814_v45 = vunpack.c.l.bf16 %v3534_v24  ;;  %v5624_v54 = vpop.f32.mrb[7].mxu1 }
 0x38b   : > { %v5617_v46 = vunpack.c.l.bf16 %v3537_v25  ;;  %v3698_v16 = vpop.f32.mrb[8].mxu1 }
 0x38c   : > { %v1639_v27 = vpop.f32.mrb[16].mxu0  ;;  %v1815_v47 = vunpack.c.l.bf16 %v3535_v26  ;;  %v1530_v25 = vpop.f32.mrb[9].mxu1 }
 0x38d   : > { %v1704_v30 = vcombine.high %v1639_v27, %v1639_v27  ;;  %v1711_v31 = vrot.slane %v1639_v27, %v5590_v8  ;;  %v3714_v32 = vpop.f32.mrb[17].mxu0 }
 0x38e   : > { %v1642_v37 = vpop.f32.mrb[18].mxu0  ;;  %v3699_v32 = vpop.f32.mrb[10].mxu1 }
 0x38f   : > { %v1718_v39 = vrot.slane %v1704_v30, %v5590_v8  ;;  %v1719_v40 = vcombine.high %v1711_v31, %v1711_v31  ;;  %v1727_v41 = vrot.slane %v1711_v31, %v5590_v8  ;;  %v1753_v42 = vcombine.high %v1642_v37, %v1642_v37  ;;  %v3715_v43 = vpop.f32.mrb[19].mxu0 }
 0x390   : > { %v1760_v48 = vrot.slane %v1642_v37, %v5590_v8 }
 0x391   : > { %v1720_v50 = vcombine.high %v1718_v39, %v1718_v39  ;;  %v1734_v51 = vrot.slane %v1718_v39, %v5590_v8  ;;  %v1741_v52 = vrot.slane %v1719_v40, %v5590_v8  ;;  %v1749_v53 = vcombine.high %v1727_v41, %v1727_v41  ;;  %v1533_v40 = vpop.f32.mrb[11].mxu1 }
 0x392   : > { %v1821_v55 = vrot.slane %v1727_v41, %v5592_v9  ;;  %v1767_v56 = vrot.slane %v1753_v42, %v5590_v8  ;;  %v1768_v57 = vcombine.high %v1760_v48, %v1760_v48  ;;  %v1776_v58 = vrot.slane %v1760_v48, %v5590_v8 }
 0x393   : > { %v1748_v59 = vrot.slane %v1720_v50, %v5590_v8  ;;  %v1750_v60 = vcombine.high %v1734_v51, %v1734_v51  ;;  %v1751_v61 = vcombine.high %v1741_v52, %v1741_v52  ;;  %v1825_v62 = vrot.slane %v1741_v52, %v5592_v9 }
 0x394   : > { %v1829_v63 = vrot.slane %v1749_v53, %v5592_v9  ;;  %v1837_v0 = vrot.slane %v1734_v51, %v5592_v9  ;;  %v1898_v1 = vmul.f32 %v1821_v55, %v1802_v11  ;;  %v1769_v2 = vcombine.high %v1767_v56, %v1767_v56 }
 0x395   : > { %v1752_v3 = vcombine.high %v1748_v59, %v1748_v59  ;;  %v1833_v4 = vrot.slane %v1751_v61, %v5592_v9  ;;  %v1841_v5 = vrot.slane %v1748_v59, %v5592_v9  ;;  %v1845_v6 = vrot.slane %v1750_v60, %v5592_v9 }
 0x396   : > { %v1900_v7 = vmul.f32 %v1829_v63, %v1804_v10  ;;  %v1783_v12 = vrot.slane %v1767_v56, %v5590_v8  ;;  %v1790_v13 = vrot.slane %v1768_v57, %v5590_v8  ;;  %v1797_v14 = vrot.slane %v1769_v2, %v5590_v8 }
 0x397   : > { %v1901_v17 = vmul.f32 %v1833_v4, %v1805_v19  ;;  %v1798_v18 = vcombine.high %v1776_v58, %v1776_v58  ;;  %v1853_v11 = vrot.slane %v1776_v58, %v5592_v9  ;;  %v1899_v24 = vmul.f32 %v1825_v62, %v1803_v20 }
 0x398   : > { %v1799_v26 = vcombine.high %v1783_v12, %v1783_v12  ;;  %v1800_v27 = vcombine.high %v1790_v13, %v1790_v13  ;;  %v1801_v30 = vcombine.high %v1797_v14, %v1797_v14  ;;  %v1857_v31 = vrot.slane %v1790_v13, %v5592_v9 }
 0x399   : > { %v1915_v10 = vpack.c.bf16 %v1901_v17, %v1900_v7  ;;  %v1861_v37 = vrot.slane %v1798_v18, %v5592_v9  ;;  %v1869_v39 = vrot.slane %v1783_v12, %v5592_v9  ;;  %v1873_v8 = vrot.slane %v1797_v14, %v5592_v9 }
 0x39a   : > { %v1865_v19 = vrot.slane %v1800_v27, %v5592_v9  ;;  %v1877_v41 = vrot.slane %v1799_v26, %v5592_v9  ;;  %v1906_v20 = vmul.f32 %v1853_v11, %v1810_v33  ;;  %v1914_v42 = vpack.c.bf16 %v1899_v24, %v1898_v1 }
 0x39b   : > { %v1902_v43 = vmul.f32 %v1837_v0, %v5596_v22  ;;  %v1903_v48 = vmul.f32 %v1841_v5, %v5600_v28  ;;  %v1849_v50 = vrot.slane %v1752_v3, %v5592_v9  ;;  %v1904_v51 = vmul.f32 %v1845_v6, %v5594_v21  ;;  %v2388_v3 = vld [vmem:[#allocation19] sm:$0x3] }
 0x39c   : > { %3720 = vmatprep.mubr.msk.bf16.mxu1 %vm1019_vm0, %v1914_v42  ;;  %v1907_v52 = vmul.f32 %v1857_v31, %v5607_v35  ;;  %v1908_v53 = vmul.f32 %v1861_v37, %v5602_v29  ;;  %v1909_v55 = vmul.f32 %v1865_v19, %v5605_v34  ;;  %v1910_v56 = vmul.f32 %v1869_v39, %v1814_v45  ;;  %v3702_v29 = vpop.f32.mrb[12].mxu1 }
 0x39d   : > { %3721 = vmatmul.mubr.msk.bf16.vlgmr.msra.gmra.mrb[20].mxu1 %vm1019_vm0, %v1915_v10  ;;  %v1916_v33 = vpack.c.bf16 %v1903_v48, %v1902_v43  ;;  %v1905_v22 = vmul.f32 %v1849_v50, %v5598_v23  ;;  %v1911_v57 = vmul.f32 %v1873_v8, %v1815_v47  ;;  %v1881_v28 = vrot.slane %v1801_v30, %v5592_v9  ;;  %v1546_v9 = vpop.f32.mrb[13].mxu1 }
 0x39e   : > { %v1918_v58 = vpack.c.bf16 %v1907_v52, %v1906_v20  ;;  %v1919_v59 = vpack.c.bf16 %v1909_v55, %v1908_v53  ;;  %v1912_v21 = vmul.f32 %v1877_v41, %v5609_v36  ;;  %v5660_v35 = vpack.c.bf16 %v5620_v49, %v5611_v38  ;;  %v3703_v36 = vpop.f32.mrb[14].mxu1  ;;  %3826 = vmatprep.subr.msk.bf16.mxu0 %vm2413_vm3, %v2388_v3 }
 0x39f   : > { %3724 = vmatprep.mubr.msk.bf16.mxu1 %vm1019_vm0, %v1916_v33  ;;  %v1917_v34 = vpack.c.bf16 %v1905_v22, %v1904_v51  ;;  %v1920_v45 = vpack.c.bf16 %v1911_v57, %v1910_v56  ;;  %v1913_v60 = vmul.f32 %v1881_v28, %v5617_v46  ;;  %v5666_v23 = vpack.c.bf16 %v5624_v54, %v5615_v44  ;;  %v1549_v49 = vpop.f32.mrb[15].mxu1 }
 0x3a0   : > { %v5668_v47 = vpack.c.bf16 %v3699_v32, %v3698_v16  ;;  %v5670_v61 = vpack.c.bf16 %v1533_v40, %v1530_v25  ;;  %v5672_v38 = vpack.c.bf16 %v3703_v36, %v3702_v29  ;;  %v5674_v63 = vpack.c.bf16 %v1549_v49, %v1546_v9  ;;  %v3706_v46 = vpop.f32.mrb[16].mxu1 }
 0x3a1   : > { %v1921_v62 = vpack.c.bf16 %v1913_v60, %v1912_v21  ;;  %v1562_v0 = vpop.f32.mrb[17].mxu1  ;;  %v2415_v4 = vsel %vm2413_vm3, %v2388_v3, 0 }
 0x3a2   : > { %v3707_v44 = vpop.f32.mrb[18].mxu1  ;;  %3737 = vmatpush3.bf16.msra.mxu0 %v2415_v4 }
 0x3a3   : > { %v5678_v54 = vpack.c.bf16 %v3707_v44, %v3706_v46  ;;  %v1565_v1 = vpop.f32.mrb[19].mxu1  ;;  %3754 = vmatprep.subr.bf16.mxu0 %v4836_v15 }
 0x3a4   : > { %v5680_v2 = vpack.c.bf16 %v1565_v1, %v1562_v0 }
 0x3a5   : > { %3725 = vmatmul.mubr.msk.bf16.gmra.mrb[24].mxu1 %vm1019_vm0, %v1917_v34 }
 0x3a6   : > { %3728 = vmatprep.mubr.msk.bf16.mxu1 %vm1019_vm0, %v1918_v58 }
 0x3ad   : > { %3729 = vmatmul.mubr.msk.bf16.gmra.mrb[28].mxu1 %vm1019_vm0, %v1919_v59 }
 0x3ae   : > { %3732 = vmatprep.mubr.msk.bf16.mxu1 %vm1019_vm0, %v1920_v45 }
 0x3b5   : > { %3733 = vmatmul.mubr.msk.bf16.gmra.mrb[32].mxu1 %vm1019_vm0, %v1921_v62 }
 0x3b6   : > { %3786 = vmatprep.mubr.msk.bf16.mxu1 %vm4837_vm2, %v4836_v15 }
 0x470   : > { %v3722_v5 = vpop.f32.mrb[20].mxu1 }
 0x471   : > { %v2061_v6 = vmul.f32 0.35355338, %v3722_v5  ;;  %v1996_v7 = vpop.f32.mrb[21].mxu1 }
 0x472   : > { %v2059_v12 = vmul.f32 0.35355338, %v1996_v7  ;;  %v3723_v13 = vpop.f32.mrb[22].mxu1 }
 0x473   : > { %v2090_v14 = vsel %vm2075_vm4, %v2061_v6, -inf  ;;  %v5689_v16 = vmul.f32 0.35355338, %v3723_v13  ;;  %v1999_v17 = vpop.f32.mrb[23].mxu1 }
 0x474   : > { %v2091_v18 = vrot.slane %v2090_v14, 4  ;;  %v2076_v11 = vsel %vm2075_vm4, %v2059_v12, -inf  ;;  %v5692_v24 = vmul.f32 0.35355338, %v1999_v17 }
 0x475   : > { %v2077_v25 = vrot.slane %v2076_v11, 4  ;;  %v2097_v26 = vsel %vm2075_vm4, %v5689_v16, -inf }
 0x476   : > { %v2092_v27 = vmax.f32 %v2090_v14, %v2091_v18  ;;  %v2098_v30 = vrot.slane %v2097_v26, 4  ;;  %v2083_v31 = vsel %vm2075_vm4, %v5692_v24, -inf }
 0x477   : > { %v2078_v32 = vmax.f32 %v2076_v11, %v2077_v25  ;;  %v2084_v10 = vrot.slane %v2083_v31, 4 }
 0x478   : > { %v2093_v37 = vrot.slane %v2092_v27, 2  ;;  %v2099_v39 = vmax.f32 %v2097_v26, %v2098_v30  ;;  %v3726_v8 = vpop.f32.mrb[24].mxu1 }
 0x479   : > { %v2079_v40 = vrot.slane %v2078_v32, 2  ;;  %v2085_v19 = vmax.f32 %v2083_v31, %v2084_v10  ;;  %v5698_v41 = vmul.f32 0.35355338, %v3726_v8  ;;  %v2012_v20 = vpop.f32.mrb[25].mxu1 }
 0x47a   : > { %v2094_v42 = vmax.f32 %v2092_v27, %v2093_v37  ;;  %v2100_v43 = vrot.slane %v2099_v39, 2  ;;  %v5700_v48 = vmul.f32 0.35355338, %v2012_v20  ;;  %v3727_v50 = vpop.f32.mrb[26].mxu1 }
 0x47b   : > { %v2080_v51 = vmax.f32 %v2078_v32, %v2079_v40  ;;  %v2086_v52 = vrot.slane %v2085_v19, 2  ;;  %v2118_v53 = vsel %vm2075_vm4, %v5698_v41, -inf  ;;  %v5704_v55 = vmul.f32 0.35355338, %v3727_v50  ;;  %v2015_v56 = vpop.f32.mrb[27].mxu1 }
 0x47c   : > { %v2095_v33 = vrot.slane %v2094_v42, 1  ;;  %v2101_v22 = vmax.f32 %v2099_v39, %v2100_v43  ;;  %v2119_v57 = vrot.slane %v2118_v53, 4  ;;  %v2104_v28 = vsel %vm2075_vm4, %v5700_v48, -inf }
 0x47d   : > { %v2081_v58 = vrot.slane %v2080_v51, 1  ;;  %v2087_v59 = vmax.f32 %v2085_v19, %v2086_v52  ;;  %v2105_v21 = vrot.slane %v2104_v28, 4  ;;  %v2125_v29 = vsel %vm2075_vm4, %v5704_v55, -inf }
 0x47e   : > { %v2096_v34 = vmax.f32 %v2094_v42, %v2095_v33  ;;  %v2102_v45 = vrot.slane %v2101_v22, 1  ;;  %v2120_v60 = vmax.f32 %v2118_v53, %v2119_v57  ;;  %v2126_v9 = vrot.slane %v2125_v29, 4 }
 0x47f   : > { %v2082_v36 = vmax.f32 %v2080_v51, %v2081_v58  ;;  %v2088_v62 = vrot.slane %v2087_v59, 1  ;;  %v2106_v49 = vmax.f32 %v2104_v28, %v2105_v21  ;;  %v5710_v46 = vmul.f32 0.35355338, %v2015_v56 }
 0x480   : > { %v2190_v0 = vsub.f32 %v2061_v6, %v2096_v34  ;;  %v2103_v44 = vmax.f32 %v2101_v22, %v2102_v45  ;;  %v2121_v1 = vrot.slane %v2120_v60, 2  ;;  %v2127_v3 = vmax.f32 %v2125_v29, %v2126_v9  ;;  %v3730_v4 = vpop.f32.mrb[28].mxu1 }
 0x481   : > { %v2188_v5 = vsub.f32 %v2059_v12, %v2082_v36  ;;  %v2089_v7 = vmax.f32 %v2087_v59, %v2088_v62  ;;  %v2107_v13 = vrot.slane %v2106_v49, 2  ;;  %v2111_v14 = vsel %vm2075_vm4, %v5710_v46, -inf  ;;  %v2028_v17 = vpop.f32.mrb[29].mxu1 }
 0x482   : > { %v2208_v18 = vmul.f32 1.442695, %v2190_v0  ;;  %v2191_v11 = vsub.f32 %v5689_v16, %v2103_v44  ;;  %v2122_v25 = vmax.f32 %v2120_v60, %v2121_v1  ;;  %v2128_v26 = vrot.slane %v2127_v3, 2  ;;  %v3731_v27 = vpop.f32.mrb[30].mxu1 }
 0x483   : > { %v2204_v30 = vmul.f32 1.442695, %v2188_v5  ;;  %v2189_v6 = vsub.f32 %v5692_v24, %v2089_v7  ;;  %v2108_v31 = vmax.f32 %v2106_v49, %v2107_v13  ;;  %v2112_v32 = vrot.slane %v2111_v14, 4  ;;  %v2031_v10 = vpop.f32.mrb[31].mxu1 }
 0x484   : > { %4097 = vpow2.f32 %v2208_v18  ;;  %v2210_v12 = vmul.f32 1.442695, %v2191_v11  ;;  %v2123_v37 = vrot.slane %v2122_v25, 1  ;;  %v2129_v39 = vmax.f32 %v2127_v3, %v2128_v26 }
 0x485   : > { %4099 = vpow2.f32 %v2204_v30  ;;  %v2206_v8 = vmul.f32 1.442695, %v2189_v6  ;;  %v2109_v40 = vrot.slane %v2108_v31, 1  ;;  %v2113_v19 = vmax.f32 %v2111_v14, %v2112_v32 }
 0x486   : > { %4101 = vpow2.f32 %v2210_v12  ;;  %v2124_v20 = vmax.f32 %v2122_v25, %v2123_v37  ;;  %v2130_v16 = vrot.slane %v2129_v39, 1  ;;  %v5716_v42 = vmul.f32 0.35355338, %v3730_v4 }
 0x487   : > { %4103 = vpow2.f32 %v2206_v8  ;;  %v2110_v43 = vmax.f32 %v2108_v31, %v2109_v40  ;;  %v2114_v50 = vrot.slane %v2113_v19, 2  ;;  %v5718_v24 = vmul.f32 0.35355338, %v2028_v17 }
 0x488   : > { %v2194_v51 = vsub.f32 %v5698_v41, %v2124_v20  ;;  %v2131_v52 = vmax.f32 %v2129_v39, %v2130_v16  ;;  %v2146_v53 = vsel %vm2075_vm4, %v5716_v42, -inf  ;;  %v5723_v56 = vmul.f32 0.35355338, %v3731_v27  ;;  %v3734_v33 = vpop.f32.mrb[32].mxu1 }
 0x489   : > { %v2192_v22 = vsub.f32 %v5700_v48, %v2110_v43  ;;  %v2115_v57 = vmax.f32 %v2113_v19, %v2114_v50  ;;  %v2147_v28 = vrot.slane %v2146_v53, 4  ;;  %v2132_v58 = vsel %vm2075_vm4, %v5718_v24, -inf  ;;  %v5728_v59 = vpop.f32.mrb[33].mxu1 }
 0x48a   : > { %v2216_v21 = vmul.f32 1.442695, %v2194_v51  ;;  %v2195_v29 = vsub.f32 %v5704_v55, %v2131_v52  ;;  %v2133_v41 = vrot.slane %v2132_v58, 4  ;;  %v2153_v34 = vsel %vm2075_vm4, %v5723_v56, -inf  ;;  %v5733_v45 = vpop.f32.mrb[34].mxu1 }
 0x48b   : > { %v2212_v60 = vmul.f32 1.442695, %v2192_v22  ;;  %v2116_v9 = vrot.slane %v2115_v57, 1  ;;  %v2148_v36 = vmax.f32 %v2146_v53, %v2147_v28  ;;  %v2154_v48 = vrot.slane %v2153_v34, 4  ;;  %v5735_v62 = vpop.f32.mrb[35].mxu1 }
 0x48c   : > { %4105 = vpow2.f32 %v2216_v21  ;;  %v2218_v49 = vmul.f32 1.442695, %v2195_v29  ;;  %v2134_v0 = vmax.f32 %v2132_v58, %v2133_v41  ;;  %v5737_v44 = vmul.f32 0.35355338, %v2031_v10 }
 0x48d   : > { %4107 = vpow2.f32 %v2212_v60  ;;  %v2117_v1 = vmax.f32 %v2115_v57, %v2116_v9  ;;  %v2149_v55 = vrot.slane %v2148_v36, 2  ;;  %v2155_v3 = vmax.f32 %v2153_v34, %v2154_v48 }
 0x48e   : > { %v5739_v4 = vpop.eup %4097  ;;  %4109 = vpow2.f32 %v2218_v49  ;;  %v2135_v5 = vrot.slane %v2134_v0, 2  ;;  %v2139_v7 = vsel %vm2075_vm4, %v5737_v44, -inf  ;;  %v5743_v13 = vmul.f32 0.35355338, %v3734_v33 }
 0x48f   : > { %v5745_v14 = vpop.eup %4099  ;;  %v2250_v17 = vsel %vm2075_vm4, %v5739_v4, 0.0  ;;  %v2193_v18 = vsub.f32 %v5710_v46, %v2117_v1  ;;  %v2150_v11 = vmax.f32 %v2148_v36, %v2149_v55  ;;  %v2156_v25 = vrot.slane %v2155_v3, 2 }
 0x490   : > { %v5750_v26 = vpop.eup %4101  ;;  %v2251_v27 = vrot.slane %v2250_v17, 4  ;;  %v2236_v30 = vsel %vm2075_vm4, %v5745_v14, 0.0  ;;  %v2136_v6 = vmax.f32 %v2134_v0, %v2135_v5  ;;  %v2140_v31 = vrot.slane %v2139_v7, 4 }
 0x491   : > { %v5754_v32 = vpop.eup %4103  ;;  %v2237_v10 = vrot.slane %v2236_v30, 4  ;;  %v2257_v12 = vsel %vm2075_vm4, %v5750_v26, 0.0  ;;  %v2214_v37 = vmul.f32 1.442695, %v2193_v18  ;;  %v2151_v39 = vrot.slane %v2150_v11, 1 }
 0x492   : > { %v2252_v8 = vadd.f32 %v2251_v27, %v2250_v17  ;;  %v2258_v46 = vrot.slane %v2257_v12, 4  ;;  %v2243_v40 = vsel %vm2075_vm4, %v5754_v32, 0.0  ;;  %v2137_v19 = vrot.slane %v2136_v6, 1 }
 0x493   : > { %v2238_v20 = vadd.f32 %v2237_v10, %v2236_v30  ;;  %v2244_v16 = vrot.slane %v2243_v40, 4  ;;  %4111 = vpow2.f32 %v2214_v37  ;;  %v2152_v43 = vmax.f32 %v2150_v11, %v2151_v39 }
 0x494   : > { %v2253_v50 = vrot.slane %v2252_v8, 2  ;;  %v2259_v51 = vadd.f32 %v2258_v46, %v2257_v12  ;;  %v2138_v52 = vmax.f32 %v2136_v6, %v2137_v19  ;;  %v2157_v53 = vmax.f32 %v2155_v3, %v2156_v25 }
 0x495   : > { %v2239_v33 = vrot.slane %v2238_v20, 2  ;;  %v2245_v22 = vadd.f32 %v2244_v16, %v2243_v40  ;;  %v2198_v57 = vsub.f32 %v5716_v42, %v2152_v43  ;;  %v2141_v28 = vmax.f32 %v2139_v7, %v2140_v31 }
 0x496   : > { %v5761_v58 = vpop.eup %4105  ;;  %v2254_v21 = vadd.f32 %v2253_v50, %v2252_v8  ;;  %v2260_v29 = vrot.slane %v2259_v51, 2  ;;  %v2196_v41 = vsub.f32 %v5718_v24, %v2138_v52  ;;  %v2158_v34 = vrot.slane %v2157_v53, 1 }
 0x497   : > { %v5764_v60 = vpop.eup %4107  ;;  %v2240_v9 = vadd.f32 %v2239_v33, %v2238_v20  ;;  %v2246_v36 = vrot.slane %v2245_v22, 2  ;;  %v2278_v48 = vsel %vm2075_vm4, %v5761_v58, 0.0  ;;  %v2224_v49 = vmul.f32 1.442695, %v2198_v57 }
 0x498   : > { %v5768_v0 = vpop.eup %4109  ;;  %v2255_v1 = vrot.slane %v2254_v21, 1  ;;  %v2261_v42 = vadd.f32 %v2260_v29, %v2259_v51  ;;  %v2279_v55 = vrot.slane %v2278_v48, 4  ;;  %v2264_v3 = vsel %vm2075_vm4, %v5764_v60, 0.0 }
 0x499   : > { %v2241_v5 = vrot.slane %v2240_v9, 1  ;;  %v2247_v7 = vadd.f32 %v2246_v36, %v2245_v22  ;;  %v2265_v24 = vrot.slane %v2264_v3, 4  ;;  %v2285_v17 = vsel %vm2075_vm4, %v5768_v0, 0.0 }
 0x49a   : > { %v2256_v18 = vadd.f32 %v2255_v1, %v2254_v21  ;;  %v2262_v11 = vrot.slane %v2261_v42, 1  ;;  %v2280_v25 = vadd.f32 %v2279_v55, %v2278_v48  ;;  %v2286_v27 = vrot.slane %v2285_v17, 4 }
 0x49b   : > { %v2242_v30 = vadd.f32 %v2241_v5, %v2240_v9  ;;  %v2248_v6 = vrot.slane %v2247_v7, 1  ;;  %v2266_v31 = vadd.f32 %v2265_v24, %v2264_v3  ;;  %4113 = vpow2.f32 %v2224_v49 }
 0x49c   : > { %4115 = vrcp.f32 %v2256_v18  ;;  %v2263_v10 = vadd.f32 %v2262_v11, %v2261_v42  ;;  %v2281_v12 = vrot.slane %v2280_v25, 2  ;;  %v2287_v37 = vadd.f32 %v2286_v27, %v2285_v17 }
 0x49d   : > { %v5774_v39 = vpop.eup %4111  ;;  %4117 = vrcp.f32 %v2242_v30  ;;  %v2249_v8 = vadd.f32 %v2248_v6, %v2247_v7  ;;  %v2267_v46 = vrot.slane %v2266_v31, 2  ;;  %v2220_v40 = vmul.f32 1.442695, %v2196_v41 }
 0x49e   : > { %4119 = vrcp.f32 %v2263_v10  ;;  %v2282_v19 = vadd.f32 %v2281_v12, %v2280_v25  ;;  %v2288_v20 = vrot.slane %v2287_v37, 2  ;;  %v2271_v16 = vsel %vm2075_vm4, %v5774_v39, 0.0 }
 0x49f   : > { %4121 = vrcp.f32 %v2249_v8  ;;  %v2268_v43 = vadd.f32 %v2267_v46, %v2266_v31  ;;  %v2272_v50 = vrot.slane %v2271_v16, 4  ;;  %v2159_v51 = vmax.f32 %v2157_v53, %v2158_v34 }
 0x4a0   : > { %v2283_v52 = vrot.slane %v2282_v19, 1  ;;  %v2289_v33 = vadd.f32 %v2288_v20, %v2287_v37  ;;  %4123 = vpow2.f32 %v2220_v40  ;;  %v2142_v22 = vrot.slane %v2141_v28, 2 }
 0x4a1   : > { %v2269_v57 = vrot.slane %v2268_v43, 1  ;;  %v2273_v21 = vadd.f32 %v2272_v50, %v2271_v16  ;;  %v2199_v29 = vsub.f32 %v5723_v56, %v2159_v51  ;;  %v2174_v41 = vsel %vm2075_vm4, %v5743_v13, -inf }
 0x4a2   : > { %v2284_v9 = vadd.f32 %v2283_v52, %v2282_v19  ;;  %v2290_v36 = vrot.slane %v2289_v33, 1  ;;  %v2143_v48 = vmax.f32 %v2141_v28, %v2142_v22  ;;  %v2175_v49 = vrot.slane %v2174_v41, 4 }
 0x4a3   : > { %v2270_v1 = vadd.f32 %v2269_v57, %v2268_v43  ;;  %v2274_v42 = vrot.slane %v2273_v21, 2  ;;  %v2226_v55 = vmul.f32 1.442695, %v2199_v29  ;;  %v5782_v53 = vmul.f32 0.35355338, %v5728_v59 }
 0x4a4   : > { %4125 = vrcp.f32 %v2284_v9  ;;  %v2291_v34 = vadd.f32 %v2290_v36, %v2289_v33  ;;  %v2144_v3 = vrot.slane %v2143_v48, 1  ;;  %v2176_v5 = vmax.f32 %v2174_v41, %v2175_v49 }
 0x4a5   : > { %v5784_v7 = vpop.eup %4113  ;;  %4127 = vrcp.f32 %v2270_v1  ;;  %v2275_v56 = vadd.f32 %v2274_v42, %v2273_v21  ;;  %v2160_v24 = vsel %vm2075_vm4, %v5782_v53, -inf  ;;  %v5789_v28 = vmul.f32 0.35355338, %v5733_v45 }
 0x4a6   : > { %v4116_v17 = vpop.eup %4115  ;;  %4129 = vrcp.f32 %v2291_v34  ;;  %v2306_v59 = vsel %vm2075_vm4, %v5784_v7, 0.0  ;;  %v2145_v18 = vmax.f32 %v2143_v48, %v2144_v3  ;;  %v2177_v11 = vrot.slane %v2176_v5, 2 }
 0x4a7   : > { %v4118_v25 = vpop.eup %4117  ;;  %v2276_v27 = vrot.slane %v2275_v56, 1  ;;  %v2307_v30 = vrot.slane %v2306_v59, 4  ;;  %4131 = vpow2.f32 %v2226_v55  ;;  %v2161_v6 = vrot.slane %v2160_v24, 4 }
 0x4a8   : > { %v4120_v31 = vpop.eup %4119  ;;  %v2197_v10 = vsub.f32 %v5737_v44, %v2145_v18  ;;  %v2178_v12 = vmax.f32 %v2176_v5, %v2177_v11  ;;  %v2181_v45 = vsel %vm2075_vm4, %v5789_v28, -inf  ;;  %v5797_v37 = vmul.f32 0.35355338, %v5735_v62 }
 0x4a9   : > { %v4122_v8 = vpop.eup %4121  ;;  %v2277_v46 = vadd.f32 %v2276_v27, %v2275_v56  ;;  %v2308_v40 = vadd.f32 %v2307_v30, %v2306_v59  ;;  %v2162_v19 = vmax.f32 %v2160_v24, %v2161_v6  ;;  %v2182_v20 = vrot.slane %v2181_v45, 4 }
 0x4aa   : > { %v5799_v16 = vpop.eup %4123  ;;  %v2222_v43 = vmul.f32 1.442695, %v2197_v10  ;;  %v2179_v50 = vrot.slane %v2178_v12, 1  ;;  %v2167_v51 = vsel %vm2075_vm4, %v5797_v37, -inf  ;;  %v2364_v41 = vmul.f32 %v4118_v25, %v5745_v14 }
 0x4ab   : > { %4133 = vrcp.f32 %v2277_v46  ;;  %v2309_v44 = vrot.slane %v2308_v40, 2  ;;  %v2292_v52 = vsel %vm2075_vm4, %v5799_v16, 0.0  ;;  %v2163_v33 = vrot.slane %v2162_v19, 2 }
 0x4ac   : > { %v2293_v62 = vrot.slane %v2292_v52, 4  ;;  %4135 = vpow2.f32 %v2222_v43  ;;  %v2180_v22 = vmax.f32 %v2178_v12, %v2179_v50  ;;  %v2183_v57 = vmax.f32 %v2181_v45, %v2182_v20 }
 0x4ad   : > { %v2164_v21 = vmax.f32 %v2162_v19, %v2163_v33  ;;  %v2168_v29 = vrot.slane %v2167_v51, 4  ;;  %v2365_v9 = vmul.f32 %v4122_v8, %v5754_v32  ;;  %v2310_v56 = vadd.f32 %v2309_v44, %v2308_v40 }
 0x4ae   : > { %v4126_v36 = vpop.eup %4125  ;;  %v2294_v48 = vadd.f32 %v2293_v62, %v2292_v52  ;;  %v2202_v49 = vsub.f32 %v5743_v13, %v2180_v22  ;;  %v2184_v1 = vrot.slane %v2183_v57, 2  ;;  %v2367_v18 = vmul.f32 %v4120_v31, %v5750_v26 }
 0x4af   : > { %v4128_v42 = vpop.eup %4127  ;;  %v2165_v55 = vrot.slane %v2164_v21, 1  ;;  %v2169_v34 = vmax.f32 %v2167_v51, %v2168_v29  ;;  %v2380_v3 = vpack.c.bf16 %v2365_v9, %v2364_v41  ;;  %v2366_v32 = vmul.f32 %v4116_v17, %v5739_v4 }
 0x4b0   : > { %v4130_v5 = vpop.eup %4129  ;;  %v2232_v24 = vmul.f32 1.442695, %v2202_v49  ;;  %v2185_v59 = vmax.f32 %v2183_v57, %v2184_v1  ;;  %v2295_v13 = vrot.slane %v2294_v48, 2  ;;  %v2311_v45 = vrot.slane %v2310_v56, 1 }
 0x4b1   : > { %v5809_v11 = vpop.eup %4131  ;;  %v2166_v14 = vmax.f32 %v2164_v21, %v2165_v55  ;;  %v2170_v25 = vrot.slane %v2169_v34, 2  ;;  %3738 = vmatprep.mubr.msk.bf16.mxu0 %vm2075_vm4, %v2380_v3  ;;  %v2381_v31 = vpack.c.bf16 %v2367_v18, %v2366_v32  ;;  %v2368_v8 = vmul.f32 %v4128_v42, %v5764_v60 }
 0x4b2   : > { %v2313_v27 = vsel %vm2075_vm4, %v5809_v11, 0.0  ;;  %4137 = vpow2.f32 %v2232_v24  ;;  %v2186_v30 = vrot.slane %v2185_v59, 1  ;;  %v2371_v4 = vmul.f32 %v4130_v5, %v5768_v0 }
 0x4b3   : > { %v2314_v6 = vrot.slane %v2313_v27, 4  ;;  %v2200_v10 = vsub.f32 %v5782_v53, %v2166_v14  ;;  %v2171_v12 = vmax.f32 %v2169_v34, %v2170_v25  ;;  %v2296_v43 = vadd.f32 %v2295_v13, %v2294_v48  ;;  %3739 = vmatmul.mubr.msk.bf16.vlgmr.msra.gmra.mrb[20].mxu0 %vm2075_vm4, %v2381_v31 }
 0x4b4   : > { %v2187_v26 = vmax.f32 %v2185_v59, %v2186_v30  ;;  %v2370_v51 = vmul.f32 %v4126_v36, %v5761_v58  ;;  %v2312_v33 = vadd.f32 %v2311_v45, %v2310_v56 }
 0x4b5   : > { %v4134_v46 = vpop.eup %4133  ;;  %v2315_v40 = vadd.f32 %v2314_v6, %v2313_v27  ;;  %v2228_v19 = vmul.f32 1.442695, %v2200_v10  ;;  %v2172_v20 = vrot.slane %v2171_v12, 1  ;;  %v2297_v29 = vrot.slane %v2296_v43, 1 }
 0x4b6   : > { %v5818_v17 = vpop.eup %4135  ;;  %v2203_v50 = vsub.f32 %v5789_v28, %v2187_v26  ;;  %v2369_v53 = vmul.f32 %v4134_v46, %v5774_v39  ;;  %v2383_v28 = vpack.c.bf16 %v2371_v4, %v2370_v51 }
 0x4b7   : > { %v2316_v44 = vrot.slane %v2315_v40, 2  ;;  %v2299_v60 = vsel %vm2075_vm4, %v5818_v17, 0.0  ;;  %4139 = vpow2.f32 %v2228_v19  ;;  %v2173_v52 = vmax.f32 %v2171_v12, %v2172_v20 }
 0x4b8   : > { %v2300_v62 = vrot.slane %v2299_v60, 4  ;;  %v2234_v0 = vmul.f32 1.442695, %v2203_v50  ;;  %v2382_v22 = vpack.c.bf16 %v2369_v53, %v2368_v8  ;;  %v2298_v1 = vadd.f32 %v2297_v29, %v2296_v43 }
 0x4b9   : > { %v2317_v57 = vadd.f32 %v2316_v44, %v2315_v40  ;;  %v2201_v21 = vsub.f32 %v5797_v37, %v2173_v52 }
 0x4ba   : > { %v2301_v41 = vadd.f32 %v2300_v62, %v2299_v60  ;;  %4141 = vpow2.f32 %v2234_v0  ;;  %3742 = vmatprep.mubr.msk.bf16.mxu0 %vm2075_vm4, %v2382_v22 }
 0x4bb   : > { %v2318_v58 = vrot.slane %v2317_v57, 1  ;;  %v2230_v39 = vmul.f32 1.442695, %v2201_v21  ;;  %4143 = vrcp.f32 %v2312_v33  ;;  %3743 = vmatmul.mubr.msk.bf16.gmra.mrb[24].mxu0 %vm2075_vm4, %v2383_v28 }
 0x4bc   : > { %v5828_v9 = vpop.eup %4137  ;;  %v2302_v36 = vrot.slane %v2301_v41, 2 }
 0x4bd   : > { %v2319_v48 = vadd.f32 %v2318_v58, %v2317_v57  ;;  %v2334_v49 = vsel %vm2075_vm4, %v5828_v9, 0.0  ;;  %4145 = vpow2.f32 %v2230_v39 }
 0x4be   : > { %v2303_v42 = vadd.f32 %v2302_v36, %v2301_v41  ;;  %v2335_v37 = vrot.slane %v2334_v49, 4 }
 0x4bf   : > { %4147 = vrcp.f32 %v2319_v48 }
 0x4c0   : > { %v2304_v55 = vrot.slane %v2303_v42, 1  ;;  %v2336_v34 = vadd.f32 %v2335_v37, %v2334_v49  ;;  %4149 = vrcp.f32 %v2298_v1  ;;  %v4085_v1 = vld [vmem:[#allocation16] sm:$0xff]  }
 0x4c1   : > { %v4140_v3 = vpop.eup %4139  ;;  %3755 = vmatpush3.bf16.msra.mxu0 %v4085_v1 }
 0x4c2   : > { %v2305_v5 = vadd.f32 %v2304_v55, %v2303_v42  ;;  %v2337_v56 = vrot.slane %v2336_v34, 2  ;;  %v2320_v24 = vsel %vm2075_vm4, %v4140_v3, 0.0  ;;  %3756 = vmatprep.subr.bf16.mxu0 %v4836_v15  ;;  %v4086_v42 = vld [vmem:[#allocation16 + $0x8] sm:$0xff]   ;;  %v2514_v55 = vunpack.c.l.bf16 %v5666_v23 }
 0x4c3   : > { %v2321_v59 = vrot.slane %v2320_v24, 4 }
 0x4c4   : > { %v4142_v18 = vpop.eup %4141  ;;  %4151 = vrcp.f32 %v2305_v5  ;;  %v2338_v14 = vadd.f32 %v2337_v56, %v2336_v34  ;;  %v2517_v5 = vunpack.c.h.bf16 %v5660_v35 }
 0x4c5   : > { %v2322_v25 = vadd.f32 %v2321_v59, %v2320_v24  ;;  %v2341_v32 = vsel %vm2075_vm4, %v4142_v18, 0.0  ;;  %v4144_v13 = vpop.eup %4143  ;;  %3757 = vmatpush3.bf16.msra.mxu0 %v4086_v42  ;;  %v2515_v59 = vunpack.c.h.bf16 %v5666_v23 }
 0x4c6   : > { %v2342_v27 = vrot.slane %v2341_v32, 4  ;;  %v2339_v10 = vrot.slane %v2338_v14, 1  ;;  %v2374_v40 = vmul.f32 %v4144_v13, %v5784_v7  ;;  %3762 = vmatprep.subr.bf16.mxu0 %v4836_v15 }
 0x4c7   : > { %v4146_v30 = vpop.eup %4145  ;;  %v2323_v6 = vrot.slane %v2322_v25, 2 }
 0x4c8   : > { %v2343_v12 = vadd.f32 %v2342_v27, %v2341_v32  ;;  %v2327_v45 = vsel %vm2075_vm4, %v4146_v30, 0.0  ;;  %v2340_v50 = vadd.f32 %v2339_v10, %v2338_v14 }
 0x4c9   : > { %v4148_v26 = vpop.eup %4147  ;;  %v2324_v31 = vadd.f32 %v2323_v6, %v2322_v25  ;;  %v2328_v8 = vrot.slane %v2327_v45, 4 }
 0x4ca   : > { %v2344_v46 = vrot.slane %v2343_v12, 2  ;;  %v2375_v19 = vmul.f32 %v4148_v26, %v5809_v11  ;;  %v4150_v43 = vpop.eup %4149  ;;  %4153 = vrcp.f32 %v2340_v50  ;;  %v2521_v50 = vunpack.c.h.bf16 %v5668_v47 }
 0x4cb   : > { %v2325_v20 = vrot.slane %v2324_v31, 1  ;;  %v2329_v4 = vadd.f32 %v2328_v8, %v2327_v45  ;;  %v2372_v0 = vmul.f32 %v4150_v43, %v5799_v16 }
 0x4cc   : > { %v2345_v53 = vadd.f32 %v2344_v46, %v2343_v12  ;;  %v2385_v51 = vpack.c.bf16 %v2375_v19, %v2374_v40  ;;  %v2518_v40 = vunpack.c.l.bf16 %v5670_v61 }
 0x4cd   : > { %v2330_v44 = vrot.slane %v2329_v4, 2  ;;  %v2326_v33 = vadd.f32 %v2325_v20, %v2324_v31  ;;  %v2520_v31 = vunpack.c.l.bf16 %v5668_v47 }
 0x4ce   : > { %v4152_v60 = vpop.eup %4151  ;;  %v2346_v52 = vrot.slane %v2345_v53, 1 }
 0x4cf   : > { %v2331_v62 = vadd.f32 %v2330_v44, %v2329_v4  ;;  %v2373_v22 = vmul.f32 %v4152_v60, %v5818_v17 }
 0x4d0   : > { %v2347_v57 = vadd.f32 %v2346_v52, %v2345_v53  ;;  %v2519_v52 = vunpack.c.h.bf16 %v5670_v61 }
 0x4d1   : > { %v2332_v7 = vrot.slane %v2331_v62, 1  ;;  %v2384_v21 = vpack.c.bf16 %v2373_v22, %v2372_v0 }
 0x4d2   : > { %4155 = vrcp.f32 %v2347_v57 }
 0x4d3   : > { %4157 = vrcp.f32 %v2326_v33  ;;  %v2333_v11 = vadd.f32 %v2332_v7, %v2331_v62  ;;  %3746 = vmatprep.mubr.msk.bf16.mxu0 %vm2075_vm4, %v2384_v21 }
 0x4d4   : > { %3747 = vmatmul.mubr.msk.bf16.gmra.mrb[28].mxu0 %vm2075_vm4, %v2385_v51  ;;  %v4154_v28 = vpop.eup %4153 }
 0x4d5   : > { %4159 = vrcp.f32 %v2333_v11  ;;  %v2378_v58 = vmul.f32 %v4154_v28, %v5828_v9  ;;  %v2516_v9 = vunpack.c.l.bf16 %v5660_v35 }
 0x4dc   : > { %v4156_v29 = vpop.eup %4155 }
 0x4dd   : > { %v4158_v41 = vpop.eup %4157  ;;  %v2379_v16 = vmul.f32 %v4156_v29, %v4142_v18 }
 0x4de   : > { %v2376_v36 = vmul.f32 %v4158_v41, %v4140_v3 }
 0x4df   : > { %v4160_v39 = vpop.eup %4159  ;;  %v2387_v17 = vpack.c.bf16 %v2379_v16, %v2378_v58 }
 0x4e0   : > { %v2377_v48 = vmul.f32 %v4160_v39, %v4146_v30 }
 0x4e2   : > { %v2386_v49 = vpack.c.bf16 %v2377_v48, %v2376_v36 }
 0x4e4   : > { %3750 = vmatprep.mubr.msk.bf16.mxu0 %vm2075_vm4, %v2386_v49 }
 0x4e5   : > { %3751 = vmatmul.mubr.msk.bf16.gmra.mrb[32].mxu0 %vm2075_vm4, %v2387_v17 }
 0x4e6   : > { %3758 = vmatprep.mubr.msk.bf16.mxu0 %vm4837_vm2, %v4836_v15 }
 0x586   : > { %v3740_v37 = vpop.f32.mrb[20].mxu0 }
 0x587   : > { %v2532_v34 = vmul.f32 %v3740_v37, %v2516_v9  ;;  %v2451_v3 = vpop.f32.mrb[21].mxu0 }
 0x588   : > { %v2530_v56 = vmul.f32 %v2514_v55, %v2451_v3  ;;  %v3741_v24 = vpop.f32.mrb[22].mxu0 }
 0x589   : > { %v2560_v18 = vsel %vm1019_vm0, %v2532_v34, 0.0  ;;  %v2533_v14 = vmul.f32 %v3741_v24, %v2517_v5  ;;  %v2454_v25 = vpop.f32.mrb[23].mxu0 }
 0x58a   : > { %v2561_v32 = vrot.slane %v2560_v18, 4  ;;  %v2546_v13 = vsel %vm1019_vm0, %v2530_v56, 0.0  ;;  %v2531_v27 = vmul.f32 %v2515_v59, %v2454_v25 }
 0x58b   : > { %v2547_v30 = vrot.slane %v2546_v13, 4  ;;  %v2567_v6 = vsel %vm1019_vm0, %v2533_v14, 0.0 }
 0x58c   : > { %v2562_v10 = vadd.f32 %v2561_v32, %v2560_v18  ;;  %v2568_v12 = vrot.slane %v2567_v6, 4  ;;  %v2553_v45 = vsel %vm1019_vm0, %v2531_v27, 0.0 }
 0x58d   : > { %v2548_v35 = vadd.f32 %v2547_v30, %v2546_v13  ;;  %v2554_v26 = vrot.slane %v2553_v45, 4 }
 0x58e   : > { %v2563_v23 = vrot.slane %v2562_v10, 2  ;;  %v2569_v8 = vadd.f32 %v2568_v12, %v2567_v6  ;;  %v3744_v46 = vpop.f32.mrb[24].mxu0 }
 0x58f   : > { %v2549_v19 = vrot.slane %v2548_v35, 2  ;;  %v2555_v20 = vadd.f32 %v2554_v26, %v2553_v45  ;;  %v2536_v4 = vmul.f32 %v3744_v46, %v2520_v31  ;;  %v2467_v43 = vpop.f32.mrb[25].mxu0 }
 0x590   : > { %v2564_v53 = vadd.f32 %v2563_v23, %v2562_v10  ;;  %v2570_v51 = vrot.slane %v2569_v8, 2  ;;  %v2534_v44 = vmul.f32 %v2518_v40, %v2467_v43  ;;  %v3745_v60 = vpop.f32.mrb[26].mxu0 }
 0x591   : > { %v2550_v33 = vadd.f32 %v2549_v19, %v2548_v35  ;;  %v2556_v62 = vrot.slane %v2555_v20, 2  ;;  %v2588_v0 = vsel %vm1019_vm0, %v2536_v4, 0.0  ;;  %v2537_v22 = vmul.f32 %v3745_v60, %v2521_v50  ;;  %v2470_v57 = vpop.f32.mrb[27].mxu0 }
 0x592   : > { %v2565_v7 = vrot.slane %v2564_v53, 1  ;;  %v2571_v21 = vadd.f32 %v2570_v51, %v2569_v8  ;;  %v2589_v11 = vrot.slane %v2588_v0, 4  ;;  %v2574_v28 = vsel %vm1019_vm0, %v2534_v44, 0.0 }
 0x593   : > { %v2551_v29 = vrot.slane %v2550_v33, 1  ;;  %v2557_v41 = vadd.f32 %v2556_v62, %v2555_v20  ;;  %v2575_v47 = vrot.slane %v2574_v28, 4  ;;  %v2595_v58 = vsel %vm1019_vm0, %v2537_v22, 0.0 }
 0x594   : > { %v2566_v16 = vadd.f32 %v2565_v7, %v2564_v53  ;;  %v2572_v39 = vrot.slane %v2571_v21, 1  ;;  %v2590_v17 = vadd.f32 %v2589_v11, %v2588_v0  ;;  %v2596_v61 = vrot.slane %v2595_v58, 4 }
 0x595   : > { %v2552_v36 = vadd.f32 %v2551_v29, %v2550_v33  ;;  %v2558_v48 = vrot.slane %v2557_v41, 1  ;;  %v2576_v49 = vadd.f32 %v2575_v47, %v2574_v28  ;;  %v2535_v1 = vmul.f32 %v2519_v52, %v2470_v57 }
 0x596   : > { %v2573_v42 = vadd.f32 %v2572_v39, %v2571_v21  ;;  %v2591_v9 = vrot.slane %v2590_v17, 2  ;;  %v2597_v37 = vadd.f32 %v2596_v61, %v2595_v58  ;;  %v2660_v56 = vpack.c.bf16 %v2566_v16, %v2566_v16 }
 0x597   : > { %v2658_v55 = vpack.c.bf16 %v2552_v36, %v2552_v36  ;;  %v2559_v34 = vadd.f32 %v2558_v48, %v2557_v41  ;;  %v2577_v3 = vrot.slane %v2576_v49, 2  ;;  %v2581_v5 = vsel %vm1019_vm0, %v2535_v1, 0.0 }
 0x598   : > { %v2661_v24 = vpack.c.bf16 %v2573_v42, %v2573_v42  ;;  %v2592_v59 = vadd.f32 %v2591_v9, %v2590_v17  ;;  %v2598_v18 = vrot.slane %v2597_v37, 2  ;;  %v2582_v32 = vrot.slane %v2581_v5, 4 }
 0x599   : > { %v2659_v14 = vpack.c.bf16 %v2559_v34, %v2559_v34  ;;  %v2578_v25 = vadd.f32 %v2577_v3, %v2576_v49  ;;  %v2694_v27 = vunpack.c.l.b16 %v2658_v55  ;;  %v2696_v12 = vunpack.c.l.b16 %v2660_v56 }
 0x59a   : > { %v2599_v13 = vadd.f32 %v2598_v18, %v2597_v37  ;;  %v2583_v10 = vadd.f32 %v2582_v32, %v2581_v5  ;;  %v2697_v45 = vunpack.c.l.b16 %v2661_v24  ;;  %v2593_v35 = vrot.slane %v2592_v59, 1 }
 0x59b   : > { %v2695_v30 = vunpack.c.l.b16 %v2659_v14  ;;  %v2579_v6 = vrot.slane %v2578_v25, 1  ;;  %v2524_v60 = vunpack.c.l.bf16 %v5672_v38  ;;  %v2522_v62 = vunpack.c.l.bf16 %v5674_v63 }
 0x59c   : > { %v2600_v23 = vrot.slane %v2599_v13, 1  ;;  %v2584_v8 = vrot.slane %v2583_v10, 2  ;;  %v2594_v4 = vadd.f32 %v2593_v35, %v2592_v59  ;;  %v2525_v21 = vunpack.c.h.bf16 %v5672_v38 }
 0x59d   : > { %v2711_v26 = vsel %vm2710_vm5, %v2695_v30, %v2694_v27  ;;  %v2580_v31 = vadd.f32 %v2579_v6, %v2578_v25  ;;  %v2523_v29 = vunpack.c.h.bf16 %v5674_v63 }
 0x59e   : > { %v2713_v46 = vsel %vm2712_vm6, %v2696_v12, %v2711_v26  ;;  %v2585_v20 = vadd.f32 %v2584_v8, %v2583_v10  ;;  %v2601_v50 = vadd.f32 %v2600_v23, %v2599_v13  ;;  %v2664_v52 = vpack.c.bf16 %v2594_v4, %v2594_v4 }
 0x59f   : > { %v2662_v40 = vpack.c.bf16 %v2580_v31, %v2580_v31  ;;  %v2715_v19 = vsel %vm2714_vm7, %v2697_v45, %v2713_v46  ;;  %v2528_v31 = vunpack.c.l.bf16 %v5678_v54 }
 0x5a0   : > { %v2586_v53 = vrot.slane %v2585_v20, 1  ;;  %v2665_v0 = vpack.c.bf16 %v2601_v50, %v2601_v50  ;;  %v2700_v39 = vunpack.c.l.b16 %v2664_v52  ;;  %v2529_v50 = vunpack.c.h.bf16 %v5678_v54 }
 0x5a1   : > { %v2698_v43 = vunpack.c.l.b16 %v2662_v40  ;;  %v2526_v40 = vunpack.c.l.bf16 %v5680_v2 }
 0x5a2   : > { %v2587_v44 = vadd.f32 %v2586_v53, %v2585_v20  ;;  %v2701_v48 = vunpack.c.l.b16 %v2665_v0 }
 0x5a3   : > { %v2717_v51 = vsel %vm2716_vm8, %v2698_v43, %v2715_v19 }
 0x5a4   : > { %v2663_v22 = vpack.c.bf16 %v2587_v44, %v2587_v44 }
 0x5a6   : > { %v2699_v41 = vunpack.c.l.b16 %v2663_v22 }
 0x5a7   : > { %v3748_v33 = vpop.f32.mrb[28].mxu0 }
 0x5a8   : > { %v2540_v57 = vmul.f32 %v3748_v33, %v2524_v60  ;;  %v2483_v7 = vpop.f32.mrb[29].mxu0  ;;  %v2719_v38 = vsel %vm2718_vm9, %v2699_v41, %v2717_v51  ;;  %v2527_v60 = vunpack.c.h.bf16 %v5680_v2 }
 0x5a9   : > { %v2538_v11 = vmul.f32 %v2522_v62, %v2483_v7  ;;  %v3749_v28 = vpop.f32.mrb[30].mxu0  ;;  %v2721_v42 = vsel %vm2720_vm10, %v2700_v39, %v2719_v38 }
 0x5aa   : > { %v2616_v47 = vsel %vm1019_vm0, %v2540_v57, 0.0  ;;  %v2541_v58 = vmul.f32 %v3749_v28, %v2525_v21  ;;  %v2486_v16 = vpop.f32.mrb[31].mxu0  ;;  %v5880_v55 = vsel %vm2722_vm11, %v2701_v48, %v2721_v42 }
 0x5ab   : > { %v2617_v17 = vrot.slane %v2616_v47, 4  ;;  %v2602_v61 = vsel %vm1019_vm0, %v2538_v11, 0.0  ;;  %v2539_v36 = vmul.f32 %v2523_v29, %v2486_v16 }
 0x5ac   : > { %v2603_v49 = vrot.slane %v2602_v61, 4  ;;  %v2623_v1 = vsel %vm1019_vm0, %v2541_v58, 0.0 }
 0x5ad   : > { %v2618_v63 = vadd.f32 %v2617_v17, %v2616_v47  ;;  %v2624_v9 = vrot.slane %v2623_v1, 4  ;;  %v2609_v37 = vsel %vm1019_vm0, %v2539_v36, 0.0 }
 0x5ae   : > { %v2604_v34 = vadd.f32 %v2603_v49, %v2602_v61  ;;  %v2610_v3 = vrot.slane %v2609_v37, 4 }
 0x5af   : > { %v2619_v5 = vrot.slane %v2618_v63, 2  ;;  %v2625_v56 = vadd.f32 %v2624_v9, %v2623_v1 }
 0x5b0   : > { %v2605_v24 = vrot.slane %v2604_v34, 2  ;;  %v2611_v59 = vadd.f32 %v2610_v3, %v2609_v37 }
 0x5b1   : > { %v2620_v18 = vadd.f32 %v2619_v5, %v2618_v63  ;;  %v2626_v14 = vrot.slane %v2625_v56, 2 }
 0x5b2   : > { %v2606_v25 = vadd.f32 %v2605_v24, %v2604_v34  ;;  %v2612_v32 = vrot.slane %v2611_v59, 2 }
 0x5b3   : > { %v2621_v13 = vrot.slane %v2620_v18, 1  ;;  %v2627_v27 = vadd.f32 %v2626_v14, %v2625_v56 }
 0x5b4   : > { %v2607_v30 = vrot.slane %v2606_v25, 1  ;;  %v2613_v6 = vadd.f32 %v2612_v32, %v2611_v59 }
 0x5b5   : > { %v2622_v10 = vadd.f32 %v2621_v13, %v2620_v18  ;;  %v2628_v12 = vrot.slane %v2627_v27, 1 }
 0x5b6   : > { %v2608_v45 = vadd.f32 %v2607_v30, %v2606_v25  ;;  %v2614_v35 = vrot.slane %v2613_v6, 1 }
 0x5b7   : > { %v2629_v26 = vadd.f32 %v2628_v12, %v2627_v27  ;;  %v2668_v19 = vpack.c.bf16 %v2622_v10, %v2622_v10 }
 0x5b8   : > { %v2666_v23 = vpack.c.bf16 %v2608_v45, %v2608_v45  ;;  %v2615_v8 = vadd.f32 %v2614_v35, %v2613_v6  ;;  %v3752_v46 = vpop.f32.mrb[32].mxu0 }
 0x5b9   : > { %v2669_v20 = vpack.c.bf16 %v2629_v26, %v2629_v26  ;;  %v2544_v4 = vmul.f32 %v3752_v46, %v2528_v31  ;;  %v2499_v43 = vpop.f32.mrb[33].mxu0  ;;  %v2704_v11 = vunpack.c.l.b16 %v2668_v19 }
 0x5ba   : > { %v2667_v53 = vpack.c.bf16 %v2615_v8, %v2615_v8  ;;  %v2542_v51 = vmul.f32 %v2526_v40, %v2499_v43  ;;  %v3753_v44 = vpop.f32.mrb[34].mxu0  ;;  %v2702_v52 = vunpack.c.l.b16 %v2666_v23  ;;  %v4169_v40 = vld [vmem:[%s5486_s28] sm:$0xff]  ;;  %v4170_v43 = vld [vmem:[%s5486_s28 + $0x8] sm:$0xff] }
 0x5bb   : > { %v2644_v33 = vsel %vm1019_vm0, %v2544_v4, 0.0  ;;  %v2545_v62 = vmul.f32 %v3753_v44, %v2529_v50  ;;  %v2502_v0 = vpop.f32.mrb[35].mxu0  ;;  %v2705_v28 = vunpack.c.l.b16 %v2669_v20 }
 0x5bc   : > { %v2703_v22 = vunpack.c.l.b16 %v2667_v53  ;;  %v2645_v57 = vrot.slane %v2644_v33, 4  ;;  %v2630_v7 = vsel %vm1019_vm0, %v2542_v51, 0.0  ;;  %v2543_v21 = vmul.f32 %v2527_v60, %v2502_v0 }
 0x5bd   : > { %v2631_v29 = vrot.slane %v2630_v7, 4  ;;  %v2651_v54 = vsel %vm1019_vm0, %v2545_v62, 0.0 }
 0x5be   : > { %v2724_v41 = vsel %vm2710_vm5, %v2703_v22, %v2702_v52  ;;  %v2646_v47 = vadd.f32 %v2645_v57, %v2644_v33  ;;  %v2652_v58 = vrot.slane %v2651_v54, 4  ;;  %v2637_v2 = vsel %vm1019_vm0, %v2543_v21, 0.0 }
 0x5bf   : > { %v2725_v16 = vsel %vm2712_vm6, %v2704_v11, %v2724_v41  ;;  %v2632_v39 = vadd.f32 %v2631_v29, %v2630_v7  ;;  %v2638_v17 = vrot.slane %v2637_v2, 4  ;;  %v4087_v11 = vld [vmem:[#allocation23] sm:$0xff]   ;;  %v4089_v29 = vld [vmem:[#allocation26] sm:$0xff]  }
 0x5c0   : > { %v2647_v61 = vrot.slane %v2646_v47, 2  ;;  %v2726_v36 = vsel %vm2714_vm7, %v2705_v28, %v2725_v16  ;;  %v2653_v48 = vadd.f32 %v2652_v58, %v2651_v54  ;;  %v4088_v28 = vld [vmem:[#allocation23 + $0x8] sm:$0xff]   ;;  %3771 = vmatpush3.bf16.msra.mxu1 %v4089_v29  ;;  %v4090_v54 = vld [vmem:[#allocation26 + $0x8] sm:$0xff]   ;;  %v4093_v58 = vld [vmem:[#allocation26 + $0x20] sm:$0xff]  }
 0x5c1   : > { %v2633_v38 = vrot.slane %v2632_v39, 2  ;;  %v2639_v49 = vadd.f32 %v2638_v17, %v2637_v2  ;;  %3772 = vmatprep.subr.bf16.mxu1 %v4836_v15  ;;  %v4091_v41 = vld [vmem:[#allocation26 + $0x10] sm:$0xff]   ;;  %v4094_v2 = vld [vmem:[#allocation26 + $0x28] sm:$0xff]  }
 0x5c2   : > { %v2648_v1 = vadd.f32 %v2647_v61, %v2646_v47  ;;  %v2654_v42 = vrot.slane %v2653_v48, 2  ;;  %v4092_v47 = vld [vmem:[#allocation26 + $0x18] sm:$0xff]  }
 0x5c3   : > { %v2634_v63 = vadd.f32 %v2633_v38, %v2632_v39  ;;  %v2640_v9 = vrot.slane %v2639_v49, 2 }
 0x5c4   : > { %v2649_v37 = vrot.slane %v2648_v1, 1  ;;  %v2655_v34 = vadd.f32 %v2654_v42, %v2653_v48  ;;  %3773 = vmatpush3.bf16.msra.mxu1 %v4090_v54 }
 0x5c5   : > { %v2635_v3 = vrot.slane %v2634_v63, 1  ;;  %v2641_v5 = vadd.f32 %v2640_v9, %v2639_v49  ;;  %3774 = vmatprep.subr.bf16.mxu1 %v4836_v15 }
 0x5c6   : > { %v2650_v56 = vadd.f32 %v2649_v37, %v2648_v1  ;;  %v2656_v24 = vrot.slane %v2655_v34, 1  ;;  %v3497_v1 = vld [vmem:[#allocation20] ss:$0 sm:$0xff]  ;;  %v3498_v37 = vld [vmem:[#allocation22] ss:$0 sm:$0xff] }
 0x5c7   : > { %v2636_v59 = vadd.f32 %v2635_v3, %v2634_v63  ;;  %v2642_v18 = vrot.slane %v2641_v5, 1 }
 0x5c8   : > { %v2657_v14 = vadd.f32 %v2656_v24, %v2655_v34  ;;  %v2672_v13 = vpack.c.bf16 %v2650_v56, %v2650_v56  ;;  %3775 = vmatpush3.bf16.msra.mxu1 %v4091_v41  ;;  %v4095_v24 = vld [vmem:[#allocation26 + $0x30] sm:$0xff]   ;;  %v3513_v41 = vld [vmem:[#allocation31] ss:$0 sm:$0xff] }
 0x5c9   : > { %v2670_v25 = vpack.c.bf16 %v2636_v59, %v2636_v59  ;;  %v2643_v32 = vadd.f32 %v2642_v18, %v2641_v5  ;;  %3776 = vmatprep.subr.bf16.mxu1 %v4836_v15  ;;  %v4096_v59 = vld [vmem:[#allocation26 + $0x38] sm:$0xff]  }
 0x5ca   : > { %v2673_v30 = vpack.c.bf16 %v2657_v14, %v2657_v14  ;;  %v2708_v45 = vunpack.c.l.b16 %v2672_v13  ;;  %v3499_v18 = vld [vmem:[#allocation25] ss:$0 sm:$0xff] }
 0x5cb   : > { %v2706_v27 = vunpack.c.l.b16 %v2670_v25  ;;  %v2671_v6 = vpack.c.bf16 %v2643_v32, %v2643_v32 }
 0x5cc   : > { %v2709_v35 = vunpack.c.l.b16 %v2673_v30  ;;  %3777 = vmatpush3.bf16.msra.mxu1 %v4092_v47 }
 0x5cd   : > { %v2727_v10 = vsel %vm2716_vm8, %v2706_v27, %v2726_v36  ;;  %v2707_v12 = vunpack.c.l.b16 %v2671_v6  ;;  %3778 = vmatprep.subr.bf16.mxu1 %v4836_v15 }
 0x5cf   : > { %v2728_v26 = vsel %vm2718_vm9, %v2707_v12, %v2727_v10 }
 0x5d0   : > { %v2729_v31 = vsel %vm2720_vm10, %v2708_v45, %v2728_v26  ;;  %3779 = vmatpush3.bf16.msra.mxu1 %v4093_v58  ;;  %v3503_v45 = vld [vmem:[#allocation28] ss:$0 sm:$0xff] }
 0x5d1   : > { %v2730_v23 = vsel %vm2722_vm11, %v2709_v35, %v2729_v31  ;;  %3780 = vmatprep.subr.bf16.mxu1 %v4836_v15 }
 0x5d2   : > { %v2731_v8 = vpack.c.b16 %v2730_v23, %v5880_v55 }
 0x5d4   : > { %3759 = vmatmul.mubr.msk.bf16.vlgmr.msra.gmra.mrb[36].mxu0 %vm1019_vm0, %v2731_v8  ;;  %3781 = vmatpush3.bf16.msra.mxu1 %v4094_v2 }
 0x5d5   : > { %3766 = vmatprep.mubr.msk.bf16.mxu0 %vm4837_vm2, %v4836_v15  ;;  %3763 = vmatpush3.bf16.msra.mxu0 %v4087_v11 }
 0x5d6   : > { %3764 = vmatprep.subr.bf16.mxu0 %v4836_v15  ;;  %3782 = vmatprep.subr.bf16.mxu1 %v4836_v15 }
 0x5d8   : > { %3783 = vmatpush3.bf16.msra.mxu1 %v4095_v24 }
 0x5d9   : > { %3765 = vmatpush3.bf16.msra.mxu0 %v4088_v28  ;;  %3784 = vmatprep.subr.bf16.mxu1 %v4836_v15  ;;  %v3512_v28 = vld [vmem:[#allocation29] ss:$0 sm:$0xff] }
 0x5dc   : > { %3785 = vmatpush3.bf16.msra.mxu1 %v4096_v59 }
 0x6a7   : > { %v2781_v46 = vpop.f32.mrb[36].mxu0 }
 0x6a8   : > { %v2788_v19 = vadd.f32 %v4169_v40, %v2781_v46  ;;  %v3760_v20 = vpop.f32.mrb[37].mxu0 }
 0x6a9   : > { %v2784_v4 = vpop.f32.mrb[38].mxu0 }
 0x6aa   : > { %v2789_v50 = vadd.f32 %v4170_v43, %v2784_v4  ;;  %v3761_v53 = vpop.f32.mrb[39].mxu0  ;;  %v2790_v51 = vsel %vm1019_vm0, %v2788_v19, 0.0 }
 0x6ab   : > { %2791 = vadd.xlane.f32.xlu0 %v2790_v51 }
 0x6ac   : > { %v2793_v44 = vsel %vm1019_vm0, %v2789_v50, 0.0 }
 0x6af   : > { %2794 = vadd.xlane.f32.xlu0 %v2793_v44 }
 0x738   : > { %v2792_v55 = vpop.xlane.xlu0 %2791 }
 0x739   : > { %v2797_v60 = vmul.f32 0.03125, %v2792_v55 }
 0x73b   : > { %v2799_v52 = vsub.f32 %v2788_v19, %v2797_v60 }
 0x73c   : > { %v2795_v33 = vpop.xlane.xlu0 %2794 }
 0x73d   : > { %v2798_v62 = vmul.f32 0.03125, %v2795_v33  ;;  %v2801_v0 = vmul.f32 %v2799_v52, %v2799_v52 }
 0x73f   : > { %v2800_v22 = vsub.f32 %v2789_v50, %v2798_v62  ;;  %v2803_v57 = vsel %vm1019_vm0, %v2801_v0, 0.0 }
 0x740   : > { %2804 = vadd.xlane.f32.xlu1 %v2803_v57 }
 0x741   : > { %v2802_v7 = vmul.f32 %v2800_v22, %v2800_v22 }
 0x743   : > { %v2806_v21 = vsel %vm1019_vm0, %v2802_v7, 0.0 }
 0x744   : > { %2807 = vadd.xlane.f32.xlu1 %v2806_v21 }
 0x7cd   : > { %v2805_v16 = vpop.xlane.xlu1 %2804 }
 0x7ce   : > { %v2809_v39 = vmul.f32 0.03125, %v2805_v16 }
 0x7d0   : > { %v2811_v17 = vadd.f32 1e-06, %v2809_v39 }
 0x7d1   : > { %v2808_v61 = vpop.xlane.xlu1 %2807 }
 0x7d2   : > { %4161 = vrsqrt.f32 %v2811_v17  ;;  %v2810_v36 = vmul.f32 0.03125, %v2808_v61 }
 0x7d4   : > { %v2812_v48 = vadd.f32 1e-06, %v2810_v36 }
 0x7d6   : > { %4163 = vrsqrt.f32 %v2812_v48 }
 0x7dc   : > { %v4162_v38 = vpop.eup %4161 }
 0x7dd   : > { %v2815_v49 = vmul.f32 %v4162_v38, %v2799_v52 }
 0x7df   : > { %v2824_v63 = vmul.f32 %v3497_v1, %v2815_v49 }
 0x7e0   : > { %v4164_v42 = vpop.eup %4163 }
 0x7e1   : > { %v2816_v9 = vmul.f32 %v4164_v42, %v2800_v22  ;;  %v2833_v3 = vadd.f32 %v3498_v37, %v2824_v63 }
 0x7e3   : > { %v2825_v34 = vmul.f32 %v3497_v1, %v2816_v9 }
 0x7e5   : > { %v2834_v5 = vadd.f32 %v3498_v37, %v2825_v34 }
 0x7e7   : > { %v2835_v56 = vpack.c.bf16 %v2834_v5, %v2833_v3 }
 0x7e9   : > { %3767 = vmatmul.mubr.msk.bf16.vlgmr.msra.gmra.mrb[40].mxu0 %vm1019_vm0, %v2835_v56 }
 0x8bc   : > { %v2896_v14 = vpop.f32.mrb[40].mxu0 }
 0x8bd   : > { %v2897_v25 = vadd.f32 %v3499_v18, %v2896_v14  ;;  %v3768_v32 = vpop.f32.mrb[41].mxu0 }
 0x8be   : > { %v2899_v13 = vpop.f32.mrb[42].mxu0 }
 0x8bf   : > { %v2900_v27 = vadd.f32 %v3499_v18, %v2899_v13  ;;  %v3769_v30 = vpop.f32.mrb[43].mxu0  ;;  %v2903_v6 = vmax.f32 %v2897_v25, 0.0 }
 0x8c1   : > { %v2904_v10 = vmax.f32 %v2900_v27, 0.0 }
 0x8c3   : > { %v2905_v12 = vpack.c.bf16 %v2904_v10, %v2903_v6 }
 0x8c5   : > { %3787 = vmatmul.mubr.bf16.vlgmr.msra.gmra.mrb[36].mxu1 %v2905_v12 }
 0x998   : > { %v3011_v35 = vpop.f32.mrb[36].mxu1 }
 0x999   : > { %v3012_v26 = vadd.f32 %v3503_v45, %v3011_v35  ;;  %v3788_v31 = vpop.f32.mrb[37].mxu1 }
 0x99a   : > { %v3014_v23 = vpop.f32.mrb[38].mxu1 }
 0x99b   : > { %v3015_v8 = vadd.f32 %v3503_v45, %v3014_v23  ;;  %v3789_v15 = vpop.f32.mrb[39].mxu1  ;;  %v3018_v46 = vadd.f32 %v3012_v26, %v2833_v3 }
 0x99d   : > { %v3020_v40 = vsel %vm1019_vm0, %v3018_v46, 0.0  ;;  %v3019_v19 = vadd.f32 %v3015_v8, %v2834_v5 }
 0x99e   : > { %3021 = vadd.xlane.f32.xlu0 %v3020_v40 }
 0x99f   : > { %v3023_v20 = vsel %vm1019_vm0, %v3019_v19, 0.0 }
 0x9a0   : > { %3024 = vadd.xlane.f32.xlu1 %v3023_v20 }
 0xa2b   : > { %v3022_v4 = vpop.xlane.xlu0 %3021 }
 0xa2c   : > { %v3026_v43 = vmul.f32 0.03125, %v3022_v4 }
 0xa2d   : > { %v3025_v50 = vpop.xlane.xlu1 %3024 }
 0xa2e   : > { %v3028_v53 = vsub.f32 %v3018_v46, %v3026_v43  ;;  %v3027_v51 = vmul.f32 0.03125, %v3025_v50 }
 0xa30   : > { %v3029_v44 = vsub.f32 %v3019_v19, %v3027_v51  ;;  %v3030_v55 = vmul.f32 %v3028_v53, %v3028_v53 }
 0xa32   : > { %v3032_v60 = vsel %vm1019_vm0, %v3030_v55, 0.0  ;;  %v3031_v52 = vmul.f32 %v3029_v44, %v3029_v44 }
 0xa33   : > { %3033 = vadd.xlane.f32.xlu0 %v3032_v60 }
 0xa34   : > { %v3035_v33 = vsel %vm1019_vm0, %v3031_v52, 0.0 }
 0xa35   : > { %3036 = vadd.xlane.f32.xlu1 %v3035_v33 }
 0xac0   : > { %v3034_v62 = vpop.xlane.xlu0 %3033 }
 0xac1   : > { %v3038_v0 = vmul.f32 0.03125, %v3034_v62 }
 0xac2   : > { %v3037_v22 = vpop.xlane.xlu1 %3036 }
 0xac3   : > { %v3040_v57 = vadd.f32 1e-06, %v3038_v0  ;;  %v3039_v7 = vmul.f32 0.03125, %v3037_v22 }
 0xac5   : > { %4165 = vrsqrt.f32 %v3040_v57  ;;  %v3041_v21 = vadd.f32 1e-06, %v3039_v7 }
 0xac7   : > { %4167 = vrsqrt.f32 %v3041_v21 }
 0xacf   : > { %v4166_v11 = vpop.eup %4165 }
 0xad0   : > { %v3044_v29 = vmul.f32 %v4166_v11, %v3028_v53 }
 0xad1   : > { %v4168_v54 = vpop.eup %4167 }
 0xad2   : > { %v3053_v47 = vmul.f32 %v3512_v28, %v3044_v29  ;;  %v3045_v58 = vmul.f32 %v4168_v54, %v3029_v44 }
 0xad4   : > { %v3062_v2 = vadd.f32 %v3513_v41, %v3053_v47  ;;  %v3054_v16 = vmul.f32 %v3512_v28, %v3045_v58 }
 0xad6   : > { %v3063_v39 = vadd.f32 %v3513_v41, %v3054_v16  ;;  %3064 = vst.msk [vmem:[%s915_s15] sm:$0xff] %vm1019_vm0, %v3062_v2 }
 0xad8   : > { %3065 = vst.msk [vmem:[%s915_s15 + $0x8] sm:$0xff] %vm1019_vm0, %v3063_v39 }
 0xad9   : > { %4722 = shalt.err (!%p4719_p12)
}
 0xada   : > { %s4723_s3 = scalar_lea.hbm %s5926_s18, 256  ;;  %s4727_s29 = scalar_lea.hbm %s6115_s14, 512 }
 0xadb   : > { %p4724_p4 = scmp.ne.s32.totalorder %s5926_s18, %s4723_s3  ;;  %p4728_p2 = scmp.lt.u32.totalorder %s5926_s18, %s6115_s14 }
 0xadc   : > { %p4729_p6 = scmp.lt.u32.totalorder %s4727_s29, %s4723_s3  ;;  %p4731_p0 = scmp.lt.u32.totalorder %s4723_s3, %s5926_s18 }
 0xadd   : > { %p4725_p10 = pnand %p4724_p4, %p6116_p5 }
 0xade   : > { %p4730_p3 = por %p4729_p6, %p4728_p2 }
 0xadf   : > { %p4726_p1 = pneg %p4725_p10 }
 0xae0   : > { %p4732_p9 = por %p4731_p0, %p4730_p3 }
 0xae2   : > { %p4733_p8 = pnand %p4732_p9, %p4726_p1 }
 0xae4   : > { %4736 = shalt.err (!%p4733_p8)
}
 0xae5   : > { %s4840_s16 = smov 128   ;;  %s4841_s9 = smov 8  }
 0xae6   : > { %3897 = dma.vmem_to_hbm [thread:$0]  (%p6116_p5), %s5928_s13, 256, %s5926_s18, %s3067_s2, %s4840_s16, %s4840_s16, %s4841_s9  }
 0xae7 PF: > { %s6117_s19 = sld [smem:[#allocation44_spill]]  ;;  %s6118_s27 = sld [smem:[#allocation49_spill]] }
 0xae8   : > { %p6120_p7 = scmp.ge.s32.totalorder %s4811_s21, 2 }
 0xaed   : > { %s3095_s25 = sand.u32 1, %s6117_s19   ;;  %p6119_p13 = scmp.ne.s32.totalorder %s6118_s27, 0 }
 0xaee   : > { %s3096_s15 = scalar_lea.sflag [#allocation4], %s3095_s25 }
 0xaef   : > { %p3959_p11 = pnand %p6120_p7, %p6119_p13 }
 0xaf1   : > { %4794 = dma.done.wait (!%p3959_p11), %s3096_s15, 256  }
 0xaf2   : > { %4796 = vsyncadd (!%p3959_p11), %s3096_s15, 4294967040  ;;  %s6121_s21 = sld [smem:[#allocation47_spill]]  ;;  %s6122_s11 = sld [smem:[#allocation45_spill]] }
 0xaf3   : > { %s6123_s20 = sld [smem:[#allocation48_spill]]  ;;  %s6124_s0 = smov %s4803_s30 }
 0xaf8   : > { %p43_p12 = scmp.ge.s32.totalorder %s6121_s21, 4   ;;  %s6125_s30 = smov %s6122_s11 }
 0xafa   :  { %45 = sbr.rel (!%p43_p12) target bundleno = 36 (0x24), region = 229 }
 0xb01   :  { %3101 = vsyncpa [#allocation3], 1 }
 0xb02   :  { %3103 = vsyncpa [#allocation3 + $0x1], 1 }
 0xb03   :  { %3104 = vsyncpa [#allocation6], 1 }
 0xb04   :  { %3106 = vsyncpa [#allocation6 + $0x1], 1 }
 0xb05   :  { %3107 = vsyncpa [#allocation9], 1 }
 0xb06   :  { %3108 = vsyncpa [#allocation12], 1 }
 0xb07   :  { %3109 = vsyncpa [#allocation15], 1 }
 0xb08   :  { %3110 = vsyncpa [#allocation18], 1 }
 0xb09   :  { %3111 = vsyncpa [#allocation21], 1 }
 0xb0a   :  { %3112 = vsyncpa [#allocation24], 1 }
 0xb0b   :  { %3113 = vsyncpa [#allocation27], 1 }
 0xb0c   :  { %3114 = vsyncpa [#allocation30], 1 }
 0xb0d   :  { %3115 = vsyncpa [#allocation4], 1 }
 0xb0e   :  { %3117 = vsyncpa [#allocation4 + $0x1], 1 }

</bundles_post_ra>
